<compile_context>
chip_gen: v6e
topology: v6e:2x2x1
jax: 0.10.0
libtpu: 0.0.40
codegen_flags: <defaults>
</compile_context>

<pallas_src>
import functools

import numpy as np
import jax
import jax.numpy as jnp
from jax.experimental import pallas as pl
from jax.experimental.pallas import tpu as pltpu

LOG_2PI = float(np.log(2.0 * np.pi))

# Geometry implied by the module (input must be 80x80 so the conv stack
# flattens to 9*9*16 = 1296 features).
IMG = 80
NCH = 16          # channels of the composed conv (== conv2 out channels)
HO = 9            # conv output is 9x9
HW = HO * HO      # 81 spatial positions
KEFF = 16         # composed kernel size  (6 + (6-1)*2)
SEFF = 8          # composed stride       (2 * 4)
KP = KEFF * KEFF  # 256 patch elements (single input channel)
H1 = 512          # actor(256) || critic(256) layer-1 width
H2 = 128          # actor(64)  || critic(64)  layer-2 width (lane dense)
OUT_LANES = 128   # packed output slab width


def _round_up(x, m):
    return (x + m - 1) // m * m


def _pick_tile(b):
    """Batch-tile size: big enough for real MXU matmuls, small enough that the
    double-buffered bf16 patch tile + resident weights fit comfortably in
    VMEM, and >=2 grid steps when possible (v7x: two TensorCores)."""
    if b >= 256:
        return 128
    if b >= 32:
        return min(128, _round_up((b + 1) // 2, 16))
    return _round_up(b, 16)


# ----------------------------------------------------------------------------
# Fused Pallas kernel: composed conv + actor/critic MLPs + diag-MVN stats.
# ----------------------------------------------------------------------------
def _fused_kernel(pt_ref, act_ref, wc_ref, w1_ref, b1_ref, w2_ref, b2_ref,
                  w3_ref, b3_ref, ivar_ref, dc_ref, out_ref, feat_ref, *,
                  tb, a_dim):
    """One batch tile (TB samples) per grid step; intermediates stay in VMEM."""
    # ---- composite conv (1->16ch, k=16, s=8) as ONE dense MXU matmul -------
    # pt block is (81, TB, 256) hw-major; merging the leading dims is a
    # layout-trivial reshape (TB is a multiple of 16, 256 is lane dense).
    pt = pt_ref[...].reshape(HW * tb, KP)                         # (81*TB,256)
    y = jnp.dot(pt, wc_ref[...],
                preferred_element_type=jnp.float32)               # (81*TB,16)

    # ---- relayout rows (hw, b) -> per-sample feature lanes (hw*16 + c) -----
    # (matches torch's NCHW .view(-1, 1296) once W1 rows are permuted to
    #  (hw, c) order host-side).  81 cheap 16-lane stores into VMEM scratch.
    for h in range(HW):
        feat_ref[:, h * NCH:(h + 1) * NCH] = y[h * tb:(h + 1) * tb, :]
    feat = feat_ref[...].astype(jnp.bfloat16)                     # (TB, 1296)

    # ---- actor || critic layer 1+2 (concatenated / block-diagonal) ---------
    z1 = jnp.dot(feat, w1_ref[...],
                 preferred_element_type=jnp.float32) + b1_ref[...]
    h1 = jnp.tanh(z1)                                             # (TB,512) f32
    h2 = jnp.tanh(jnp.dot(h1, w2_ref[...],
                          preferred_element_type=jnp.float32) + b2_ref[...])

    # ---- fused heads: [actor mean | critic value] in one matmul ------------
    z3 = jnp.dot(h2, w3_ref[...],
                 preferred_element_type=jnp.float32) + b3_ref[...]
    mean = jnp.tanh(z3[:, :a_dim])                                # (TB, A)
    value = z3[:, a_dim:a_dim + 1]                                # (TB, 1)

    # ---- diag-MVN log_prob / entropy (logdet & entropy precomputed host) ---
    diff = act_ref[...] - mean
    maha = jnp.sum(diff * diff * ivar_ref[...], axis=-1, keepdims=True)
    dc = dc_ref[...]                                              # (1, 2)
    logprob = dc[:, 0:1] - 0.5 * maha                             # (TB, 1)
    entropy = dc[:, 1:2]                                          # (1, 1)

    # ---- pack (logprob, value, entropy) into a lane-dense (TB, 128) slab ---
    lane = jax.lax.broadcasted_iota(jnp.int32, (tb, OUT_LANES), 1)
    out_ref[...] = jnp.where(lane == 0, logprob,
                   jnp.where(lane == 1, value,
                   jnp.where(lane == 2, entropy, 0.0)))


# ----------------------------------------------------------------------------
# Host-side glue
# ----------------------------------------------------------------------------
def _extract_patches(x):
    """x: (B, 80, 80) f32 -> bf16 (81, B, 256) with
    pt[9*ho+wo, b, 128*di+16*r+8*dj+s] == x[b, 8*(ho+di)+r, 8*(wo+dj)+s]
    (the composed conv has kernel 16, stride 8)."""
    bsz = x.shape[0]
    xb = x.reshape(bsz, 10, SEFF, 10, SEFF)
    parts = [xb[:, di:di + HO, :, dj:dj + HO, :]        # (B, 9, 8, 9, 8)
             for di in range(2) for dj in range(2)]
    p = jnp.stack(parts, axis=0).reshape(2, 2, bsz, HO, SEFF, HO, SEFF)
    p = p.transpose(3, 5, 2, 0, 4, 1, 6)                # (ho, wo, b, di, r, dj, s)
    return p.reshape(HW, bsz, KP).astype(jnp.bfloat16)


def actor_critic_evaluate(prep, states, actions):
    """states: (..., 1, 80, 80), actions: (..., A) ->
       (action_logprobs[B], state_value[B], dist_entropy[B])."""
    a_dim = actions.shape[-1]
    x = states.reshape(-1, IMG, IMG).astype(jnp.float32)
    actions = actions.reshape(-1, a_dim).astype(jnp.float32)
    bsz = x.shape[0]

    tb = _pick_tile(bsz)
    bp = _round_up(bsz, tb)
    if bp != bsz:                       # pad batch to a whole number of tiles
        x = jnp.pad(x, ((0, bp - bsz), (0, 0), (0, 0)))
        actions = jnp.pad(actions, ((0, bp - bsz), (0, 0)))

    pt = _extract_patches(x)            # (81, bp, 256) bf16, lane-dense K
    # TODO(synk): forming the patches inside the kernel from the raw
    # (TB, 80, 80) states would cut the dominant HBM stream a further ~3x;
    # kept host-side (single fused XLA transpose, bf16) for robust lowering.

    full = lambda shape: pl.BlockSpec(shape, lambda i: (0, 0))
    kernel = functools.partial(_fused_kernel, tb=tb, a_dim=a_dim)
    out = pl.pallas_call(
        kernel,
        out_shape=jax.ShapeDtypeStruct((bp, OUT_LANES), jnp.float32),
        grid=(bp // tb,),
        in_specs=[
            pl.BlockSpec((HW, tb, KP), lambda i: (0, i, 0)),   # patches (tile)
            pl.BlockSpec((tb, a_dim), lambda i: (i, 0)),       # actions (tile)
            full((KP, NCH)),                                   # composed conv w
            full((HW * NCH, H1)),                              # layer-1 w (a||c)
            full((1, H1)),                                     # layer-1 b (+conv2 b)
            full((H1, H2)),                                    # layer-2 w (blockdiag)
            full((1, H2)),                                     # layer-2 b
            full((H2, a_dim + 1)),                             # fused heads w
            full((1, a_dim + 1)),                              # fused heads b
            full((1, a_dim)),                                  # 1 / action_var
            full((1, 2)),                                      # [logprob c0, entropy]
        ],
        out_specs=pl.BlockSpec((tb, OUT_LANES), lambda i: (i, 0)),
        scratch_shapes=[pltpu.VMEM((tb, HW * NCH), jnp.float32)],
        compiler_params=pltpu.CompilerParams(
            dimension_semantics=("parallel",),                 # v7x: both TCs
            vmem_limit_bytes=48 * 1024 * 1024),
    )(pt, actions, prep["wc"], prep["w1"], prep["b1"], prep["w2"], prep["b2"],
      prep["w3"], prep["b3"], prep["inv_var"], prep["dist_const"])
    return out[:bsz, 0], out[:bsz, 1], out[:bsz, 2]


# ----------------------------------------------------------------------------
# One-time parameter preparation (torch layout -> kernel layout)
# ----------------------------------------------------------------------------
def prepare_params(tp):
    """Fold/permute torch-layout params into the fused-kernel layout."""
    g = {k: np.asarray(v, np.float32) for k, v in tp.items()}
    w1c, w2c, b2c = g["conv1_w"], g["conv2_w"], g["conv2_b"]

    # Compose conv2 o conv1 (adjacent linear ops, no activation between them):
    # W_eff[o, 2*kh2+kh1, 2*kw2+kw1] += sum_ci w2[o,ci,kh2,kw2]*w1[ci,0,kh1,kw1]
    w_eff = np.zeros((NCH, KEFF, KEFF), np.float32)
    for kh2 in range(6):
        for kw2 in range(6):
            contrib = np.einsum("oc,chw->ohw", w2c[:, :, kh2, kw2], w1c[:, 0])
            w_eff[:, 2 * kh2:2 * kh2 + 6, 2 * kw2:2 * kw2 + 6] += contrib
    wc = w_eff.reshape(NCH, KP).T                 # (256, 16); K order == patches

    # Actor || critic layer-1, rows permuted from torch's (c, hw) flatten order
    # to the kernel's (hw, c) order.
    w1cat = np.concatenate([g["aw1"].T, g["cw1"].T], axis=1)       # (1296, 512)
    w1 = w1cat.reshape(NCH, HW, H1).transpose(1, 0, 2).reshape(HW * NCH, H1)
    b1cat = np.concatenate([g["ab1"], g["cb1"]])                   # (512,)
    b1 = (b1cat + np.tile(b2c, HW) @ w1).reshape(1, H1)            # fold conv2 b

    w2 = np.zeros((H1, H2), np.float32)           # block-diagonal actor/critic
    w2[:256, :64] = g["aw2"].T
    w2[256:, 64:] = g["cw2"].T
    b2 = np.concatenate([g["ab2"], g["cb2"]]).reshape(1, H2)

    a_dim = g["aw3"].shape[0]
    w3 = np.zeros((H2, a_dim + 1), np.float32)    # fused [mean | value] head
    w3[:64, :a_dim] = g["aw3"].T
    w3[64:, a_dim:] = g["cw3"].T
    b3 = np.concatenate([g["ab3"], g["cb3"]]).reshape(1, a_dim + 1)

    var = g["action_var"]
    inv_var = (1.0 / var).reshape(1, a_dim)
    logdet = float(np.sum(np.log(var)))
    dist_const = np.array([[-0.5 * (a_dim * LOG_2PI + logdet),
                            0.5 * a_dim * (1.0 + LOG_2PI) + 0.5 * logdet]],
                          np.float32)

    return dict(
        wc=jnp.asarray(wc, jnp.bfloat16),         # big streams in bf16,
        w1=jnp.asarray(w1, jnp.bfloat16),         # f32 MXU accumulation
        b1=jnp.asarray(b1, jnp.float32),
        w2=jnp.asarray(w2, jnp.float32),
        b2=jnp.asarray(b2, jnp.float32),
        w3=jnp.asarray(w3, jnp.float32),
        b3=jnp.asarray(b3, jnp.float32),
        inv_var=jnp.asarray(inv_var, jnp.float32),
        dist_const=jnp.asarray(dist_const, jnp.float32),
    )


# ----------------------------------------------------------------------------
# Synthetic parameters in torch layout (Conv2d: (out,in,kh,kw), Linear: (out,in))
# ----------------------------------------------------------------------------
def init_params(key, action_dim, action_std):
    ks = jax.random.split(key, 16)
    size = NCH * HW  # 1296

    def lin(kw, kb, fan_in, fan_out):
        s = 1.0 / np.sqrt(fan_in)
        w = jax.random.uniform(kw, (fan_out, fan_in), jnp.float32, -s, s)
        b = jax.random.uniform(kb, (fan_out,), jnp.float32, -s, s)
        return w, b

    p = {}
    p["conv1_w"] = jax.random.normal(ks[0], (4, 1, 6, 6), jnp.float32) * 0.1
    p["conv2_w"] = jax.random.normal(ks[1], (16, 4, 6, 6), jnp.float32) * 0.05
    p["conv2_b"] = jax.random.normal(ks[2], (16,), jnp.float32) * 0.01
    p["aw1"], p["ab1"] = lin(ks[3], ks[4], size, 256)
    p["aw2"], p["ab2"] = lin(ks[5], ks[6], 256, 64)
    p["aw3"], p["ab3"] = lin(ks[7], ks[8], 64, action_dim)
    p["cw1"], p["cb1"] = lin(ks[9], ks[10], size, 256)
    p["cw2"], p["cb2"] = lin(ks[11], ks[12], 256, 64)
    p["cw3"], p["cb3"] = lin(ks[13], ks[14], 64, 1)
    p["action_var"] = jnp.full((action_dim,), action_std * action_std,
                               jnp.float32)
    return p


# ----------------------------------------------------------------------------
# Faithful two-conv / two-MLP plain-JAX reference for the correctness check
# ----------------------------------------------------------------------------
def reference_evaluate(tp, states, actions):
    bsz = states.shape[0]
    hp = jax.lax.Precision.HIGHEST
    dn = ("NCHW", "OIHW", "NCHW")
    y = jax.lax.conv_general_dilated(states, tp["conv1_w"], (2, 2), "VALID",
                                     dimension_numbers=dn, precision=hp)
    y = jax.lax.conv_general_dilated(y, tp["conv2_w"], (4, 4), "VALID",
                                     dimension_numbers=dn, precision=hp)
    y = y + tp["conv2_b"][None, :, None, None]
    feat = y.reshape(bsz, -1)                     # NCHW flatten == torch .view

    def lin(x, w, b):
        return jnp.dot(x, w.T, precision=hp) + b

    h = jnp.tanh(lin(feat, tp["aw1"], tp["ab1"]))
    h = jnp.tanh(lin(h, tp["aw2"], tp["ab2"]))
    mean = jnp.tanh(lin(h, tp["aw3"], tp["ab3"]))
    c = jnp.tanh(lin(feat, tp["cw1"], tp["cb1"]))
    c = jnp.tanh(lin(c, tp["cw2"], tp["cb2"]))
    value = lin(c, tp["cw3"], tp["cb3"])[:, 0]

    var = tp["action_var"][None, :]
    diff = actions - mean
    maha = jnp.sum(diff * diff / var, axis=-1)
    logdet = jnp.sum(jnp.log(var))
    d = mean.shape[-1]
    logprob = -0.5 * (maha + d * LOG_2PI + logdet)
    entropy = jnp.full((bsz,), 0.5 * d * (1.0 + LOG_2PI) + 0.5 * logdet)
    return logprob, value, entropy


if __name__ == "__main__":
    key = jax.random.PRNGKey(0)
    k_param, k_data = jax.random.split(key)

    action_dim, action_std = 2, 0.5
    torch_params = init_params(k_param, action_dim, action_std)
    prep = prepare_params(torch_params)

    fn = jax.jit(actor_critic_evaluate)

    # batch=2 -> single padded tile; batch=48 -> two grid steps + tail padding.
    for batch in (2, 48):
        ks, ka = jax.random.split(jax.random.fold_in(k_data, batch))
        states = jax.random.normal(ks, (batch, 1, IMG, IMG), jnp.float32)
        actions = jax.random.normal(ka, (batch, action_dim), jnp.float32)

        logprobs, values, entropy = fn(prep, states, actions)
        jax.block_until_ready((logprobs, values, entropy))

        lp_r, val_r, ent_r = reference_evaluate(torch_params, states, actions)
        assert logprobs.shape == (batch,) and values.shape == (batch,)
        assert entropy.shape == (batch,)
        # bf16 patch/weight streams + default MXU matmul precision vs. the
        # HIGHEST-precision f32 reference -> slightly wider tolerance.
        np.testing.assert_allclose(np.asarray(logprobs), np.asarray(lp_r),
                                   rtol=3e-2, atol=3e-2)
        np.testing.assert_allclose(np.asarray(values), np.asarray(val_r),
                                   rtol=3e-2, atol=3e-2)
        np.testing.assert_allclose(np.asarray(entropy), np.asarray(ent_r),
                                   rtol=3e-2, atol=3e-2)
    print("KERNEL_OK")
</pallas_src>

<mosaic_0001>
module attributes {stable_mosaic.version = 11 : i64} {
  func.func @_fused_kernel(%arg0: i32, %arg1: memref<81x16x256xbf16, #tpu.memory_space<vmem>>, %arg2: memref<16x2xf32, #tpu.memory_space<vmem>>, %arg3: memref<256x16xbf16, #tpu.memory_space<vmem>>, %arg4: memref<1296x512xbf16, #tpu.memory_space<vmem>>, %arg5: memref<1x512xf32, #tpu.memory_space<vmem>>, %arg6: memref<512x128xf32, #tpu.memory_space<vmem>>, %arg7: memref<1x128xf32, #tpu.memory_space<vmem>>, %arg8: memref<128x3xf32, #tpu.memory_space<vmem>>, %arg9: memref<1x3xf32, #tpu.memory_space<vmem>>, %arg10: memref<1x2xf32, #tpu.memory_space<vmem>>, %arg11: memref<1x2xf32, #tpu.memory_space<vmem>>, %arg12: memref<16x128xf32, #tpu.memory_space<vmem>>, %arg13: memref<16x1296xf32, #tpu.memory_space<vmem>>) attributes {dimension_semantics = [#tpu.dimension_semantics<parallel>], iteration_bounds = array<i64: 1>, scalar_prefetch = 0 : i64, scratch_operands = 1 : i64, tpu.core_type = #tpu.core_type<tc>, window_params = [{transform_indices = @transform_0, window_bounds = array<i64: 81, 16, 256>}, {transform_indices = @transform_1, window_bounds = array<i64: 16, 2>}, {pipeline_mode = #tpu.pipeline_mode<synchronous>, transform_indices = @transform_2, window_bounds = array<i64: 256, 16>}, {pipeline_mode = #tpu.pipeline_mode<synchronous>, transform_indices = @transform_3, window_bounds = array<i64: 1296, 512>}, {pipeline_mode = #tpu.pipeline_mode<synchronous>, transform_indices = @transform_4, window_bounds = array<i64: 1, 512>}, {pipeline_mode = #tpu.pipeline_mode<synchronous>, transform_indices = @transform_5, window_bounds = array<i64: 512, 128>}, {pipeline_mode = #tpu.pipeline_mode<synchronous>, transform_indices = @transform_6, window_bounds = array<i64: 1, 128>}, {pipeline_mode = #tpu.pipeline_mode<synchronous>, transform_indices = @transform_7, window_bounds = array<i64: 128, 3>}, {pipeline_mode = #tpu.pipeline_mode<synchronous>, transform_indices = @transform_8, window_bounds = array<i64: 1, 3>}, {pipeline_mode = #tpu.pipeline_mode<synchronous>, transform_indices = @transform_9, window_bounds = array<i64: 1, 2>}, {pipeline_mode = #tpu.pipeline_mode<synchronous>, transform_indices = @transform_10, window_bounds = array<i64: 1, 2>}, {transform_indices = @transform_11, window_bounds = array<i64: 16, 128>}]} {
    %c0 = arith.constant 0 : index
    %c0_0 = arith.constant 0 : index
    %c0_1 = arith.constant 0 : index
    %0 = vector.load %arg1[%c0, %c0_0, %c0_1] : memref<81x16x256xbf16, #tpu.memory_space<vmem>>, vector<81x16x256xbf16>
    %1 = vector.shape_cast %0 : vector<81x16x256xbf16> to vector<1296x256xbf16>
    %c0_2 = arith.constant 0 : index
    %c0_3 = arith.constant 0 : index
    %2 = vector.load %arg3[%c0_2, %c0_3] : memref<256x16xbf16, #tpu.memory_space<vmem>>, vector<256x16xbf16>
    %cst = arith.constant dense<0.000000e+00> : vector<1296x16xf32>
    %3 = tpu.matmul %1, %2, %cst {dimension_numbers = #tpu.dot_dimension_numbers<[1], [0], [0], [1], [0, 0, 1, 1], [], []>} : vector<1296x256xbf16>, vector<256x16xbf16>, vector<1296x16xf32> -> vector<1296x16xf32>
    %4 = vector.extract_strided_slice %3 {offsets = [0, 0], sizes = [16, 16], strides = [1, 1]} : vector<1296x16xf32> to vector<16x16xf32>
    %c0_4 = arith.constant 0 : index
    %c0_5 = arith.constant 0 : index
    %5 = vector.load %arg13[%c0_4, %c0_5] : memref<16x1296xf32, #tpu.memory_space<vmem>>, vector<16x16xf32>
    tpu.vector_store %arg13[%c0_4, %c0_5], %4 {strides = array<i32>} : memref<16x1296xf32, #tpu.memory_space<vmem>>, vector<16x16xf32>,
    %6 = vector.extract_strided_slice %3 {offsets = [16, 0], sizes = [16, 16], strides = [1, 1]} : vector<1296x16xf32> to vector<16x16xf32>
    %c0_6 = arith.constant 0 : index
    %c16 = arith.constant 16 : index
    %7 = vector.load %arg13[%c0_6, %c16] : memref<16x1296xf32, #tpu.memory_space<vmem>>, vector<16x16xf32>
    tpu.vector_store %arg13[%c0_6, %c16], %6 {strides = array<i32>} : memref<16x1296xf32, #tpu.memory_space<vmem>>, vector<16x16xf32>,
    %8 = vector.extract_strided_slice %3 {offsets = [32, 0], sizes = [16, 16], strides = [1, 1]} : vector<1296x16xf32> to vector<16x16xf32>
    %c0_7 = arith.constant 0 : index
    %c32 = arith.constant 32 : index
    %9 = vector.load %arg13[%c0_7, %c32] : memref<16x1296xf32, #tpu.memory_space<vmem>>, vector<16x16xf32>
    tpu.vector_store %arg13[%c0_7, %c32], %8 {strides = array<i32>} : memref<16x1296xf32, #tpu.memory_space<vmem>>, vector<16x16xf32>,
    %10 = vector.extract_strided_slice %3 {offsets = [48, 0], sizes = [16, 16], strides = [1, 1]} : vector<1296x16xf32> to vector<16x16xf32>
    %c0_8 = arith.constant 0 : index
    %c48 = arith.constant 48 : index
    %11 = vector.load %arg13[%c0_8, %c48] : memref<16x1296xf32, #tpu.memory_space<vmem>>, vector<16x16xf32>
    tpu.vector_store %arg13[%c0_8, %c48], %10 {strides = array<i32>} : memref<16x1296xf32, #tpu.memory_space<vmem>>, vector<16x16xf32>,
    %12 = vector.extract_strided_slice %3 {offsets = [64, 0], sizes = [16, 16], strides = [1, 1]} : vector<1296x16xf32> to vector<16x16xf32>
    %c0_9 = arith.constant 0 : index
    %c64 = arith.constant 64 : index
    %13 = vector.load %arg13[%c0_9, %c64] : memref<16x1296xf32, #tpu.memory_space<vmem>>, vector<16x16xf32>
    tpu.vector_store %arg13[%c0_9, %c64], %12 {strides = array<i32>} : memref<16x1296xf32, #tpu.memory_space<vmem>>, vector<16x16xf32>,
    %14 = vector.extract_strided_slice %3 {offsets = [80, 0], sizes = [16, 16], strides = [1, 1]} : vector<1296x16xf32> to vector<16x16xf32>
    %c0_10 = arith.constant 0 : index
    %c80 = arith.constant 80 : index
    %15 = vector.load %arg13[%c0_10, %c80] : memref<16x1296xf32, #tpu.memory_space<vmem>>, vector<16x16xf32>
    tpu.vector_store %arg13[%c0_10, %c80], %14 {strides = array<i32>} : memref<16x1296xf32, #tpu.memory_space<vmem>>, vector<16x16xf32>,
    %16 = vector.extract_strided_slice %3 {offsets = [96, 0], sizes = [16, 16], strides = [1, 1]} : vector<1296x16xf32> to vector<16x16xf32>
    %c0_11 = arith.constant 0 : index
    %c96 = arith.constant 96 : index
    %17 = vector.load %arg13[%c0_11, %c96] : memref<16x1296xf32, #tpu.memory_space<vmem>>, vector<16x16xf32>
    tpu.vector_store %arg13[%c0_11, %c96], %16 {strides = array<i32>} : memref<16x1296xf32, #tpu.memory_space<vmem>>, vector<16x16xf32>,
    %18 = vector.extract_strided_slice %3 {offsets = [112, 0], sizes = [16, 16], strides = [1, 1]} : vector<1296x16xf32> to vector<16x16xf32>
    %c0_12 = arith.constant 0 : index
    %c112 = arith.constant 112 : index
    %19 = vector.load %arg13[%c0_12, %c112] : memref<16x1296xf32, #tpu.memory_space<vmem>>, vector<16x16xf32>
    tpu.vector_store %arg13[%c0_12, %c112], %18 {strides = array<i32>} : memref<16x1296xf32, #tpu.memory_space<vmem>>, vector<16x16xf32>,
    %20 = vector.extract_strided_slice %3 {offsets = [128, 0], sizes = [16, 16], strides = [1, 1]} : vector<1296x16xf32> to vector<16x16xf32>
    %c0_13 = arith.constant 0 : index
    %c128 = arith.constant 128 : index
    %21 = vector.load %arg13[%c0_13, %c128] : memref<16x1296xf32, #tpu.memory_space<vmem>>, vector<16x16xf32>
    tpu.vector_store %arg13[%c0_13, %c128], %20 {strides = array<i32>} : memref<16x1296xf32, #tpu.memory_space<vmem>>, vector<16x16xf32>,
    %22 = vector.extract_strided_slice %3 {offsets = [144, 0], sizes = [16, 16], strides = [1, 1]} : vector<1296x16xf32> to vector<16x16xf32>
    %c0_14 = arith.constant 0 : index
    %c144 = arith.constant 144 : index
    %23 = vector.load %arg13[%c0_14, %c144] : memref<16x1296xf32, #tpu.memory_space<vmem>>, vector<16x16xf32>
    tpu.vector_store %arg13[%c0_14, %c144], %22 {strides = array<i32>} : memref<16x1296xf32, #tpu.memory_space<vmem>>, vector<16x16xf32>,
    %24 = vector.extract_strided_slice %3 {offsets = [160, 0], sizes = [16, 16], strides = [1, 1]} : vector<1296x16xf32> to vector<16x16xf32>
    %c0_15 = arith.constant 0 : index
    %c160 = arith.constant 160 : index
    %25 = vector.load %arg13[%c0_15, %c160] : memref<16x1296xf32, #tpu.memory_space<vmem>>, vector<16x16xf32>
    tpu.vector_store %arg13[%c0_15, %c160], %24 {strides = array<i32>} : memref<16x1296xf32, #tpu.memory_space<vmem>>, vector<16x16xf32>,
    %26 = vector.extract_strided_slice %3 {offsets = [176, 0], sizes = [16, 16], strides = [1, 1]} : vector<1296x16xf32> to vector<16x16xf32>
    %c0_16 = arith.constant 0 : index
    %c176 = arith.constant 176 : index
    %27 = vector.load %arg13[%c0_16, %c176] : memref<16x1296xf32, #tpu.memory_space<vmem>>, vector<16x16xf32>
    tpu.vector_store %arg13[%c0_16, %c176], %26 {strides = array<i32>} : memref<16x1296xf32, #tpu.memory_space<vmem>>, vector<16x16xf32>,
    %28 = vector.extract_strided_slice %3 {offsets = [192, 0], sizes = [16, 16], strides = [1, 1]} : vector<1296x16xf32> to vector<16x16xf32>
    %c0_17 = arith.constant 0 : index
    %c192 = arith.constant 192 : index
    %29 = vector.load %arg13[%c0_17, %c192] : memref<16x1296xf32, #tpu.memory_space<vmem>>, vector<16x16xf32>
    tpu.vector_store %arg13[%c0_17, %c192], %28 {strides = array<i32>} : memref<16x1296xf32, #tpu.memory_space<vmem>>, vector<16x16xf32>,
    %30 = vector.extract_strided_slice %3 {offsets = [208, 0], sizes = [16, 16], strides = [1, 1]} : vector<1296x16xf32> to vector<16x16xf32>
    %c0_18 = arith.constant 0 : index
    %c208 = arith.constant 208 : index
    %31 = vector.load %arg13[%c0_18, %c208] : memref<16x1296xf32, #tpu.memory_space<vmem>>, vector<16x16xf32>
    tpu.vector_store %arg13[%c0_18, %c208], %30 {strides = array<i32>} : memref<16x1296xf32, #tpu.memory_space<vmem>>, vector<16x16xf32>,
    %32 = vector.extract_strided_slice %3 {offsets = [224, 0], sizes = [16, 16], strides = [1, 1]} : vector<1296x16xf32> to vector<16x16xf32>
    %c0_19 = arith.constant 0 : index
    %c224 = arith.constant 224 : index
    %33 = vector.load %arg13[%c0_19, %c224] : memref<16x1296xf32, #tpu.memory_space<vmem>>, vector<16x16xf32>
    tpu.vector_store %arg13[%c0_19, %c224], %32 {strides = array<i32>} : memref<16x1296xf32, #tpu.memory_space<vmem>>, vector<16x16xf32>,
    %34 = vector.extract_strided_slice %3 {offsets = [240, 0], sizes = [16, 16], strides = [1, 1]} : vector<1296x16xf32> to vector<16x16xf32>
    %c0_20 = arith.constant 0 : index
    %c240 = arith.constant 240 : index
    %35 = vector.load %arg13[%c0_20, %c240] : memref<16x1296xf32, #tpu.memory_space<vmem>>, vector<16x16xf32>
    tpu.vector_store %arg13[%c0_20, %c240], %34 {strides = array<i32>} : memref<16x1296xf32, #tpu.memory_space<vmem>>, vector<16x16xf32>,
    %36 = vector.extract_strided_slice %3 {offsets = [256, 0], sizes = [16, 16], strides = [1, 1]} : vector<1296x16xf32> to vector<16x16xf32>
    %c0_21 = arith.constant 0 : index
    %c256 = arith.constant 256 : index
    %37 = vector.load %arg13[%c0_21, %c256] : memref<16x1296xf32, #tpu.memory_space<vmem>>, vector<16x16xf32>
    tpu.vector_store %arg13[%c0_21, %c256], %36 {strides = array<i32>} : memref<16x1296xf32, #tpu.memory_space<vmem>>, vector<16x16xf32>,
    %38 = vector.extract_strided_slice %3 {offsets = [272, 0], sizes = [16, 16], strides = [1, 1]} : vector<1296x16xf32> to vector<16x16xf32>
    %c0_22 = arith.constant 0 : index
    %c272 = arith.constant 272 : index
    %39 = vector.load %arg13[%c0_22, %c272] : memref<16x1296xf32, #tpu.memory_space<vmem>>, vector<16x16xf32>
    tpu.vector_store %arg13[%c0_22, %c272], %38 {strides = array<i32>} : memref<16x1296xf32, #tpu.memory_space<vmem>>, vector<16x16xf32>,
    %40 = vector.extract_strided_slice %3 {offsets = [288, 0], sizes = [16, 16], strides = [1, 1]} : vector<1296x16xf32> to vector<16x16xf32>
    %c0_23 = arith.constant 0 : index
    %c288 = arith.constant 288 : index
    %41 = vector.load %arg13[%c0_23, %c288] : memref<16x1296xf32, #tpu.memory_space<vmem>>, vector<16x16xf32>
    tpu.vector_store %arg13[%c0_23, %c288], %40 {strides = array<i32>} : memref<16x1296xf32, #tpu.memory_space<vmem>>, vector<16x16xf32>,
    %42 = vector.extract_strided_slice %3 {offsets = [304, 0], sizes = [16, 16], strides = [1, 1]} : vector<1296x16xf32> to vector<16x16xf32>
    %c0_24 = arith.constant 0 : index
    %c304 = arith.constant 304 : index
    %43 = vector.load %arg13[%c0_24, %c304] : memref<16x1296xf32, #tpu.memory_space<vmem>>, vector<16x16xf32>
    tpu.vector_store %arg13[%c0_24, %c304], %42 {strides = array<i32>} : memref<16x1296xf32, #tpu.memory_space<vmem>>, vector<16x16xf32>,
    %44 = vector.extract_strided_slice %3 {offsets = [320, 0], sizes = [16, 16], strides = [1, 1]} : vector<1296x16xf32> to vector<16x16xf32>
    %c0_25 = arith.constant 0 : index
    %c320 = arith.constant 320 : index
    %45 = vector.load %arg13[%c0_25, %c320] : memref<16x1296xf32, #tpu.memory_space<vmem>>, vector<16x16xf32>
    tpu.vector_store %arg13[%c0_25, %c320], %44 {strides = array<i32>} : memref<16x1296xf32, #tpu.memory_space<vmem>>, vector<16x16xf32>,
    %46 = vector.extract_strided_slice %3 {offsets = [336, 0], sizes = [16, 16], strides = [1, 1]} : vector<1296x16xf32> to vector<16x16xf32>
    %c0_26 = arith.constant 0 : index
    %c336 = arith.constant 336 : index
    %47 = vector.load %arg13[%c0_26, %c336] : memref<16x1296xf32, #tpu.memory_space<vmem>>, vector<16x16xf32>
    tpu.vector_store %arg13[%c0_26, %c336], %46 {strides = array<i32>} : memref<16x1296xf32, #tpu.memory_space<vmem>>, vector<16x16xf32>,
    %48 = vector.extract_strided_slice %3 {offsets = [352, 0], sizes = [16, 16], strides = [1, 1]} : vector<1296x16xf32> to vector<16x16xf32>
    %c0_27 = arith.constant 0 : index
    %c352 = arith.constant 352 : index
    %49 = vector.load %arg13[%c0_27, %c352] : memref<16x1296xf32, #tpu.memory_space<vmem>>, vector<16x16xf32>
    tpu.vector_store %arg13[%c0_27, %c352], %48 {strides = array<i32>} : memref<16x1296xf32, #tpu.memory_space<vmem>>, vector<16x16xf32>,
    %50 = vector.extract_strided_slice %3 {offsets = [368, 0], sizes = [16, 16], strides = [1, 1]} : vector<1296x16xf32> to vector<16x16xf32>
    %c0_28 = arith.constant 0 : index
    %c368 = arith.constant 368 : index
    %51 = vector.load %arg13[%c0_28, %c368] : memref<16x1296xf32, #tpu.memory_space<vmem>>, vector<16x16xf32>
    tpu.vector_store %arg13[%c0_28, %c368], %50 {strides = array<i32>} : memref<16x1296xf32, #tpu.memory_space<vmem>>, vector<16x16xf32>,
    %52 = vector.extract_strided_slice %3 {offsets = [384, 0], sizes = [16, 16], strides = [1, 1]} : vector<1296x16xf32> to vector<16x16xf32>
    %c0_29 = arith.constant 0 : index
    %c384 = arith.constant 384 : index
    %53 = vector.load %arg13[%c0_29, %c384] : memref<16x1296xf32, #tpu.memory_space<vmem>>, vector<16x16xf32>
    tpu.vector_store %arg13[%c0_29, %c384], %52 {strides = array<i32>} : memref<16x1296xf32, #tpu.memory_space<vmem>>, vector<16x16xf32>,
    %54 = vector.extract_strided_slice %3 {offsets = [400, 0], sizes = [16, 16], strides = [1, 1]} : vector<1296x16xf32> to vector<16x16xf32>
    %c0_30 = arith.constant 0 : index
    %c400 = arith.constant 400 : index
    %55 = vector.load %arg13[%c0_30, %c400] : memref<16x1296xf32, #tpu.memory_space<vmem>>, vector<16x16xf32>
    tpu.vector_store %arg13[%c0_30, %c400], %54 {strides = array<i32>} : memref<16x1296xf32, #tpu.memory_space<vmem>>, vector<16x16xf32>,
    %56 = vector.extract_strided_slice %3 {offsets = [416, 0], sizes = [16, 16], strides = [1, 1]} : vector<1296x16xf32> to vector<16x16xf32>
    %c0_31 = arith.constant 0 : index
    %c416 = arith.constant 416 : index
    %57 = vector.load %arg13[%c0_31, %c416] : memref<16x1296xf32, #tpu.memory_space<vmem>>, vector<16x16xf32>
    tpu.vector_store %arg13[%c0_31, %c416], %56 {strides = array<i32>} : memref<16x1296xf32, #tpu.memory_space<vmem>>, vector<16x16xf32>,
    %58 = vector.extract_strided_slice %3 {offsets = [432, 0], sizes = [16, 16], strides = [1, 1]} : vector<1296x16xf32> to vector<16x16xf32>
    %c0_32 = arith.constant 0 : index
    %c432 = arith.constant 432 : index
    %59 = vector.load %arg13[%c0_32, %c432] : memref<16x1296xf32, #tpu.memory_space<vmem>>, vector<16x16xf32>
    tpu.vector_store %arg13[%c0_32, %c432], %58 {strides = array<i32>} : memref<16x1296xf32, #tpu.memory_space<vmem>>, vector<16x16xf32>,
    %60 = vector.extract_strided_slice %3 {offsets = [448, 0], sizes = [16, 16], strides = [1, 1]} : vector<1296x16xf32> to vector<16x16xf32>
    %c0_33 = arith.constant 0 : index
    %c448 = arith.constant 448 : index
    %61 = vector.load %arg13[%c0_33, %c448] : memref<16x1296xf32, #tpu.memory_space<vmem>>, vector<16x16xf32>
    tpu.vector_store %arg13[%c0_33, %c448], %60 {strides = array<i32>} : memref<16x1296xf32, #tpu.memory_space<vmem>>, vector<16x16xf32>,
    %62 = vector.extract_strided_slice %3 {offsets = [464, 0], sizes = [16, 16], strides = [1, 1]} : vector<1296x16xf32> to vector<16x16xf32>
    %c0_34 = arith.constant 0 : index
    %c464 = arith.constant 464 : index
    %63 = vector.load %arg13[%c0_34, %c464] : memref<16x1296xf32, #tpu.memory_space<vmem>>, vector<16x16xf32>
    tpu.vector_store %arg13[%c0_34, %c464], %62 {strides = array<i32>} : memref<16x1296xf32, #tpu.memory_space<vmem>>, vector<16x16xf32>,
    %64 = vector.extract_strided_slice %3 {offsets = [480, 0], sizes = [16, 16], strides = [1, 1]} : vector<1296x16xf32> to vector<16x16xf32>
    %c0_35 = arith.constant 0 : index
    %c480 = arith.constant 480 : index
    %65 = vector.load %arg13[%c0_35, %c480] : memref<16x1296xf32, #tpu.memory_space<vmem>>, vector<16x16xf32>
    tpu.vector_store %arg13[%c0_35, %c480], %64 {strides = array<i32>} : memref<16x1296xf32, #tpu.memory_space<vmem>>, vector<16x16xf32>,
    %66 = vector.extract_strided_slice %3 {offsets = [496, 0], sizes = [16, 16], strides = [1, 1]} : vector<1296x16xf32> to vector<16x16xf32>
    %c0_36 = arith.constant 0 : index
    %c496 = arith.constant 496 : index
    %67 = vector.load %arg13[%c0_36, %c496] : memref<16x1296xf32, #tpu.memory_space<vmem>>, vector<16x16xf32>
    tpu.vector_store %arg13[%c0_36, %c496], %66 {strides = array<i32>} : memref<16x1296xf32, #tpu.memory_space<vmem>>, vector<16x16xf32>,
    %68 = vector.extract_strided_slice %3 {offsets = [512, 0], sizes = [16, 16], strides = [1, 1]} : vector<1296x16xf32> to vector<16x16xf32>
    %c0_37 = arith.constant 0 : index
    %c512 = arith.constant 512 : index
    %69 = vector.load %arg13[%c0_37, %c512] : memref<16x1296xf32, #tpu.memory_space<vmem>>, vector<16x16xf32>
    tpu.vector_store %arg13[%c0_37, %c512], %68 {strides = array<i32>} : memref<16x1296xf32, #tpu.memory_space<vmem>>, vector<16x16xf32>,
    %70 = vector.extract_strided_slice %3 {offsets = [528, 0], sizes = [16, 16], strides = [1, 1]} : vector<1296x16xf32> to vector<16x16xf32>
    %c0_38 = arith.constant 0 : index
    %c528 = arith.constant 528 : index
    %71 = vector.load %arg13[%c0_38, %c528] : memref<16x1296xf32, #tpu.memory_space<vmem>>, vector<16x16xf32>
    tpu.vector_store %arg13[%c0_38, %c528], %70 {strides = array<i32>} : memref<16x1296xf32, #tpu.memory_space<vmem>>, vector<16x16xf32>,
    %72 = vector.extract_strided_slice %3 {offsets = [544, 0], sizes = [16, 16], strides = [1, 1]} : vector<1296x16xf32> to vector<16x16xf32>
    %c0_39 = arith.constant 0 : index
    %c544 = arith.constant 544 : index
    %73 = vector.load %arg13[%c0_39, %c544] : memref<16x1296xf32, #tpu.memory_space<vmem>>, vector<16x16xf32>
    tpu.vector_store %arg13[%c0_39, %c544], %72 {strides = array<i32>} : memref<16x1296xf32, #tpu.memory_space<vmem>>, vector<16x16xf32>,
    %74 = vector.extract_strided_slice %3 {offsets = [560, 0], sizes = [16, 16], strides = [1, 1]} : vector<1296x16xf32> to vector<16x16xf32>
    %c0_40 = arith.constant 0 : index
    %c560 = arith.constant 560 : index
    %75 = vector.load %arg13[%c0_40, %c560] : memref<16x1296xf32, #tpu.memory_space<vmem>>, vector<16x16xf32>
    tpu.vector_store %arg13[%c0_40, %c560], %74 {strides = array<i32>} : memref<16x1296xf32, #tpu.memory_space<vmem>>, vector<16x16xf32>,
    %76 = vector.extract_strided_slice %3 {offsets = [576, 0], sizes = [16, 16], strides = [1, 1]} : vector<1296x16xf32> to vector<16x16xf32>
    %c0_41 = arith.constant 0 : index
    %c576 = arith.constant 576 : index
    %77 = vector.load %arg13[%c0_41, %c576] : memref<16x1296xf32, #tpu.memory_space<vmem>>, vector<16x16xf32>
    tpu.vector_store %arg13[%c0_41, %c576], %76 {strides = array<i32>} : memref<16x1296xf32, #tpu.memory_space<vmem>>, vector<16x16xf32>,
    %78 = vector.extract_strided_slice %3 {offsets = [592, 0], sizes = [16, 16], strides = [1, 1]} : vector<1296x16xf32> to vector<16x16xf32>
    %c0_42 = arith.constant 0 : index
    %c592 = arith.constant 592 : index
    %79 = vector.load %arg13[%c0_42, %c592] : memref<16x1296xf32, #tpu.memory_space<vmem>>, vector<16x16xf32>
    tpu.vector_store %arg13[%c0_42, %c592], %78 {strides = array<i32>} : memref<16x1296xf32, #tpu.memory_space<vmem>>, vector<16x16xf32>,
    %80 = vector.extract_strided_slice %3 {offsets = [608, 0], sizes = [16, 16], strides = [1, 1]} : vector<1296x16xf32> to vector<16x16xf32>
    %c0_43 = arith.constant 0 : index
    %c608 = arith.constant 608 : index
    %81 = vector.load %arg13[%c0_43, %c608] : memref<16x1296xf32, #tpu.memory_space<vmem>>, vector<16x16xf32>
    tpu.vector_store %arg13[%c0_43, %c608], %80 {strides = array<i32>} : memref<16x1296xf32, #tpu.memory_space<vmem>>, vector<16x16xf32>,
    %82 = vector.extract_strided_slice %3 {offsets = [624, 0], sizes = [16, 16], strides = [1, 1]} : vector<1296x16xf32> to vector<16x16xf32>
    %c0_44 = arith.constant 0 : index
    %c624 = arith.constant 624 : index
    %83 = vector.load %arg13[%c0_44, %c624] : memref<16x1296xf32, #tpu.memory_space<vmem>>, vector<16x16xf32>
    tpu.vector_store %arg13[%c0_44, %c624], %82 {strides = array<i32>} : memref<16x1296xf32, #tpu.memory_space<vmem>>, vector<16x16xf32>,
    %84 = vector.extract_strided_slice %3 {offsets = [640, 0], sizes = [16, 16], strides = [1, 1]} : vector<1296x16xf32> to vector<16x16xf32>
    %c0_45 = arith.constant 0 : index
    %c640 = arith.constant 640 : index
    %85 = vector.load %arg13[%c0_45, %c640] : memref<16x1296xf32, #tpu.memory_space<vmem>>, vector<16x16xf32>
    tpu.vector_store %arg13[%c0_45, %c640], %84 {strides = array<i32>} : memref<16x1296xf32, #tpu.memory_space<vmem>>, vector<16x16xf32>,
    %86 = vector.extract_strided_slice %3 {offsets = [656, 0], sizes = [16, 16], strides = [1, 1]} : vector<1296x16xf32> to vector<16x16xf32>
    %c0_46 = arith.constant 0 : index
    %c656 = arith.constant 656 : index
    %87 = vector.load %arg13[%c0_46, %c656] : memref<16x1296xf32, #tpu.memory_space<vmem>>, vector<16x16xf32>
    tpu.vector_store %arg13[%c0_46, %c656], %86 {strides = array<i32>} : memref<16x1296xf32, #tpu.memory_space<vmem>>, vector<16x16xf32>,
    %88 = vector.extract_strided_slice %3 {offsets = [672, 0], sizes = [16, 16], strides = [1, 1]} : vector<1296x16xf32> to vector<16x16xf32>
    %c0_47 = arith.constant 0 : index
    %c672 = arith.constant 672 : index
    %89 = vector.load %arg13[%c0_47, %c672] : memref<16x1296xf32, #tpu.memory_space<vmem>>, vector<16x16xf32>
    tpu.vector_store %arg13[%c0_47, %c672], %88 {strides = array<i32>} : memref<16x1296xf32, #tpu.memory_space<vmem>>, vector<16x16xf32>,
    %90 = vector.extract_strided_slice %3 {offsets = [688, 0], sizes = [16, 16], strides = [1, 1]} : vector<1296x16xf32> to vector<16x16xf32>
    %c0_48 = arith.constant 0 : index
    %c688 = arith.constant 688 : index
    %91 = vector.load %arg13[%c0_48, %c688] : memref<16x1296xf32, #tpu.memory_space<vmem>>, vector<16x16xf32>
    tpu.vector_store %arg13[%c0_48, %c688], %90 {strides = array<i32>} : memref<16x1296xf32, #tpu.memory_space<vmem>>, vector<16x16xf32>,
    %92 = vector.extract_strided_slice %3 {offsets = [704, 0], sizes = [16, 16], strides = [1, 1]} : vector<1296x16xf32> to vector<16x16xf32>
    %c0_49 = arith.constant 0 : index
    %c704 = arith.constant 704 : index
    %93 = vector.load %arg13[%c0_49, %c704] : memref<16x1296xf32, #tpu.memory_space<vmem>>, vector<16x16xf32>
    tpu.vector_store %arg13[%c0_49, %c704], %92 {strides = array<i32>} : memref<16x1296xf32, #tpu.memory_space<vmem>>, vector<16x16xf32>,
    %94 = vector.extract_strided_slice %3 {offsets = [720, 0], sizes = [16, 16], strides = [1, 1]} : vector<1296x16xf32> to vector<16x16xf32>
    %c0_50 = arith.constant 0 : index
    %c720 = arith.constant 720 : index
    %95 = vector.load %arg13[%c0_50, %c720] : memref<16x1296xf32, #tpu.memory_space<vmem>>, vector<16x16xf32>
    tpu.vector_store %arg13[%c0_50, %c720], %94 {strides = array<i32>} : memref<16x1296xf32, #tpu.memory_space<vmem>>, vector<16x16xf32>,
    %96 = vector.extract_strided_slice %3 {offsets = [736, 0], sizes = [16, 16], strides = [1, 1]} : vector<1296x16xf32> to vector<16x16xf32>
    %c0_51 = arith.constant 0 : index
    %c736 = arith.constant 736 : index
    %97 = vector.load %arg13[%c0_51, %c736] : memref<16x1296xf32, #tpu.memory_space<vmem>>, vector<16x16xf32>
    tpu.vector_store %arg13[%c0_51, %c736], %96 {strides = array<i32>} : memref<16x1296xf32, #tpu.memory_space<vmem>>, vector<16x16xf32>,
    %98 = vector.extract_strided_slice %3 {offsets = [752, 0], sizes = [16, 16], strides = [1, 1]} : vector<1296x16xf32> to vector<16x16xf32>
    %c0_52 = arith.constant 0 : index
    %c752 = arith.constant 752 : index
    %99 = vector.load %arg13[%c0_52, %c752] : memref<16x1296xf32, #tpu.memory_space<vmem>>, vector<16x16xf32>
    tpu.vector_store %arg13[%c0_52, %c752], %98 {strides = array<i32>} : memref<16x1296xf32, #tpu.memory_space<vmem>>, vector<16x16xf32>,
    %100 = vector.extract_strided_slice %3 {offsets = [768, 0], sizes = [16, 16], strides = [1, 1]} : vector<1296x16xf32> to vector<16x16xf32>
    %c0_53 = arith.constant 0 : index
    %c768 = arith.constant 768 : index
    %101 = vector.load %arg13[%c0_53, %c768] : memref<16x1296xf32, #tpu.memory_space<vmem>>, vector<16x16xf32>
    tpu.vector_store %arg13[%c0_53, %c768], %100 {strides = array<i32>} : memref<16x1296xf32, #tpu.memory_space<vmem>>, vector<16x16xf32>,
    %102 = vector.extract_strided_slice %3 {offsets = [784, 0], sizes = [16, 16], strides = [1, 1]} : vector<1296x16xf32> to vector<16x16xf32>
    %c0_54 = arith.constant 0 : index
    %c784 = arith.constant 784 : index
    %103 = vector.load %arg13[%c0_54, %c784] : memref<16x1296xf32, #tpu.memory_space<vmem>>, vector<16x16xf32>
    tpu.vector_store %arg13[%c0_54, %c784], %102 {strides = array<i32>} : memref<16x1296xf32, #tpu.memory_space<vmem>>, vector<16x16xf32>,
    %104 = vector.extract_strided_slice %3 {offsets = [800, 0], sizes = [16, 16], strides = [1, 1]} : vector<1296x16xf32> to vector<16x16xf32>
    %c0_55 = arith.constant 0 : index
    %c800 = arith.constant 800 : index
    %105 = vector.load %arg13[%c0_55, %c800] : memref<16x1296xf32, #tpu.memory_space<vmem>>, vector<16x16xf32>
    tpu.vector_store %arg13[%c0_55, %c800], %104 {strides = array<i32>} : memref<16x1296xf32, #tpu.memory_space<vmem>>, vector<16x16xf32>,
    %106 = vector.extract_strided_slice %3 {offsets = [816, 0], sizes = [16, 16], strides = [1, 1]} : vector<1296x16xf32> to vector<16x16xf32>
    %c0_56 = arith.constant 0 : index
    %c816 = arith.constant 816 : index
    %107 = vector.load %arg13[%c0_56, %c816] : memref<16x1296xf32, #tpu.memory_space<vmem>>, vector<16x16xf32>
    tpu.vector_store %arg13[%c0_56, %c816], %106 {strides = array<i32>} : memref<16x1296xf32, #tpu.memory_space<vmem>>, vector<16x16xf32>,
    %108 = vector.extract_strided_slice %3 {offsets = [832, 0], sizes = [16, 16], strides = [1, 1]} : vector<1296x16xf32> to vector<16x16xf32>
    %c0_57 = arith.constant 0 : index
    %c832 = arith.constant 832 : index
    %109 = vector.load %arg13[%c0_57, %c832] : memref<16x1296xf32, #tpu.memory_space<vmem>>, vector<16x16xf32>
    tpu.vector_store %arg13[%c0_57, %c832], %108 {strides = array<i32>} : memref<16x1296xf32, #tpu.memory_space<vmem>>, vector<16x16xf32>,
    %110 = vector.extract_strided_slice %3 {offsets = [848, 0], sizes = [16, 16], strides = [1, 1]} : vector<1296x16xf32> to vector<16x16xf32>
    %c0_58 = arith.constant 0 : index
    %c848 = arith.constant 848 : index
    %111 = vector.load %arg13[%c0_58, %c848] : memref<16x1296xf32, #tpu.memory_space<vmem>>, vector<16x16xf32>
    tpu.vector_store %arg13[%c0_58, %c848], %110 {strides = array<i32>} : memref<16x1296xf32, #tpu.memory_space<vmem>>, vector<16x16xf32>,
    %112 = vector.extract_strided_slice %3 {offsets = [864, 0], sizes = [16, 16], strides = [1, 1]} : vector<1296x16xf32> to vector<16x16xf32>
    %c0_59 = arith.constant 0 : index
    %c864 = arith.constant 864 : index
    %113 = vector.load %arg13[%c0_59, %c864] : memref<16x1296xf32, #tpu.memory_space<vmem>>, vector<16x16xf32>
    tpu.vector_store %arg13[%c0_59, %c864], %112 {strides = array<i32>} : memref<16x1296xf32, #tpu.memory_space<vmem>>, vector<16x16xf32>,
    %114 = vector.extract_strided_slice %3 {offsets = [880, 0], sizes = [16, 16], strides = [1, 1]} : vector<1296x16xf32> to vector<16x16xf32>
    %c0_60 = arith.constant 0 : index
    %c880 = arith.constant 880 : index
    %115 = vector.load %arg13[%c0_60, %c880] : memref<16x1296xf32, #tpu.memory_space<vmem>>, vector<16x16xf32>
    tpu.vector_store %arg13[%c0_60, %c880], %114 {strides = array<i32>} : memref<16x1296xf32, #tpu.memory_space<vmem>>, vector<16x16xf32>,
    %116 = vector.extract_strided_slice %3 {offsets = [896, 0], sizes = [16, 16], strides = [1, 1]} : vector<1296x16xf32> to vector<16x16xf32>
    %c0_61 = arith.constant 0 : index
    %c896 = arith.constant 896 : index
    %117 = vector.load %arg13[%c0_61, %c896] : memref<16x1296xf32, #tpu.memory_space<vmem>>, vector<16x16xf32>
    tpu.vector_store %arg13[%c0_61, %c896], %116 {strides = array<i32>} : memref<16x1296xf32, #tpu.memory_space<vmem>>, vector<16x16xf32>,
    %118 = vector.extract_strided_slice %3 {offsets = [912, 0], sizes = [16, 16], strides = [1, 1]} : vector<1296x16xf32> to vector<16x16xf32>
    %c0_62 = arith.constant 0 : index
    %c912 = arith.constant 912 : index
    %119 = vector.load %arg13[%c0_62, %c912] : memref<16x1296xf32, #tpu.memory_space<vmem>>, vector<16x16xf32>
    tpu.vector_store %arg13[%c0_62, %c912], %118 {strides = array<i32>} : memref<16x1296xf32, #tpu.memory_space<vmem>>, vector<16x16xf32>,
    %120 = vector.extract_strided_slice %3 {offsets = [928, 0], sizes = [16, 16], strides = [1, 1]} : vector<1296x16xf32> to vector<16x16xf32>
    %c0_63 = arith.constant 0 : index
    %c928 = arith.constant 928 : index
    %121 = vector.load %arg13[%c0_63, %c928] : memref<16x1296xf32, #tpu.memory_space<vmem>>, vector<16x16xf32>
    tpu.vector_store %arg13[%c0_63, %c928], %120 {strides = array<i32>} : memref<16x1296xf32, #tpu.memory_space<vmem>>, vector<16x16xf32>,
    %122 = vector.extract_strided_slice %3 {offsets = [944, 0], sizes = [16, 16], strides = [1, 1]} : vector<1296x16xf32> to vector<16x16xf32>
    %c0_64 = arith.constant 0 : index
    %c944 = arith.constant 944 : index
    %123 = vector.load %arg13[%c0_64, %c944] : memref<16x1296xf32, #tpu.memory_space<vmem>>, vector<16x16xf32>
    tpu.vector_store %arg13[%c0_64, %c944], %122 {strides = array<i32>} : memref<16x1296xf32, #tpu.memory_space<vmem>>, vector<16x16xf32>,
    %124 = vector.extract_strided_slice %3 {offsets = [960, 0], sizes = [16, 16], strides = [1, 1]} : vector<1296x16xf32> to vector<16x16xf32>
    %c0_65 = arith.constant 0 : index
    %c960 = arith.constant 960 : index
    %125 = vector.load %arg13[%c0_65, %c960] : memref<16x1296xf32, #tpu.memory_space<vmem>>, vector<16x16xf32>
    tpu.vector_store %arg13[%c0_65, %c960], %124 {strides = array<i32>} : memref<16x1296xf32, #tpu.memory_space<vmem>>, vector<16x16xf32>,
    %126 = vector.extract_strided_slice %3 {offsets = [976, 0], sizes = [16, 16], strides = [1, 1]} : vector<1296x16xf32> to vector<16x16xf32>
    %c0_66 = arith.constant 0 : index
    %c976 = arith.constant 976 : index
    %127 = vector.load %arg13[%c0_66, %c976] : memref<16x1296xf32, #tpu.memory_space<vmem>>, vector<16x16xf32>
    tpu.vector_store %arg13[%c0_66, %c976], %126 {strides = array<i32>} : memref<16x1296xf32, #tpu.memory_space<vmem>>, vector<16x16xf32>,
    %128 = vector.extract_strided_slice %3 {offsets = [992, 0], sizes = [16, 16], strides = [1, 1]} : vector<1296x16xf32> to vector<16x16xf32>
    %c0_67 = arith.constant 0 : index
    %c992 = arith.constant 992 : index
    %129 = vector.load %arg13[%c0_67, %c992] : memref<16x1296xf32, #tpu.memory_space<vmem>>, vector<16x16xf32>
    tpu.vector_store %arg13[%c0_67, %c992], %128 {strides = array<i32>} : memref<16x1296xf32, #tpu.memory_space<vmem>>, vector<16x16xf32>,
    %130 = vector.extract_strided_slice %3 {offsets = [1008, 0], sizes = [16, 16], strides = [1, 1]} : vector<1296x16xf32> to vector<16x16xf32>
    %c0_68 = arith.constant 0 : index
    %c1008 = arith.constant 1008 : index
    %131 = vector.load %arg13[%c0_68, %c1008] : memref<16x1296xf32, #tpu.memory_space<vmem>>, vector<16x16xf32>
    tpu.vector_store %arg13[%c0_68, %c1008], %130 {strides = array<i32>} : memref<16x1296xf32, #tpu.memory_space<vmem>>, vector<16x16xf32>,
    %132 = vector.extract_strided_slice %3 {offsets = [1024, 0], sizes = [16, 16], strides = [1, 1]} : vector<1296x16xf32> to vector<16x16xf32>
    %c0_69 = arith.constant 0 : index
    %c1024 = arith.constant 1024 : index
    %133 = vector.load %arg13[%c0_69, %c1024] : memref<16x1296xf32, #tpu.memory_space<vmem>>, vector<16x16xf32>
    tpu.vector_store %arg13[%c0_69, %c1024], %132 {strides = array<i32>} : memref<16x1296xf32, #tpu.memory_space<vmem>>, vector<16x16xf32>,
    %134 = vector.extract_strided_slice %3 {offsets = [1040, 0], sizes = [16, 16], strides = [1, 1]} : vector<1296x16xf32> to vector<16x16xf32>
    %c0_70 = arith.constant 0 : index
    %c1040 = arith.constant 1040 : index
    %135 = vector.load %arg13[%c0_70, %c1040] : memref<16x1296xf32, #tpu.memory_space<vmem>>, vector<16x16xf32>
    tpu.vector_store %arg13[%c0_70, %c1040], %134 {strides = array<i32>} : memref<16x1296xf32, #tpu.memory_space<vmem>>, vector<16x16xf32>,
    %136 = vector.extract_strided_slice %3 {offsets = [1056, 0], sizes = [16, 16], strides = [1, 1]} : vector<1296x16xf32> to vector<16x16xf32>
    %c0_71 = arith.constant 0 : index
    %c1056 = arith.constant 1056 : index
    %137 = vector.load %arg13[%c0_71, %c1056] : memref<16x1296xf32, #tpu.memory_space<vmem>>, vector<16x16xf32>
    tpu.vector_store %arg13[%c0_71, %c1056], %136 {strides = array<i32>} : memref<16x1296xf32, #tpu.memory_space<vmem>>, vector<16x16xf32>,
    %138 = vector.extract_strided_slice %3 {offsets = [1072, 0], sizes = [16, 16], strides = [1, 1]} : vector<1296x16xf32> to vector<16x16xf32>
    %c0_72 = arith.constant 0 : index
    %c1072 = arith.constant 1072 : index
    %139 = vector.load %arg13[%c0_72, %c1072] : memref<16x1296xf32, #tpu.memory_space<vmem>>, vector<16x16xf32>
    tpu.vector_store %arg13[%c0_72, %c1072], %138 {strides = array<i32>} : memref<16x1296xf32, #tpu.memory_space<vmem>>, vector<16x16xf32>,
    %140 = vector.extract_strided_slice %3 {offsets = [1088, 0], sizes = [16, 16], strides = [1, 1]} : vector<1296x16xf32> to vector<16x16xf32>
    %c0_73 = arith.constant 0 : index
    %c1088 = arith.constant 1088 : index
    %141 = vector.load %arg13[%c0_73, %c1088] : memref<16x1296xf32, #tpu.memory_space<vmem>>, vector<16x16xf32>
    tpu.vector_store %arg13[%c0_73, %c1088], %140 {strides = array<i32>} : memref<16x1296xf32, #tpu.memory_space<vmem>>, vector<16x16xf32>,
    %142 = vector.extract_strided_slice %3 {offsets = [1104, 0], sizes = [16, 16], strides = [1, 1]} : vector<1296x16xf32> to vector<16x16xf32>
    %c0_74 = arith.constant 0 : index
    %c1104 = arith.constant 1104 : index
    %143 = vector.load %arg13[%c0_74, %c1104] : memref<16x1296xf32, #tpu.memory_space<vmem>>, vector<16x16xf32>
    tpu.vector_store %arg13[%c0_74, %c1104], %142 {strides = array<i32>} : memref<16x1296xf32, #tpu.memory_space<vmem>>, vector<16x16xf32>,
    %144 = vector.extract_strided_slice %3 {offsets = [1120, 0], sizes = [16, 16], strides = [1, 1]} : vector<1296x16xf32> to vector<16x16xf32>
    %c0_75 = arith.constant 0 : index
    %c1120 = arith.constant 1120 : index
    %145 = vector.load %arg13[%c0_75, %c1120] : memref<16x1296xf32, #tpu.memory_space<vmem>>, vector<16x16xf32>
    tpu.vector_store %arg13[%c0_75, %c1120], %144 {strides = array<i32>} : memref<16x1296xf32, #tpu.memory_space<vmem>>, vector<16x16xf32>,
    %146 = vector.extract_strided_slice %3 {offsets = [1136, 0], sizes = [16, 16], strides = [1, 1]} : vector<1296x16xf32> to vector<16x16xf32>
    %c0_76 = arith.constant 0 : index
    %c1136 = arith.constant 1136 : index
    %147 = vector.load %arg13[%c0_76, %c1136] : memref<16x1296xf32, #tpu.memory_space<vmem>>, vector<16x16xf32>
    tpu.vector_store %arg13[%c0_76, %c1136], %146 {strides = array<i32>} : memref<16x1296xf32, #tpu.memory_space<vmem>>, vector<16x16xf32>,
    %148 = vector.extract_strided_slice %3 {offsets = [1152, 0], sizes = [16, 16], strides = [1, 1]} : vector<1296x16xf32> to vector<16x16xf32>
    %c0_77 = arith.constant 0 : index
    %c1152 = arith.constant 1152 : index
    %149 = vector.load %arg13[%c0_77, %c1152] : memref<16x1296xf32, #tpu.memory_space<vmem>>, vector<16x16xf32>
    tpu.vector_store %arg13[%c0_77, %c1152], %148 {strides = array<i32>} : memref<16x1296xf32, #tpu.memory_space<vmem>>, vector<16x16xf32>,
    %150 = vector.extract_strided_slice %3 {offsets = [1168, 0], sizes = [16, 16], strides = [1, 1]} : vector<1296x16xf32> to vector<16x16xf32>
    %c0_78 = arith.constant 0 : index
    %c1168 = arith.constant 1168 : index
    %151 = vector.load %arg13[%c0_78, %c1168] : memref<16x1296xf32, #tpu.memory_space<vmem>>, vector<16x16xf32>
    tpu.vector_store %arg13[%c0_78, %c1168], %150 {strides = array<i32>} : memref<16x1296xf32, #tpu.memory_space<vmem>>, vector<16x16xf32>,
    %152 = vector.extract_strided_slice %3 {offsets = [1184, 0], sizes = [16, 16], strides = [1, 1]} : vector<1296x16xf32> to vector<16x16xf32>
    %c0_79 = arith.constant 0 : index
    %c1184 = arith.constant 1184 : index
    %153 = vector.load %arg13[%c0_79, %c1184] : memref<16x1296xf32, #tpu.memory_space<vmem>>, vector<16x16xf32>
    tpu.vector_store %arg13[%c0_79, %c1184], %152 {strides = array<i32>} : memref<16x1296xf32, #tpu.memory_space<vmem>>, vector<16x16xf32>,
    %154 = vector.extract_strided_slice %3 {offsets = [1200, 0], sizes = [16, 16], strides = [1, 1]} : vector<1296x16xf32> to vector<16x16xf32>
    %c0_80 = arith.constant 0 : index
    %c1200 = arith.constant 1200 : index
    %155 = vector.load %arg13[%c0_80, %c1200] : memref<16x1296xf32, #tpu.memory_space<vmem>>, vector<16x16xf32>
    tpu.vector_store %arg13[%c0_80, %c1200], %154 {strides = array<i32>} : memref<16x1296xf32, #tpu.memory_space<vmem>>, vector<16x16xf32>,
    %156 = vector.extract_strided_slice %3 {offsets = [1216, 0], sizes = [16, 16], strides = [1, 1]} : vector<1296x16xf32> to vector<16x16xf32>
    %c0_81 = arith.constant 0 : index
    %c1216 = arith.constant 1216 : index
    %157 = vector.load %arg13[%c0_81, %c1216] : memref<16x1296xf32, #tpu.memory_space<vmem>>, vector<16x16xf32>
    tpu.vector_store %arg13[%c0_81, %c1216], %156 {strides = array<i32>} : memref<16x1296xf32, #tpu.memory_space<vmem>>, vector<16x16xf32>,
    %158 = vector.extract_strided_slice %3 {offsets = [1232, 0], sizes = [16, 16], strides = [1, 1]} : vector<1296x16xf32> to vector<16x16xf32>
    %c0_82 = arith.constant 0 : index
    %c1232 = arith.constant 1232 : index
    %159 = vector.load %arg13[%c0_82, %c1232] : memref<16x1296xf32, #tpu.memory_space<vmem>>, vector<16x16xf32>
    tpu.vector_store %arg13[%c0_82, %c1232], %158 {strides = array<i32>} : memref<16x1296xf32, #tpu.memory_space<vmem>>, vector<16x16xf32>,
    %160 = vector.extract_strided_slice %3 {offsets = [1248, 0], sizes = [16, 16], strides = [1, 1]} : vector<1296x16xf32> to vector<16x16xf32>
    %c0_83 = arith.constant 0 : index
    %c1248 = arith.constant 1248 : index
    %161 = vector.load %arg13[%c0_83, %c1248] : memref<16x1296xf32, #tpu.memory_space<vmem>>, vector<16x16xf32>
    tpu.vector_store %arg13[%c0_83, %c1248], %160 {strides = array<i32>} : memref<16x1296xf32, #tpu.memory_space<vmem>>, vector<16x16xf32>,
    %162 = vector.extract_strided_slice %3 {offsets = [1264, 0], sizes = [16, 16], strides = [1, 1]} : vector<1296x16xf32> to vector<16x16xf32>
    %c0_84 = arith.constant 0 : index
    %c1264 = arith.constant 1264 : index
    %163 = vector.load %arg13[%c0_84, %c1264] : memref<16x1296xf32, #tpu.memory_space<vmem>>, vector<16x16xf32>
    tpu.vector_store %arg13[%c0_84, %c1264], %162 {strides = array<i32>} : memref<16x1296xf32, #tpu.memory_space<vmem>>, vector<16x16xf32>,
    %164 = vector.extract_strided_slice %3 {offsets = [1280, 0], sizes = [16, 16], strides = [1, 1]} : vector<1296x16xf32> to vector<16x16xf32>
    %c0_85 = arith.constant 0 : index
    %c1280 = arith.constant 1280 : index
    %165 = vector.load %arg13[%c0_85, %c1280] : memref<16x1296xf32, #tpu.memory_space<vmem>>, vector<16x16xf32>
    tpu.vector_store %arg13[%c0_85, %c1280], %164 {strides = array<i32>} : memref<16x1296xf32, #tpu.memory_space<vmem>>, vector<16x16xf32>,
    %c0_86 = arith.constant 0 : index
    %c0_87 = arith.constant 0 : index
    %166 = vector.load %arg13[%c0_86, %c0_87] : memref<16x1296xf32, #tpu.memory_space<vmem>>, vector<16x1296xf32>
    %167 = arith.truncf %166 : vector<16x1296xf32> to vector<16x1296xbf16>
    %c0_88 = arith.constant 0 : index
    %c0_89 = arith.constant 0 : index
    %168 = vector.load %arg4[%c0_88, %c0_89] : memref<1296x512xbf16, #tpu.memory_space<vmem>>, vector<1296x512xbf16>
    %cst_90 = arith.constant dense<0.000000e+00> : vector<16x512xf32>
    %169 = tpu.matmul %167, %168, %cst_90 {dimension_numbers = #tpu.dot_dimension_numbers<[1], [0], [0], [1], [0, 0, 1, 1], [], []>} : vector<16x1296xbf16>, vector<1296x512xbf16>, vector<16x512xf32> -> vector<16x512xf32>
    %c0_91 = arith.constant 0 : index
    %c0_92 = arith.constant 0 : index
    %170 = vector.load %arg5[%c0_91, %c0_92] : memref<1x512xf32, #tpu.memory_space<vmem>>, vector<1x512xf32>
    %171 = vector.broadcast %170 : vector<1x512xf32> to vector<16x512xf32>
    %172 = arith.addf %169, %171 : vector<16x512xf32>
    %173 = math.tanh %172 : vector<16x512xf32>
    %c0_93 = arith.constant 0 : index
    %c0_94 = arith.constant 0 : index
    %174 = vector.load %arg6[%c0_93, %c0_94] : memref<512x128xf32, #tpu.memory_space<vmem>>, vector<512x128xf32>
    %cst_95 = arith.constant dense<0.000000e+00> : vector<16x128xf32>
    %175 = tpu.matmul %173, %174, %cst_95 {dimension_numbers = #tpu.dot_dimension_numbers<[1], [0], [0], [1], [0, 0, 1, 1], [], []>} : vector<16x512xf32>, vector<512x128xf32>, vector<16x128xf32> -> vector<16x128xf32>
    %c0_96 = arith.constant 0 : index
    %c0_97 = arith.constant 0 : index
    %176 = vector.load %arg7[%c0_96, %c0_97] : memref<1x128xf32, #tpu.memory_space<vmem>>, vector<1x128xf32>
    %177 = vector.broadcast %176 : vector<1x128xf32> to vector<16x128xf32>
    %178 = arith.addf %175, %177 : vector<16x128xf32>
    %179 = math.tanh %178 : vector<16x128xf32>
    %c0_98 = arith.constant 0 : index
    %c0_99 = arith.constant 0 : index
    %180 = vector.load %arg8[%c0_98, %c0_99] : memref<128x3xf32, #tpu.memory_space<vmem>>, vector<128x3xf32>
    %cst_100 = arith.constant dense<0.000000e+00> : vector<16x3xf32>
    %181 = tpu.matmul %179, %180, %cst_100 {dimension_numbers = #tpu.dot_dimension_numbers<[1], [0], [0], [1], [0, 0, 1, 1], [], []>} : vector<16x128xf32>, vector<128x3xf32>, vector<16x3xf32> -> vector<16x3xf32>
    %c0_101 = arith.constant 0 : index
    %c0_102 = arith.constant 0 : index
    %182 = vector.load %arg9[%c0_101, %c0_102] : memref<1x3xf32, #tpu.memory_space<vmem>>, vector<1x3xf32>
    %183 = vector.broadcast %182 : vector<1x3xf32> to vector<16x3xf32>
    %184 = arith.addf %181, %183 : vector<16x3xf32>
    %185 = vector.extract_strided_slice %184 {offsets = [0, 0], sizes = [16, 2], strides = [1, 1]} : vector<16x3xf32> to vector<16x2xf32>
    %186 = math.tanh %185 : vector<16x2xf32>
    %187 = vector.extract_strided_slice %184 {offsets = [0, 2], sizes = [16, 1], strides = [1, 1]} : vector<16x3xf32> to vector<16x1xf32>
    %c0_103 = arith.constant 0 : index
    %c0_104 = arith.constant 0 : index
    %188 = vector.load %arg2[%c0_103, %c0_104] : memref<16x2xf32, #tpu.memory_space<vmem>>, vector<16x2xf32>
    %189 = arith.subf %188, %186 : vector<16x2xf32>
    %190 = arith.mulf %189, %189 : vector<16x2xf32>
    %c0_105 = arith.constant 0 : index
    %c0_106 = arith.constant 0 : index
    %191 = vector.load %arg10[%c0_105, %c0_106] : memref<1x2xf32, #tpu.memory_space<vmem>>, vector<1x2xf32>
    %192 = vector.broadcast %191 : vector<1x2xf32> to vector<16x2xf32>
    %193 = arith.mulf %190, %192 : vector<16x2xf32>
    %cst_107 = arith.constant dense<0.000000e+00> : vector<16xf32>
    %194 = vector.multi_reduction <add>, %193, %cst_107 [1] : vector<16x2xf32> to vector<16xf32>
    %195 = vector.shape_cast %194 : vector<16xf32> to vector<16x1xf32>
    %c0_108 = arith.constant 0 : index
    %c0_109 = arith.constant 0 : index
    %196 = vector.load %arg11[%c0_108, %c0_109] : memref<1x2xf32, #tpu.memory_space<vmem>>, vector<1x2xf32>
    %197 = vector.extract_strided_slice %196 {offsets = [0, 0], sizes = [1, 1], strides = [1, 1]} : vector<1x2xf32> to vector<1x1xf32>
    %cst_110 = arith.constant 5.000000e-01 : f32
    %198 = vector.broadcast %cst_110 : f32 to vector<16x1xf32>
    %199 = arith.mulf %198, %195 : vector<16x1xf32>
    %200 = vector.broadcast %197 : vector<1x1xf32> to vector<16x1xf32>
    %201 = arith.subf %200, %199 : vector<16x1xf32>
    %202 = vector.extract_strided_slice %196 {offsets = [0, 1], sizes = [1, 1], strides = [1, 1]} : vector<1x2xf32> to vector<1x1xf32>
    %203 = tpu.iota {dimensions = array<i32: 1>} : vector<16x128xi32>
    %c0_i32 = arith.constant 0 : i32
    %204 = vector.broadcast %c0_i32 : i32 to vector<16x128xi32>
    %205 = arith.cmpi eq, %203, %204 : vector<16x128xi32>
    %c1_i32 = arith.constant 1 : i32
    %206 = vector.broadcast %c1_i32 : i32 to vector<16x128xi32>
    %207 = arith.cmpi eq, %203, %206 : vector<16x128xi32>
    %c2_i32 = arith.constant 2 : i32
    %208 = vector.broadcast %c2_i32 : i32 to vector<16x128xi32>
    %209 = arith.cmpi eq, %203, %208 : vector<16x128xi32>
    %cst_111 = arith.constant 0.000000e+00 : f32
    %210 = vector.shape_cast %202 : vector<1x1xf32> to vector<1x1xf32>
    %211 = vector.broadcast %210 : vector<1x1xf32> to vector<16x128xf32>
    %212 = vector.broadcast %cst_111 : f32 to vector<16x128xf32>
    %213 = arith.select %209, %211, %212 : vector<16x128xi1>, vector<16x128xf32>
    %214 = vector.shape_cast %187 : vector<16x1xf32> to vector<16x1xf32>
    %215 = vector.broadcast %214 : vector<16x1xf32> to vector<16x128xf32>
    %216 = arith.select %207, %215, %213 : vector<16x128xi1>, vector<16x128xf32>
    %217 = vector.shape_cast %201 : vector<16x1xf32> to vector<16x1xf32>
    %218 = vector.broadcast %217 : vector<16x1xf32> to vector<16x128xf32>
    %219 = arith.select %205, %218, %216 : vector<16x128xi1>, vector<16x128xf32>
    %c0_112 = arith.constant 0 : index
    %c0_113 = arith.constant 0 : index
    %220 = vector.load %arg12[%c0_112, %c0_113] : memref<16x128xf32, #tpu.memory_space<vmem>>, vector<16x128xf32>
    tpu.vector_store %arg12[%c0_112, %c0_113], %219 {strides = array<i32>} : memref<16x128xf32, #tpu.memory_space<vmem>>, vector<16x128xf32>,
    return
  }
  func.func @transform_0(%arg0: i32) -> (i32, i32, i32) {
    %c0_i32 = arith.constant 0 : i32
    %c0_i32_0 = arith.constant 0 : i32
    %c0_i32_1 = arith.constant 0 : i32
    return %c0_i32, %arg0, %c0_i32_0 : i32, i32, i32
  }
  func.func @transform_1(%arg0: i32) -> (i32, i32) {
    %c0_i32 = arith.constant 0 : i32
    %c0_i32_0 = arith.constant 0 : i32
    return %arg0, %c0_i32 : i32, i32
  }
  func.func @transform_2(%arg0: i32) -> (i32, i32) {
    %c0_i32 = arith.constant 0 : i32
    %c0_i32_0 = arith.constant 0 : i32
    %c0_i32_1 = arith.constant 0 : i32
    return %c0_i32, %c0_i32_0 : i32, i32
  }
  func.func @transform_3(%arg0: i32) -> (i32, i32) {
    %c0_i32 = arith.constant 0 : i32
    %c0_i32_0 = arith.constant 0 : i32
    %c0_i32_1 = arith.constant 0 : i32
    return %c0_i32, %c0_i32_0 : i32, i32
  }
  func.func @transform_4(%arg0: i32) -> (i32, i32) {
    %c0_i32 = arith.constant 0 : i32
    %c0_i32_0 = arith.constant 0 : i32
    %c0_i32_1 = arith.constant 0 : i32
    return %c0_i32, %c0_i32_0 : i32, i32
  }
  func.func @transform_5(%arg0: i32) -> (i32, i32) {
    %c0_i32 = arith.constant 0 : i32
    %c0_i32_0 = arith.constant 0 : i32
    %c0_i32_1 = arith.constant 0 : i32
    return %c0_i32, %c0_i32_0 : i32, i32
  }
  func.func @transform_6(%arg0: i32) -> (i32, i32) {
    %c0_i32 = arith.constant 0 : i32
    %c0_i32_0 = arith.constant 0 : i32
    %c0_i32_1 = arith.constant 0 : i32
    return %c0_i32, %c0_i32_0 : i32, i32
  }
  func.func @transform_7(%arg0: i32) -> (i32, i32) {
    %c0_i32 = arith.constant 0 : i32
    %c0_i32_0 = arith.constant 0 : i32
    %c0_i32_1 = arith.constant 0 : i32
    return %c0_i32, %c0_i32_0 : i32, i32
  }
  func.func @transform_8(%arg0: i32) -> (i32, i32) {
    %c0_i32 = arith.constant 0 : i32
    %c0_i32_0 = arith.constant 0 : i32
    %c0_i32_1 = arith.constant 0 : i32
    return %c0_i32, %c0_i32_0 : i32, i32
  }
  func.func @transform_9(%arg0: i32) -> (i32, i32) {
    %c0_i32 = arith.constant 0 : i32
    %c0_i32_0 = arith.constant 0 : i32
    %c0_i32_1 = arith.constant 0 : i32
    return %c0_i32, %c0_i32_0 : i32, i32
  }
  func.func @transform_10(%arg0: i32) -> (i32, i32) {
    %c0_i32 = arith.constant 0 : i32
    %c0_i32_0 = arith.constant 0 : i32
    %c0_i32_1 = arith.constant 0 : i32
    return %c0_i32, %c0_i32_0 : i32, i32
  }
  func.func @transform_11(%arg0: i32) -> (i32, i32) {
    %c0_i32 = arith.constant 0 : i32
    %c0_i32_0 = arith.constant 0 : i32
    return %arg0, %c0_i32 : i32, i32
  }
}

</mosaic_0001>

<bundles_post_ra>
// kernel: actor_critic_evaluate.1
= control target key start
LH: loop header
LB: loop body
LE: loop exit
PB: predicated region body
PF: predicated region fallthrough
CT: control target
= control target key end

     0   :  { %v6891_v0 = vmov 0   ;;  %vm1820_vm0 = vcmask 130048   ;;  %s6892_s19 = smov 16   ;;  %s6893_s23 = smov 32   ;;  %vm1831_vm1 = vcmask 261248   ;;  %vm1842_vm2 = vcmask 392448   ;;  %s9207_s2 = inlined_call_operand.vmem [shape: bf16[256,16], index: 2, kind: input, shape index: {}]   ;;  %s9208_s0 = inlined_call_operand.vmem [shape: bf16[81,16,256], index: 0, kind: input, shape index: {}]   ;;  %s9209_s3 = inlined_call_operand.vmem [shape: bf16[1296,512], index: 3, kind: input, shape index: {}]   ;;  %s9210_s5 = inlined_call_operand.vmem [shape: f32[512,128], index: 5, kind: input, shape index: {}]   ;;  %s9211_s4 = inlined_call_operand.vmem [shape: f32[1,512], index: 4, kind: input, shape index: {}]   ;;  %s9212_s7 = inlined_call_operand.vmem [shape: f32[128,3], index: 7, kind: input, shape index: {}]   ;;  %s9213_s6 = inlined_call_operand.vmem [shape: f32[1,128], index: 6, kind: input, shape index: {}]   ;;  %s9214_s8 = inlined_call_operand.vmem [shape: f32[1,3], index: 8, kind: input, shape index: {}]   ;;  %s9215_s1 = inlined_call_operand.vmem [shape: f32[16,2], index: 1, kind: input, shape index: {}]   ;;  %s9216_s9 = inlined_call_operand.vmem [shape: f32[1,2], index: 9, kind: input, shape index: {}]   ;;  %s9217_s10 = inlined_call_operand.vmem [shape: f32[1,2], index: 10, kind: input, shape index: {}]   ;;  %s9218_s11 = inlined_call_operand.vmem [shape: f32[16,128], index: 11, kind: output, shape index: {}]  }
   0x1   :  { %1139 = vmatprep.subr.bf16.mxu0 %v6891_v0  ;;  %v6123_v1 = vld [vmem:[%s9207_s2 + $0x38] sm:$0xff]   ;;  %v6124_v2 = vld [vmem:[%s9207_s2 + $0x30] sm:$0xff]   ;;  %v6125_v3 = vld [vmem:[%s9207_s2 + $0x28] sm:$0xff]   ;;  %s6894_s28 = smov 48   ;;  %s6895_s14 = smov 64   ;;  %vm1853_vm3 = vcmask 523648  }
   0x2   :  { %1140 = vmatpush1.bf16.msra.mxu0 %v6123_v1  ;;  %v6126_v4 = vld [vmem:[%s9207_s2 + $0x20] sm:$0xff]   ;;  %v6127_v5 = vld [vmem:[%s9207_s2 + $0x18] sm:$0xff]   ;;  %v6128_v7 = vld [vmem:[%s9207_s2 + $0x10] sm:$0xff]   ;;  %s6896_s20 = smov 80   ;;  %s6897_s25 = smov 96   ;;  %vm1864_vm4 = vcmask 654848  }
   0x3   :  { %1141 = vmatprep.subr.bf16.mxu0 %v6891_v0  ;;  %v6141_v6 = vld [vmem:[%s9208_s0 + $0x4] ss:$8 sps:$4 sm:$0xff]   ;;  %v6131_v10 = vld [vmem:[%s9207_s2 + $0x78] sm:$0xff]   ;;  %v6132_v11 = vld [vmem:[%s9207_s2 + $0x70] sm:$0xff]   ;;  %s6898_s26 = smov 112   ;;  %vm1875_vm5 = vcmask 786048  }
   0x4   :  { %1171 = vmatprep.mubr.bf16.mxu0 %v6141_v6  ;;  %v6129_v8 = vld [vmem:[%s9207_s2 + $0x8] sm:$0xff]   ;;  %v6130_v9 = vld [vmem:[%s9207_s2] sm:$0xff]   ;;  %v6135_v14 = vld [vmem:[%s9207_s2 + $0x58] sm:$0xff]   ;;  %vm1886_vm6 = vcmask 917248   ;;  %vm1897_vm7 = vcmask 1048448   ;;  %vm5414_vm8 = vcmask 15360  }
   0x5   :  { %v6133_v12 = vld [vmem:[%s9207_s2 + $0x68] sm:$0xff]   ;;  %v6134_v13 = vld [vmem:[%s9207_s2 + $0x60] sm:$0xff]   ;;  %v6136_v15 = vld [vmem:[%s9207_s2 + $0x50] sm:$0xff]  }
   0x6   :  { %1142 = vmatpush1.bf16.msra.mxu0 %v6124_v2  ;;  %v6137_v16 = vld [vmem:[%s9207_s2 + $0x48] sm:$0xff]   ;;  %v6138_v17 = vld [vmem:[%s9207_s2 + $0x40] sm:$0xff]   ;;  %v6142_v19 = vld [vmem:[%s9208_s0 + $0x14] ss:$8 sps:$4 sm:$0xff]  }
   0x7   :  { %1143 = vmatprep.subr.bf16.mxu0 %v6891_v0  ;;  %v6139_v18 = vld [vmem:[%s9208_s0] ss:$8 sps:$4 sm:$0xff]   ;;  %v6144_v20 = vld [vmem:[%s9208_s0 + $0x10] ss:$8 sps:$4 sm:$0xff]   ;;  %v6145_v21 = vld [vmem:[%s9208_s0 + $0x24] ss:$8 sps:$4 sm:$0xff]  }
   0x8   :  { %v6147_v22 = vld [vmem:[%s9208_s0 + $0x20] ss:$8 sps:$4 sm:$0xff]   ;;  %v6148_v23 = vld [vmem:[%s9208_s0 + $0x34] ss:$8 sps:$4 sm:$0xff]   ;;  %v6150_v24 = vld [vmem:[%s9208_s0 + $0x30] ss:$8 sps:$4 sm:$0xff]  }
   0x9   :  { %v6151_v25 = vld [vmem:[%s9208_s0 + $0x44] ss:$8 sps:$4 sm:$0xff]   ;;  %v6153_v26 = vld [vmem:[%s9208_s0 + $0x40] ss:$8 sps:$4 sm:$0xff]   ;;  %v6154_v27 = vld [vmem:[%s9208_s0 + $0x54] ss:$8 sps:$4 sm:$0xff]  }
   0xa   :  { %1144 = vmatpush1.bf16.msra.mxu0 %v6125_v3  ;;  %v6156_v28 = vld [vmem:[%s9208_s0 + $0x50] ss:$8 sps:$4 sm:$0xff]   ;;  %v6157_v29 = vld [vmem:[%s9208_s0 + $0x64] ss:$8 sps:$4 sm:$0xff]   ;;  %v6159_v30 = vld [vmem:[%s9208_s0 + $0x60] ss:$8 sps:$4 sm:$0xff]  }
   0xb   :  { %1145 = vmatprep.subr.bf16.mxu0 %v6891_v0  ;;  %v6160_v31 = vld [vmem:[%s9208_s0 + $0x74] ss:$8 sps:$4 sm:$0xff]   ;;  %v6162_v32 = vld [vmem:[%s9208_s0 + $0x70] ss:$8 sps:$4 sm:$0xff]   ;;  %v6163_v33 = vld [vmem:[%s9208_s0 + $0x84] ss:$8 sps:$4 sm:$0xff]  }
   0xc   :  { %v6165_v34 = vld [vmem:[%s9208_s0 + $0x80] ss:$8 sps:$4 sm:$0xff]   ;;  %v6166_v35 = vld [vmem:[%s9208_s0 + $0x94] ss:$8 sps:$4 sm:$0xff]   ;;  %v6168_v36 = vld [vmem:[%s9208_s0 + $0x90] ss:$8 sps:$4 sm:$0xff]  }
   0xd   :  { %v6169_v37 = vld [vmem:[%s9208_s0 + $0xa4] ss:$8 sps:$4 sm:$0xff]   ;;  %v6171_v38 = vld [vmem:[%s9208_s0 + $0xa0] ss:$8 sps:$4 sm:$0xff]   ;;  %v6172_v39 = vld [vmem:[%s9208_s0 + $0xb4] ss:$8 sps:$4 sm:$0xff]  }
   0xe   :  { %1146 = vmatpush1.bf16.msra.mxu0 %v6126_v4  ;;  %v6174_v40 = vld [vmem:[%s9208_s0 + $0xb0] ss:$8 sps:$4 sm:$0xff]   ;;  %v6175_v41 = vld [vmem:[%s9208_s0 + $0xc4] ss:$8 sps:$4 sm:$0xff]   ;;  %v6177_v42 = vld [vmem:[%s9208_s0 + $0xc0] ss:$8 sps:$4 sm:$0xff]  }
   0xf   :  { %1147 = vmatprep.subr.bf16.mxu0 %v6891_v0  ;;  %v6178_v43 = vld [vmem:[%s9208_s0 + $0xd4] ss:$8 sps:$4 sm:$0xff]   ;;  %v6180_v44 = vld [vmem:[%s9208_s0 + $0xd0] ss:$8 sps:$4 sm:$0xff]   ;;  %v6181_v45 = vld [vmem:[%s9208_s0 + $0xe4] ss:$8 sps:$4 sm:$0xff]  }
  0x10   :  { %v6183_v46 = vld [vmem:[%s9208_s0 + $0xe0] ss:$8 sps:$4 sm:$0xff]   ;;  %v6184_v47 = vld [vmem:[%s9208_s0 + $0xf4] ss:$8 sps:$4 sm:$0xff]   ;;  %v6186_v48 = vld [vmem:[%s9208_s0 + $0xf0] ss:$8 sps:$4 sm:$0xff]  }
  0x11   :  { %v6187_v49 = vld [vmem:[%s9208_s0 + $0x104] ss:$8 sps:$4 sm:$0xff]   ;;  %v6189_v50 = vld [vmem:[%s9208_s0 + $0x100] ss:$8 sps:$4 sm:$0xff]   ;;  %v6190_v51 = vld [vmem:[%s9208_s0 + $0x114] ss:$8 sps:$4 sm:$0xff]  }
  0x12   :  { %1148 = vmatpush1.bf16.msra.mxu0 %v6127_v5  ;;  %v6192_v52 = vld [vmem:[%s9208_s0 + $0x110] ss:$8 sps:$4 sm:$0xff]   ;;  %v6193_v53 = vld [vmem:[%s9208_s0 + $0x124] ss:$8 sps:$4 sm:$0xff]   ;;  %v6195_v54 = vld [vmem:[%s9208_s0 + $0x120] ss:$8 sps:$4 sm:$0xff]  }
  0x13   :  { %1149 = vmatprep.subr.bf16.mxu0 %v6891_v0  ;;  %v6196_v55 = vld [vmem:[%s9208_s0 + $0x134] ss:$8 sps:$4 sm:$0xff]   ;;  %v6198_v56 = vld [vmem:[%s9208_s0 + $0x130] ss:$8 sps:$4 sm:$0xff]   ;;  %v6199_v57 = vld [vmem:[%s9208_s0 + $0x144] ss:$8 sps:$4 sm:$0xff]  }
  0x14   :  { %v6201_v58 = vld [vmem:[%s9208_s0 + $0x140] ss:$8 sps:$4 sm:$0xff]   ;;  %v6202_v59 = vld [vmem:[%s9208_s0 + $0x154] ss:$8 sps:$4 sm:$0xff]   ;;  %v6204_v60 = vld [vmem:[%s9208_s0 + $0x150] ss:$8 sps:$4 sm:$0xff]  }
  0x15   :  { %v6205_v61 = vld [vmem:[%s9208_s0 + $0x164] ss:$8 sps:$4 sm:$0xff]   ;;  %v6207_v62 = vld [vmem:[%s9208_s0 + $0x160] ss:$8 sps:$4 sm:$0xff]   ;;  %v6208_v63 = vld [vmem:[%s9208_s0 + $0x174] ss:$8 sps:$4 sm:$0xff]  }
  0x16   :  { %1150 = vmatpush1.bf16.msra.mxu0 %v6128_v7  ;;  %v6210_v1 = vld [vmem:[%s9208_s0 + $0x170] ss:$8 sps:$4 sm:$0xff]   ;;  %v6211_v2 = vld [vmem:[%s9208_s0 + $0x184] ss:$8 sps:$4 sm:$0xff]   ;;  %v6213_v6 = vld [vmem:[%s9208_s0 + $0x194] ss:$8 sps:$4 sm:$0xff]  }
  0x17   :  { %1151 = vmatprep.subr.bf16.mxu0 %v6891_v0  ;;  %v87_v3 = vld [vmem:[%s9208_s0 + $0x180] sm:$0xff]  ;;  %v88_v4 = vld [vmem:[%s9208_s0 + $0x188] sm:$0xff] }
  0x18   :  { %v5520_v5 = vcombine.low %v87_v3, %v88_v4 }
  0x1a   :  { %1152 = vmatpush1.bf16.msra.mxu0 %v6129_v8 }
  0x1b   :  { %1153 = vmatprep.subr.bf16.mxu0 %v6891_v0 }
  0x1e   :  { %1154 = vmatpush1.bf16.msra.mxu0 %v6130_v9 }
  0x1f   :  { %1155 = vmatprep.subr.bf16.mxu0 %v6891_v0 }
  0x22   :  { %1156 = vmatpush2.bf16.msra.mxu0 %v6131_v10  ;;  %v6215_v10 = vld [vmem:[%s9208_s0 + $0x190] ss:$8 sps:$4 sm:$0xff]  }
  0x23   :  { %1157 = vmatprep.subr.bf16.mxu0 %v6891_v0 }
  0x26   :  { %1158 = vmatpush2.bf16.msra.mxu0 %v6132_v11  ;;  %v6216_v11 = vld [vmem:[%s9208_s0 + $0x1a4] ss:$8 sps:$4 sm:$0xff]  }
  0x27   :  { %1159 = vmatprep.subr.bf16.mxu0 %v6891_v0 }
  0x2a   :  { %1160 = vmatpush2.bf16.msra.mxu0 %v6133_v12 }
  0x2b   :  { %1161 = vmatprep.subr.bf16.mxu0 %v6891_v0 }
  0x2e   :  { %1162 = vmatpush2.bf16.msra.mxu0 %v6134_v13 }
  0x2f   :  { %1163 = vmatprep.subr.bf16.mxu0 %v6891_v0 }
  0x32   :  { %1164 = vmatpush2.bf16.msra.mxu0 %v6135_v14 }
  0x33   :  { %1165 = vmatprep.subr.bf16.mxu0 %v6891_v0 }
  0x36   :  { %1166 = vmatpush2.bf16.msra.mxu0 %v6136_v15 }
  0x37   :  { %1167 = vmatprep.subr.bf16.mxu0 %v6891_v0 }
  0x3a   :  { %1168 = vmatpush2.bf16.msra.mxu0 %v6137_v16  ;;  %v6218_v16 = vld [vmem:[%s9208_s0 + $0x1a0] ss:$8 sps:$4 sm:$0xff]  }
  0x3b   :  { %1169 = vmatprep.subr.bf16.mxu0 %v6891_v0 }
  0x3e   :  { %1170 = vmatpush2.bf16.msra.mxu0 %v6138_v17  ;;  %v6219_v17 = vld [vmem:[%s9208_s0 + $0x1b4] ss:$8 sps:$4 sm:$0xff]  }
  0x41   :  { %1172 = vmatmul.mubr.bf16.vlgmr.msra.gmra.mxu0 %v6139_v18 }
  0x42   :  { %1179 = vmatprep.mubr.bf16.mxu0 %v6142_v19 }
  0x49   :  { %1180 = vmatmul.mubr.bf16.gmra.mxu0 %v6144_v20 }
  0x4a   :  { %1187 = vmatprep.mubr.bf16.mxu0 %v6145_v21 }
  0x51   :  { %1188 = vmatmul.mubr.bf16.gmra.mxu0 %v6147_v22  ;;  %v6221_v22 = vld [vmem:[%s9208_s0 + $0x1b0] ss:$8 sps:$4 sm:$0xff]  }
  0x52   :  { %1195 = vmatprep.mubr.bf16.mxu0 %v6148_v23  ;;  %v6224_v23 = vld [vmem:[%s9208_s0 + $0x1c4] ss:$8 sps:$4 sm:$0xff]  }
  0x59   :  { %1196 = vmatmul.mubr.bf16.gmra.mxu0 %v6150_v24 }
  0x5a   :  { %1203 = vmatprep.mubr.bf16.mxu0 %v6151_v25 }
  0x61   :  { %1204 = vmatmul.mubr.bf16.gmra.mxu0 %v6153_v26 }
  0x62   :  { %1211 = vmatprep.mubr.bf16.mxu0 %v6154_v27 }
  0x69   :  { %1212 = vmatmul.mubr.bf16.gmra.mxu0 %v6156_v28  ;;  %v6222_v28 = vld [vmem:[%s9208_s0 + $0x1c0] ss:$8 sps:$4 sm:$0xff]  }
  0x6a   :  { %1219 = vmatprep.mubr.bf16.mxu0 %v6157_v29  ;;  %v6227_v29 = vld [vmem:[%s9208_s0 + $0x1d4] ss:$8 sps:$4 sm:$0xff]  }
  0x71   :  { %1220 = vmatmul.mubr.bf16.gmra.mxu0 %v6159_v30 }
  0x72   :  { %1227 = vmatprep.mubr.bf16.mxu0 %v6160_v31 }
  0x79   :  { %1228 = vmatmul.mubr.bf16.gmra.mxu0 %v6162_v32 }
  0x7a   :  { %1235 = vmatprep.mubr.bf16.mxu0 %v6163_v33 }
  0x81   :  { %1236 = vmatmul.mubr.bf16.gmra.mxu0 %v6165_v34  ;;  %v6225_v34 = vld [vmem:[%s9208_s0 + $0x1d0] ss:$8 sps:$4 sm:$0xff]  }
  0x82   :  { %1243 = vmatprep.mubr.bf16.mxu0 %v6166_v35  ;;  %v6230_v35 = vld [vmem:[%s9208_s0 + $0x1e4] ss:$8 sps:$4 sm:$0xff]  }
  0x89   :  { %1244 = vmatmul.mubr.bf16.gmra.mxu0 %v6168_v36 }
  0x8a   :  { %1251 = vmatprep.mubr.bf16.mxu0 %v6169_v37 }
  0x91   :  { %1252 = vmatmul.mubr.bf16.gmra.mxu0 %v6171_v38 }
  0x92   :  { %1259 = vmatprep.mubr.bf16.mxu0 %v6172_v39 }
  0x99   :  { %1260 = vmatmul.mubr.bf16.gmra.mxu0 %v6174_v40  ;;  %v6228_v40 = vld [vmem:[%s9208_s0 + $0x1e0] ss:$8 sps:$4 sm:$0xff]  }
  0x9a   :  { %1267 = vmatprep.mubr.bf16.mxu0 %v6175_v41  ;;  %v6233_v41 = vld [vmem:[%s9208_s0 + $0x1f4] ss:$8 sps:$4 sm:$0xff]  }
  0xa1   :  { %1268 = vmatmul.mubr.bf16.gmra.mxu0 %v6177_v42 }
  0xa2   :  { %1275 = vmatprep.mubr.bf16.mxu0 %v6178_v43 }
  0xa9   :  { %1276 = vmatmul.mubr.bf16.gmra.mxu0 %v6180_v44 }
  0xaa   :  { %1283 = vmatprep.mubr.bf16.mxu0 %v6181_v45 }
  0xb1   :  { %1284 = vmatmul.mubr.bf16.gmra.mxu0 %v6183_v46  ;;  %v6231_v46 = vld [vmem:[%s9208_s0 + $0x1f0] ss:$8 sps:$4 sm:$0xff]  }
  0xb2   :  { %1291 = vmatprep.mubr.bf16.mxu0 %v6184_v47  ;;  %v6236_v47 = vld [vmem:[%s9208_s0 + $0x204] ss:$8 sps:$4 sm:$0xff]  }
  0xb9   :  { %1292 = vmatmul.mubr.bf16.gmra.mxu0 %v6186_v48 }
  0xba   :  { %1299 = vmatprep.mubr.bf16.mxu0 %v6187_v49 }
  0xc1   :  { %1300 = vmatmul.mubr.bf16.gmra.mxu0 %v6189_v50 }
  0xc2   :  { %1307 = vmatprep.mubr.bf16.mxu0 %v6190_v51  ;;  %v6234_v51 = vld [vmem:[%s9208_s0 + $0x200] ss:$8 sps:$4 sm:$0xff]  }
  0xc9   :  { %1308 = vmatmul.mubr.bf16.gmra.mxu0 %v6192_v52 }
  0xca   :  { %1315 = vmatprep.mubr.bf16.mxu0 %v6193_v53  ;;  %v6282_v53 = vld [vmem:[%s9209_s3 + $0xe4] ss:$16 sps:$4 sm:$0xff]  }
  0xcb   :  { %4552 = vmatprep.subr.bf16.mxu1 %v6282_v53  ;;  %v6257_v53 = vld [vmem:[%s9208_s0 + $0x274] ss:$8 sps:$4 sm:$0xff]  }
  0xd1   :  { %1316 = vmatmul.mubr.bf16.gmra.mxu0 %v6195_v54  ;;  %v6239_v54 = vld [vmem:[%s9208_s0 + $0x214] ss:$8 sps:$4 sm:$0xff]  }
  0xd2   :  { %1323 = vmatprep.mubr.bf16.mxu0 %v6196_v55  ;;  %v6284_v55 = vld [vmem:[%s9209_s3 + $0xe0] ss:$16 sps:$4 sm:$0xff]  }
  0xd3   :  { %4553 = vmatpush1.bf16.msra.mxu1 %v6284_v55 }
  0xd9   :  { %1324 = vmatmul.mubr.bf16.gmra.mxu0 %v6198_v56 }
  0xda   :  { %1331 = vmatprep.mubr.bf16.mxu0 %v6199_v57 }
  0xe1   :  { %1332 = vmatmul.mubr.bf16.gmra.mxu0 %v6201_v58  ;;  %v6288_v58 = vld [vmem:[%s9209_s3 + $0xc4] ss:$16 sps:$4 sm:$0xff]  }
  0xe2   :  { %1339 = vmatprep.mubr.bf16.mxu0 %v6202_v59  ;;  %v6290_v59 = vld [vmem:[%s9209_s3 + $0xc0] ss:$16 sps:$4 sm:$0xff]   ;;  %4554 = vmatprep.subr.bf16.mxu1 %v6288_v58 }
  0xe3   :  { %4555 = vmatpush1.bf16.msra.mxu1 %v6290_v59  ;;  %v6344_v58 = vld [vmem:[%s9209_s3 + $0x140] ss:$16 sps:$4 sm:$0xff]  }
  0xe9   :  { %1340 = vmatmul.mubr.bf16.gmra.mxu0 %v6204_v60 }
  0xea   :  { %1347 = vmatprep.mubr.bf16.mxu0 %v6205_v61  ;;  %v6237_v61 = vld [vmem:[%s9208_s0 + $0x210] ss:$8 sps:$4 sm:$0xff]  }
  0xf1   :  { %1348 = vmatmul.mubr.bf16.gmra.mxu0 %v6207_v62 }
  0xf2   :  { %1355 = vmatprep.mubr.bf16.mxu0 %v6208_v63  ;;  %v6291_v63 = vld [vmem:[%s9209_s3 + $0xa4] ss:$16 sps:$4 sm:$0xff]  }
  0xf3   :  { %4556 = vmatprep.subr.bf16.mxu1 %v6291_v63  ;;  %v6260_v63 = vld [vmem:[%s9208_s0 + $0x284] ss:$8 sps:$4 sm:$0xff]  }
  0xf9   :  { %1356 = vmatmul.mubr.bf16.gmra.mxu0 %v6210_v1  ;;  %v6242_v1 = vld [vmem:[%s9208_s0 + $0x224] ss:$8 sps:$4 sm:$0xff]  }
  0xfa   :  { %1363 = vmatprep.mubr.bf16.mxu0 %v6211_v2  ;;  %v6293_v2 = vld [vmem:[%s9209_s3 + $0xa0] ss:$16 sps:$4 sm:$0xff]  }
  0xfb   :  { %4557 = vmatpush1.bf16.msra.mxu1 %v6293_v2 }
 0x101   :  { %v1173_v7 = vpop.f32.mrf.mxu0  ;;  %1364 = vmatmul.mubr.bf16.gmra.mxu0 %v5520_v5  ;;  %v6297_v5 = vld [vmem:[%s9209_s3 + $0x84] ss:$16 sps:$4 sm:$0xff]  }
 0x102   :  { %1821 = vst.msk [vmem:[#allocation2] sm:$0xff] %vm1820_vm0, %v1173_v7  ;;  %1371 = vmatprep.mubr.bf16.mxu0 %v6213_v6  ;;  %v6299_v6 = vld [vmem:[%s9209_s3 + $0x80] ss:$16 sps:$4 sm:$0xff]   ;;  %4558 = vmatprep.subr.bf16.mxu1 %v6297_v5 }
 0x103   :  { %v1175_v8 = vpop.f32.mrf.mxu0  ;;  %4559 = vmatpush1.bf16.msra.mxu1 %v6299_v6  ;;  %v6353_v5 = vld [vmem:[%s9209_s3 + $0x100] ss:$16 sps:$4 sm:$0xff]  }
 0x104   :  { %v6240_v8 = vld [vmem:[%s9208_s0 + $0x220] ss:$8 sps:$4 sm:$0xff]  }
 0x105   :  { %v1176_v9 = vpop.f32.mrf.mxu0 }
 0x106   :  { %1822 = vst.msk [vmem:[#allocation2 + $0x58] sm:$0xff] %vm1820_vm0, %v1176_v9 }
 0x107   :  { %v1178_v12 = vpop.f32.mrf.mxu0 }
 0x108   :  { %v6302_v12 = vld [vmem:[%s9209_s3 + $0x60] ss:$16 sps:$4 sm:$0xff]  }
 0x109   :  { %v1181_v13 = vpop.f32.mrf.mxu0  ;;  %1372 = vmatmul.mubr.bf16.gmra.mxu0 %v6215_v10  ;;  %v6300_v10 = vld [vmem:[%s9209_s3 + $0x64] ss:$16 sps:$4 sm:$0xff]  }
 0x10a   :  { %1825 = vrot.lane.b32.xlu1 %v1181_v13, %s6892_s19  ;;  %1379 = vmatprep.mubr.bf16.mxu0 %v6216_v11  ;;  %v6245_v11 = vld [vmem:[%s9208_s0 + $0x234] ss:$8 sps:$4 sm:$0xff]  }
 0x10b   :  { %v1183_v14 = vpop.f32.mrf.mxu0  ;;  %4560 = vmatprep.subr.bf16.mxu1 %v6300_v10  ;;  %v6263_v10 = vld [vmem:[%s9208_s0 + $0x294] ss:$8 sps:$4 sm:$0xff]  }
 0x10c   :  { %4561 = vmatpush1.bf16.msra.mxu1 %v6302_v12 }
 0x10d   :  { %v1184_v15 = vpop.f32.mrf.mxu0 }
 0x10e   :  { %1827 = vrot.lane.b32.xlu1 %v1184_v15, %s6892_s19  ;;  %v6306_v15 = vld [vmem:[%s9209_s3 + $0x44] ss:$16 sps:$4 sm:$0xff]  }
 0x10f   :  { %v1186_v18 = vpop.f32.mrf.mxu0  ;;  %4562 = vmatprep.subr.bf16.mxu1 %v6306_v15 }
 0x110   :  { %v6243_v18 = vld [vmem:[%s9208_s0 + $0x230] ss:$8 sps:$4 sm:$0xff]  }
 0x111   :  { %v1189_v19 = vpop.f32.mrf.mxu0  ;;  %1380 = vmatmul.mubr.bf16.gmra.mxu0 %v6218_v16  ;;  %v6308_v16 = vld [vmem:[%s9209_s3 + $0x40] ss:$16 sps:$4 sm:$0xff]  }
 0x112   :  { %1836 = vrot.lane.b32.xlu0 %v1189_v19, %s6893_s23  ;;  %1387 = vmatprep.mubr.bf16.mxu0 %v6219_v17 }
 0x113   :  { %v1191_v20 = vpop.f32.mrf.mxu0  ;;  %4563 = vmatpush1.bf16.msra.mxu1 %v6308_v16 }
 0x114   :  { %v6309_v20 = vld [vmem:[%s9209_s3 + $0x24] ss:$16 sps:$4 sm:$0xff]  }
 0x115   :  { %v1192_v21 = vpop.f32.mrf.mxu0  ;;  %4564 = vmatprep.subr.bf16.mxu1 %v6309_v20 }
 0x116   :  { %1838 = vrot.lane.b32.xlu1 %v1192_v21, %s6893_s23  ;;  %v6248_v21 = vld [vmem:[%s9208_s0 + $0x244] ss:$8 sps:$4 sm:$0xff]  }
 0x117   :  { %v1194_v24 = vpop.f32.mrf.mxu0 }
 0x119   :  { %v1197_v25 = vpop.f32.mrf.mxu0  ;;  %1388 = vmatmul.mubr.bf16.gmra.mxu0 %v6221_v22  ;;  %v6311_v22 = vld [vmem:[%s9209_s3 + $0x20] ss:$16 sps:$4 sm:$0xff]  }
 0x11a   :  { %1847 = vrot.lane.b32.xlu0 %v1197_v25, %s6894_s28  ;;  %1395 = vmatprep.mubr.bf16.mxu0 %v6224_v23  ;;  %v6315_v25 = vld [vmem:[%s9209_s3 + $0x4] ss:$16 sps:$4 sm:$0xff]  }
 0x11b   :  { %v1199_v26 = vpop.f32.mrf.mxu0  ;;  %4565 = vmatpush1.bf16.msra.mxu1 %v6311_v22 }
 0x11c   :  { %v6317_v26 = vld [vmem:[%s9209_s3] ss:$16 sps:$4 sm:$0xff]   ;;  %4566 = vmatprep.subr.bf16.mxu1 %v6315_v25 }
 0x11d   :  { %v1200_v27 = vpop.f32.mrf.mxu0 }
 0x11e   :  { %1849 = vrot.lane.b32.xlu1 %v1200_v27, %s6894_s28 }
 0x11f   :  { %v1202_v30 = vpop.f32.mrf.mxu0  ;;  %4567 = vmatpush1.bf16.msra.mxu1 %v6317_v26 }
 0x120   :  { %v6318_v30 = vld [vmem:[%s9209_s3 + $0x1e4] ss:$16 sps:$4 sm:$0xff]  }
 0x121   :  { %v1205_v31 = vpop.f32.mrf.mxu0  ;;  %1396 = vmatmul.mubr.bf16.gmra.mxu0 %v6222_v28  ;;  %v6246_v28 = vld [vmem:[%s9208_s0 + $0x240] ss:$8 sps:$4 sm:$0xff]   ;;  %4568 = vmatprep.subr.bf16.mxu1 %v6318_v30 }
 0x122   :  { %1858 = vrot.lane.b32.xlu0 %v1205_v31, %s6895_s14  ;;  %1403 = vmatprep.mubr.bf16.mxu0 %v6227_v29  ;;  %v6251_v31 = vld [vmem:[%s9208_s0 + $0x254] ss:$8 sps:$4 sm:$0xff]  }
 0x123   :  { %v1207_v32 = vpop.f32.mrf.mxu0 }
 0x124   :  { %v6320_v32 = vld [vmem:[%s9209_s3 + $0x1e0] ss:$16 sps:$4 sm:$0xff]  }
 0x125   :  { %v1208_v33 = vpop.f32.mrf.mxu0  ;;  %4569 = vmatpush2.bf16.msra.mxu1 %v6320_v32  ;;  %v6272_v32 = vld [vmem:[%s9208_s0 + $0x2c4] ss:$8 sps:$4 sm:$0xff]  }
 0x126   :  { %1860 = vrot.lane.b32.xlu1 %v1208_v33, %s6895_s14 }
 0x127   :  { %v1210_v36 = vpop.f32.mrf.mxu0 }
 0x128   :  { %v6326_v36 = vld [vmem:[%s9209_s3 + $0x1c0] ss:$16 sps:$4 sm:$0xff]  }
 0x129   :  { %v1213_v37 = vpop.f32.mrf.mxu0  ;;  %1404 = vmatmul.mubr.bf16.gmra.mxu0 %v6225_v34 }
 0x12a   :  { %1869 = vrot.lane.b32.xlu0 %v1213_v37, %s6896_s20  ;;  %1411 = vmatprep.mubr.bf16.mxu0 %v6230_v35  ;;  %v6324_v35 = vld [vmem:[%s9209_s3 + $0x1c4] ss:$16 sps:$4 sm:$0xff]  }
 0x12b   :  { %v1215_v38 = vpop.f32.mrf.mxu0  ;;  %4570 = vmatprep.subr.bf16.mxu1 %v6324_v35 }
 0x12c   :  { %v6249_v38 = vld [vmem:[%s9208_s0 + $0x250] ss:$8 sps:$4 sm:$0xff]   ;;  %4571 = vmatpush2.bf16.msra.mxu1 %v6326_v36 }
 0x12d   :  { %v1216_v39 = vpop.f32.mrf.mxu0 }
 0x12e   :  { %1871 = vrot.lane.b32.xlu1 %v1216_v39, %s6896_s20 }
 0x12f   :  { %v1218_v42 = vpop.f32.mrf.mxu0 }
 0x130   :  { %v6329_v42 = vld [vmem:[%s9209_s3 + $0x1a0] ss:$16 sps:$4 sm:$0xff]  }
 0x131   :  { %v1221_v43 = vpop.f32.mrf.mxu0  ;;  %1412 = vmatmul.mubr.bf16.gmra.mxu0 %v6228_v40  ;;  %v6327_v40 = vld [vmem:[%s9209_s3 + $0x1a4] ss:$16 sps:$4 sm:$0xff]  }
 0x132   :  { %1880 = vrot.lane.b32.xlu0 %v1221_v43, %s6897_s25  ;;  %1419 = vmatprep.mubr.bf16.mxu0 %v6233_v41  ;;  %v6254_v41 = vld [vmem:[%s9208_s0 + $0x264] ss:$8 sps:$4 sm:$0xff]  }
 0x133   :  { %v1223_v44 = vpop.f32.mrf.mxu0  ;;  %4572 = vmatprep.subr.bf16.mxu1 %v6327_v40  ;;  %v6275_v40 = vld [vmem:[%s9208_s0 + $0x2d4] ss:$8 sps:$4 sm:$0xff]  }
 0x134   :  { %4573 = vmatpush2.bf16.msra.mxu1 %v6329_v42 }
 0x135   :  { %v1224_v45 = vpop.f32.mrf.mxu0 }
 0x136   :  { %1882 = vrot.lane.b32.xlu1 %v1224_v45, %s6897_s25  ;;  %v6333_v45 = vld [vmem:[%s9209_s3 + $0x184] ss:$16 sps:$4 sm:$0xff]  }
 0x137   :  { %v1226_v48 = vpop.f32.mrf.mxu0  ;;  %4574 = vmatprep.subr.bf16.mxu1 %v6333_v45  ;;  %v6273_v45 = vld [vmem:[%s9208_s0 + $0x2d0] ss:$8 sps:$4 sm:$0xff]  }
 0x138   :  { %v6252_v48 = vld [vmem:[%s9208_s0 + $0x260] ss:$8 sps:$4 sm:$0xff]  }
 0x139   :  { %v7237_v49 = vpop.f32.mrf.mxu0  ;;  %1420 = vmatmul.mubr.bf16.gmra.mxu0 %v6231_v46  ;;  %v6335_v46 = vld [vmem:[%s9209_s3 + $0x180] ss:$16 sps:$4 sm:$0xff]  }
 0x13a   :  { %1427 = vmatprep.mubr.bf16.mxu0 %v6236_v47  ;;  %4575 = vmatpush2.bf16.msra.mxu1 %v6335_v46 }
 0x13b   :  { %v1231_v50 = vpop.f32.mrf.mxu0 }
 0x13d   :  { %v7242_v52 = vpop.f32.mrf.mxu0 }
 0x13f   :  { %v1234_v56 = vpop.f32.mrf.mxu0 }
 0x141   :  { %v1237_v57 = vpop.f32.mrf.mxu0  ;;  %1428 = vmatmul.mubr.bf16.gmra.mxu0 %v6234_v51  ;;  %v6336_v51 = vld [vmem:[%s9209_s3 + $0x164] ss:$16 sps:$4 sm:$0xff]  }
 0x142   :  { %1900 = vst.msk [vmem:[#allocation2 + $0x8] sm:$0xff] %vm1820_vm0, %v1237_v57  ;;  %1435 = vmatprep.mubr.bf16.mxu0 %v6239_v54  ;;  %v6338_v54 = vld [vmem:[%s9209_s3 + $0x160] ss:$16 sps:$4 sm:$0xff]   ;;  %4576 = vmatprep.subr.bf16.mxu1 %v6336_v51  ;;  %v6342_v57 = vld [vmem:[%s9209_s3 + $0x144] ss:$16 sps:$4 sm:$0xff]  }
 0x143   :  { %v1239_v60 = vpop.f32.mrf.mxu0  ;;  %4577 = vmatpush2.bf16.msra.mxu1 %v6338_v54 }
 0x144   :  { %v6255_v60 = vld [vmem:[%s9208_s0 + $0x270] ss:$8 sps:$4 sm:$0xff]   ;;  %4578 = vmatprep.subr.bf16.mxu1 %v6342_v57  ;;  %v6281_v57 = vld [vmem:[%s9208_s0 + $0x2f4] ss:$8 sps:$4 sm:$0xff]  }
 0x145   :  { %v1240_v62 = vpop.f32.mrf.mxu0 }
 0x146   :  { %1901 = vst.msk [vmem:[#allocation2 + $0x60] sm:$0xff] %vm1820_vm0, %v1240_v62  ;;  %v6345_v62 = vld [vmem:[%s9209_s3 + $0x124] ss:$16 sps:$4 sm:$0xff]  }
 0x147   :  { %v1242_v3 = vpop.f32.mrf.mxu0  ;;  %4579 = vmatpush2.bf16.msra.mxu1 %v6344_v58 }
 0x148   :  { %4580 = vmatprep.subr.bf16.mxu1 %v6345_v62 }
 0x149   :  { %v1245_v4 = vpop.f32.mrf.mxu0  ;;  %1436 = vmatmul.mubr.bf16.gmra.mxu0 %v6237_v61 }
 0x14a   :  { %1904 = vrot.lane.b32.xlu0 %v1245_v4, %s6892_s19  ;;  %1443 = vmatprep.mubr.bf16.mxu0 %v6242_v1  ;;  %v6350_v1 = vld [vmem:[%s9209_s3 + $0x120] ss:$16 sps:$4 sm:$0xff]   ;;  %v6351_v4 = vld [vmem:[%s9209_s3 + $0x104] ss:$16 sps:$4 sm:$0xff]  }
 0x14b   :  { %v1247_v7 = vpop.f32.mrf.mxu0  ;;  %4581 = vmatpush2.bf16.msra.mxu1 %v6350_v1 }
 0x14c   :  { %v6258_v7 = vld [vmem:[%s9208_s0 + $0x280] ss:$8 sps:$4 sm:$0xff]   ;;  %4582 = vmatprep.subr.bf16.mxu1 %v6351_v4 }
 0x14d   :  { %v1248_v9 = vpop.f32.mrf.mxu0  ;;  %v6285_v4 = vld [vmem:[%s9208_s0 + $0x300] ss:$8 sps:$4 sm:$0xff]  }
 0x14e   :  { %1906 = vrot.lane.b32.xlu0 %v1248_v9, %s6892_s19 }
 0x14f   :  { %v1250_v13 = vpop.f32.mrf.mxu0  ;;  %4583 = vmatpush2.bf16.msra.mxu1 %v6353_v5 }
 0x151   :  { %v1253_v14 = vpop.f32.mrf.mxu0  ;;  %1444 = vmatmul.mubr.bf16.gmra.mxu0 %v6240_v8 }
 0x152   :  { %1914 = vrot.lane.b32.xlu0 %v1253_v14, %s6893_s23  ;;  %1451 = vmatprep.mubr.bf16.mxu0 %v6245_v11  ;;  %v6261_v14 = vld [vmem:[%s9208_s0 + $0x290] ss:$8 sps:$4 sm:$0xff]  }
 0x153   :  { %v1255_v17 = vpop.f32.mrf.mxu0 }
 0x154   :  { %v6266_v17 = vld [vmem:[%s9208_s0 + $0x2a4] ss:$8 sps:$4 sm:$0xff]  }
 0x155   :  { %v1256_v19 = vpop.f32.mrf.mxu0 }
 0x156   :  { %1916 = vrot.lane.b32.xlu1 %v1256_v19, %s6893_s23 }
 0x157   :  { %v1258_v23 = vpop.f32.mrf.mxu0 }
 0x159   :  { %v1261_v24 = vpop.f32.mrf.mxu0  ;;  %1452 = vmatmul.mubr.bf16.gmra.mxu0 %v6243_v18 }
 0x15a   :  { %1924 = vrot.lane.b32.xlu0 %v1261_v24, %s6894_s28  ;;  %1459 = vmatprep.mubr.bf16.mxu0 %v6248_v21  ;;  %v6264_v21 = vld [vmem:[%s9208_s0 + $0x2a0] ss:$8 sps:$4 sm:$0xff]   ;;  %v6269_v24 = vld [vmem:[%s9208_s0 + $0x2b4] ss:$8 sps:$4 sm:$0xff]  }
 0x15b   :  { %v1263_v27 = vpop.f32.mrf.mxu0 }
 0x15d   :  { %v1264_v29 = vpop.f32.mrf.mxu0 }
 0x15e   :  { %1926 = vrot.lane.b32.xlu1 %v1264_v29, %s6894_s28  ;;  %v6267_v29 = vld [vmem:[%s9208_s0 + $0x2b0] ss:$8 sps:$4 sm:$0xff]  }
 0x15f   :  { %v1266_v33 = vpop.f32.mrf.mxu0 }
 0x161   :  { %v1269_v34 = vpop.f32.mrf.mxu0  ;;  %1460 = vmatmul.mubr.bf16.gmra.mxu0 %v6246_v28 }
 0x162   :  { %1934 = vrot.lane.b32.xlu0 %v1269_v34, %s6895_s14  ;;  %1467 = vmatprep.mubr.bf16.mxu0 %v6251_v31 }
 0x163   :  { %v1271_v37 = vpop.f32.mrf.mxu0 }
 0x164   :  { %v6270_v37 = vld [vmem:[%s9208_s0 + $0x2c0] ss:$8 sps:$4 sm:$0xff]  }
 0x165   :  { %v1272_v39 = vpop.f32.mrf.mxu0 }
 0x166   :  { %1936 = vrot.lane.b32.xlu1 %v1272_v39, %s6895_s14 }
 0x167   :  { %v1274_v43 = vpop.f32.mrf.mxu0 }
 0x169   :  { %v1277_v44 = vpop.f32.mrf.mxu0  ;;  %1468 = vmatmul.mubr.bf16.gmra.mxu0 %v6249_v38 }
 0x16a   :  { %1944 = vrot.lane.b32.xlu0 %v1277_v44, %s6896_s20  ;;  %1475 = vmatprep.mubr.bf16.mxu0 %v6254_v41 }
 0x16b   :  { %v1279_v47 = vpop.f32.mrf.mxu0 }
 0x16d   :  { %v1280_v50 = vpop.f32.mrf.mxu0 }
 0x16e   :  { %1946 = vrot.lane.b32.xlu1 %v1280_v50, %s6896_s20 }
 0x16f   :  { %v1282_v55 = vpop.f32.mrf.mxu0 }
 0x170   :  { %v6276_v55 = vld [vmem:[%s9208_s0 + $0x2e0] ss:$8 sps:$4 sm:$0xff]  }
 0x171   :  { %v1285_v56 = vpop.f32.mrf.mxu0  ;;  %1476 = vmatmul.mubr.bf16.gmra.mxu0 %v6252_v48  ;;  %v6278_v48 = vld [vmem:[%s9208_s0 + $0x2e4] ss:$8 sps:$4 sm:$0xff]  }
 0x172   :  { %1954 = vrot.lane.b32.xlu0 %v1285_v56, %s6897_s25  ;;  %1483 = vmatprep.mubr.bf16.mxu0 %v6257_v53 }
 0x173   :  { %v1287_v59 = vpop.f32.mrf.mxu0 }
 0x175   :  { %v1288_v61 = vpop.f32.mrf.mxu0 }
 0x176   :  { %1956 = vrot.lane.b32.xlu1 %v1288_v61, %s6897_s25  ;;  %v6279_v61 = vld [vmem:[%s9208_s0 + $0x2f0] ss:$8 sps:$4 sm:$0xff]  }
 0x177   :  { %v1290_v2 = vpop.f32.mrf.mxu0 }
 0x179   :  { %v1293_v3 = vpop.f32.mrf.mxu0  ;;  %1484 = vmatmul.mubr.bf16.gmra.mxu0 %v6255_v60 }
 0x17a   :  { %1964 = vrot.lane.b32.xlu0 %v1293_v3, %s6898_s26  ;;  %1491 = vmatprep.mubr.bf16.mxu0 %v6260_v63  ;;  %v6287_v63 = vld [vmem:[%s9208_s0 + $0x304] ss:$8 sps:$4 sm:$0xff]  }
 0x17b   :  { %v1295_v6 = vpop.f32.mrf.mxu0 }
 0x17c   :  { %v1826_v8 = vpop.permute.xlu1 %1825 }
 0x17d   :  { %1832 = vst.msk [vmem:[#allocation2] sm:$0xff] %vm1831_vm1, %v1826_v8  ;;  %v1296_v9 = vpop.f32.mrf.mxu0  ;;  %v6296_v8 = vld [vmem:[%s9208_s0 + $0x314] ss:$8 sps:$4 sm:$0xff]  }
 0x17e   :  { %1891 = vrot.lane.b32.xlu0 %v7237_v49, %s6898_s26  ;;  %1966 = vrot.lane.b32.xlu1 %v1296_v9, %s6898_s26 }
 0x17f   :  { %v1298_v11 = vpop.f32.mrf.mxu0 }
 0x180   :  { %v1828_v12 = vpop.permute.xlu1 %1827 }
 0x181   :  { %1833 = vst.msk [vmem:[#allocation2 + $0x58] sm:$0xff] %vm1831_vm1, %v1828_v12  ;;  %v1301_v13 = vpop.f32.mrf.mxu0  ;;  %1492 = vmatmul.mubr.bf16.gmra.mxu0 %v6258_v7  ;;  %v6380_v7 = vld [vmem:[%s9209_s3 + $0x2e4] ss:$16 sps:$4 sm:$0xff]  }
 0x182   :  { %1972 = vst.msk [vmem:[#allocation2 + $0x10] sm:$0xff] %vm1820_vm0, %v1301_v13  ;;  %1893 = vrot.lane.b32.xlu1 %v7242_v52, %s6898_s26  ;;  %1499 = vmatprep.mubr.bf16.mxu0 %v6263_v10 }
 0x183   :  { %v1303_v49 = vpop.f32.mrf.mxu0  ;;  %4595 = vmatprep.subr.bf16.mxu1 %v6380_v7 }
 0x184   :  { %v1837_v15 = vpop.permute.xlu0 %1836 }
 0x185   :  { %1843 = vst.msk [vmem:[#allocation2] sm:$0xff] %vm1842_vm2, %v1837_v15  ;;  %v1304_v16 = vpop.f32.mrf.mxu0  ;;  %v6305_v15 = vld [vmem:[%s9208_s0 + $0x324] ss:$8 sps:$4 sm:$0xff]  }
 0x186   :  { %1973 = vst.msk [vmem:[#allocation2 + $0x68] sm:$0xff] %vm1820_vm0, %v1304_v16 }
 0x187   :  { %v1306_v18 = vpop.f32.mrf.mxu0 }
 0x188   :  { %v1839_v19 = vpop.permute.xlu1 %1838 }
 0x189   :  { %1844 = vst.msk [vmem:[#allocation2 + $0x58] sm:$0xff] %vm1842_vm2, %v1839_v19  ;;  %v1309_v52 = vpop.f32.mrf.mxu0  ;;  %1500 = vmatmul.mubr.bf16.gmra.mxu0 %v6261_v14  ;;  %v6294_v14 = vld [vmem:[%s9208_s0 + $0x310] ss:$8 sps:$4 sm:$0xff]  }
 0x18a   :  { %1976 = vrot.lane.b32.xlu0 %v1309_v52, %s6892_s19  ;;  %1507 = vmatprep.mubr.bf16.mxu0 %v6266_v17 }
 0x18b   :  { %v1311_v20 = vpop.f32.mrf.mxu0 }
 0x18c   :  { %v1848_v22 = vpop.permute.xlu0 %1847 }
 0x18d   :  { %1854 = vst.msk [vmem:[#allocation2] sm:$0xff] %vm1853_vm3, %v1848_v22  ;;  %v1312_v23 = vpop.f32.mrf.mxu0  ;;  %v6314_v22 = vld [vmem:[%s9208_s0 + $0x334] ss:$8 sps:$4 sm:$0xff]  }
 0x18e   :  { %1978 = vrot.lane.b32.xlu1 %v1312_v23, %s6892_s19 }
 0x18f   :  { %v1314_v25 = vpop.f32.mrf.mxu0 }
 0x190   :  { %v1850_v26 = vpop.permute.xlu1 %1849 }
 0x191   :  { %1855 = vst.msk [vmem:[#allocation2 + $0x58] sm:$0xff] %vm1853_vm3, %v1850_v26  ;;  %v1317_v27 = vpop.f32.mrf.mxu0  ;;  %1508 = vmatmul.mubr.bf16.gmra.mxu0 %v6264_v21  ;;  %v6303_v21 = vld [vmem:[%s9208_s0 + $0x320] ss:$8 sps:$4 sm:$0xff]  }
 0x192   :  { %1986 = vrot.lane.b32.xlu0 %v1317_v27, %s6893_s23  ;;  %1515 = vmatprep.mubr.bf16.mxu0 %v6269_v24 }
 0x193   :  { %v1319_v28 = vpop.f32.mrf.mxu0 }
 0x194   :  { %v1859_v30 = vpop.permute.xlu0 %1858 }
 0x195   :  { %1865 = vst.msk [vmem:[#allocation2] sm:$0xff] %vm1864_vm4, %v1859_v30  ;;  %v1320_v31 = vpop.f32.mrf.mxu0  ;;  %v6323_v30 = vld [vmem:[%s9208_s0 + $0x344] ss:$8 sps:$4 sm:$0xff]  }
 0x196   :  { %1988 = vrot.lane.b32.xlu1 %v1320_v31, %s6893_s23 }
 0x197   :  { %v1322_v33 = vpop.f32.mrf.mxu0 }
 0x198   :  { %v1861_v34 = vpop.permute.xlu1 %1860 }
 0x199   :  { %1866 = vst.msk [vmem:[#allocation2 + $0x58] sm:$0xff] %vm1864_vm4, %v1861_v34  ;;  %v1325_v35 = vpop.f32.mrf.mxu0  ;;  %1516 = vmatmul.mubr.bf16.gmra.mxu0 %v6267_v29  ;;  %v6312_v29 = vld [vmem:[%s9208_s0 + $0x330] ss:$8 sps:$4 sm:$0xff]  }
 0x19a   :  { %1996 = vrot.lane.b32.xlu0 %v1325_v35, %s6894_s28  ;;  %1523 = vmatprep.mubr.bf16.mxu0 %v6272_v32 }
 0x19b   :  { %v1327_v36 = vpop.f32.mrf.mxu0 }
 0x19c   :  { %v1870_v38 = vpop.permute.xlu0 %1869 }
 0x19d   :  { %1876 = vst.msk [vmem:[#allocation2] sm:$0xff] %vm1875_vm5, %v1870_v38  ;;  %v1328_v39 = vpop.f32.mrf.mxu0  ;;  %v6332_v38 = vld [vmem:[%s9208_s0 + $0x354] ss:$8 sps:$4 sm:$0xff]  }
 0x19e   :  { %1998 = vrot.lane.b32.xlu1 %v1328_v39, %s6894_s28 }
 0x19f   :  { %v1330_v41 = vpop.f32.mrf.mxu0 }
 0x1a0   :  { %v1872_v42 = vpop.permute.xlu1 %1871 }
 0x1a1   :  { %1877 = vst.msk [vmem:[#allocation2 + $0x58] sm:$0xff] %vm1875_vm5, %v1872_v42  ;;  %v1333_v43 = vpop.f32.mrf.mxu0  ;;  %1524 = vmatmul.mubr.bf16.gmra.mxu0 %v6270_v37  ;;  %v6321_v37 = vld [vmem:[%s9208_s0 + $0x340] ss:$8 sps:$4 sm:$0xff]  }
 0x1a2   :  { %2006 = vrot.lane.b32.xlu0 %v1333_v43, %s6895_s14  ;;  %1531 = vmatprep.mubr.bf16.mxu0 %v6275_v40 }
 0x1a3   :  { %v1335_v44 = vpop.f32.mrf.mxu0 }
 0x1a4   :  { %v1881_v46 = vpop.permute.xlu0 %1880 }
 0x1a5   :  { %1887 = vst.msk [vmem:[#allocation2] sm:$0xff] %vm1886_vm6, %v1881_v46  ;;  %v1336_v47 = vpop.f32.mrf.mxu0  ;;  %v6341_v46 = vld [vmem:[%s9208_s0 + $0x364] ss:$8 sps:$4 sm:$0xff]  }
 0x1a6   :  { %2008 = vrot.lane.b32.xlu1 %v1336_v47, %s6895_s14 }
 0x1a7   :  { %v1338_v50 = vpop.f32.mrf.mxu0 }
 0x1a8   :  { %v1883_v51 = vpop.permute.xlu1 %1882 }
 0x1a9   :  { %1888 = vst.msk [vmem:[#allocation2 + $0x58] sm:$0xff] %vm1886_vm6, %v1883_v51  ;;  %v1341_v53 = vpop.f32.mrf.mxu0  ;;  %1532 = vmatmul.mubr.bf16.gmra.mxu0 %v6273_v45  ;;  %v6330_v45 = vld [vmem:[%s9208_s0 + $0x350] ss:$8 sps:$4 sm:$0xff]  }
 0x1aa   :  { %2016 = vrot.lane.b32.xlu0 %v1341_v53, %s6896_s20  ;;  %1539 = vmatprep.mubr.bf16.mxu0 %v6278_v48 }
 0x1ab   :  { %v1343_v54 = vpop.f32.mrf.mxu0 }
 0x1ad   :  { %v1344_v56 = vpop.f32.mrf.mxu0 }
 0x1ae   :  { %2018 = vrot.lane.b32.xlu1 %v1344_v56, %s6896_s20  ;;  %v6349_v56 = vld [vmem:[%s9208_s0 + $0x374] ss:$8 sps:$4 sm:$0xff]  }
 0x1af   :  { %v1346_v58 = vpop.f32.mrf.mxu0 }
 0x1b1   :  { %v1349_v59 = vpop.f32.mrf.mxu0  ;;  %1540 = vmatmul.mubr.bf16.gmra.mxu0 %v6276_v55  ;;  %v6339_v55 = vld [vmem:[%s9208_s0 + $0x360] ss:$8 sps:$4 sm:$0xff]  }
 0x1b2   :  { %2026 = vrot.lane.b32.xlu0 %v1349_v59, %s6897_s25  ;;  %1547 = vmatprep.mubr.bf16.mxu0 %v6281_v57 }
 0x1b3   :  { %v1351_v60 = vpop.f32.mrf.mxu0 }
 0x1b5   :  { %v1352_v62 = vpop.f32.mrf.mxu0 }
 0x1b6   :  { %2028 = vrot.lane.b32.xlu1 %v1352_v62, %s6897_s25 }
 0x1b7   :  { %v1354_v1 = vpop.f32.mrf.mxu0 }
 0x1b8   :  { %v6347_v1 = vld [vmem:[%s9208_s0 + $0x370] ss:$8 sps:$4 sm:$0xff]  }
 0x1b9   :  { %v7479_v2 = vpop.f32.mrf.mxu0  ;;  %1548 = vmatmul.mubr.bf16.gmra.mxu0 %v6279_v61 }
 0x1ba   :  { %1555 = vmatprep.mubr.bf16.mxu0 %v6287_v63 }
 0x1bb   :  { %v1359_v3 = vpop.f32.mrf.mxu0 }
 0x1bc   :  { %v1905_v5 = vpop.permute.xlu0 %1904  ;;  %v6356_v3 = vld [vmem:[%s9208_s0 + $0x384] ss:$8 sps:$4 sm:$0xff]  }
 0x1bd   :  { %1910 = vst.msk [vmem:[#allocation2 + $0x8] sm:$0xff] %vm1831_vm1, %v1905_v5  ;;  %v7485_v6 = vpop.f32.mrf.mxu0 }
 0x1bf   :  { %v1362_v9 = vpop.f32.mrf.mxu0 }
 0x1c0   :  { %v1907_v10 = vpop.permute.xlu0 %1906 }
 0x1c1   :  { %1911 = vst.msk [vmem:[#allocation2 + $0x60] sm:$0xff] %vm1831_vm1, %v1907_v10  ;;  %v1365_v11 = vpop.f32.mrf.mxu0  ;;  %1556 = vmatmul.mubr.bf16.gmra.mxu0 %v6285_v4 }
 0x1c2   :  { %2044 = vst.msk [vmem:[#allocation2 + $0x18] sm:$0xff] %vm1820_vm0, %v1365_v11  ;;  %1563 = vmatprep.mubr.bf16.mxu0 %v6296_v8 }
 0x1c3   :  { %v1367_v12 = vpop.f32.mrf.mxu0 }
 0x1c4   :  { %v1915_v13 = vpop.permute.xlu0 %1914 }
 0x1c5   :  { %1920 = vst.msk [vmem:[#allocation2 + $0x8] sm:$0xff] %vm1842_vm2, %v1915_v13  ;;  %v1368_v49 = vpop.f32.mrf.mxu0 }
 0x1c6   :  { %2045 = vst.msk [vmem:[#allocation2 + $0x70] sm:$0xff] %vm1820_vm0, %v1368_v49  ;;  %v6378_v49 = vld [vmem:[%s9209_s3 + $0x2e0] ss:$16 sps:$4 sm:$0xff]  }
 0x1c7   :  { %v1370_v16 = vpop.f32.mrf.mxu0 }
 0x1c8   :  { %v1917_v17 = vpop.permute.xlu1 %1916  ;;  %v6354_v16 = vld [vmem:[%s9208_s0 + $0x380] ss:$8 sps:$4 sm:$0xff]  }
 0x1c9   :  { %1921 = vst.msk [vmem:[#allocation2 + $0x60] sm:$0xff] %vm1842_vm2, %v1917_v17  ;;  %v1373_v18 = vpop.f32.mrf.mxu0  ;;  %1564 = vmatmul.mubr.bf16.gmra.mxu0 %v6294_v14  ;;  %v6386_v17 = vld [vmem:[%s9209_s3 + $0x2c4] ss:$16 sps:$4 sm:$0xff]  }
 0x1ca   :  { %2048 = vrot.lane.b32.xlu0 %v1373_v18, %s6892_s19  ;;  %1571 = vmatprep.mubr.bf16.mxu0 %v6305_v15  ;;  %v6359_v18 = vld [vmem:[%s9208_s0 + $0x394] ss:$8 sps:$4 sm:$0xff]  }
 0x1cb   :  { %v1375_v19 = vpop.f32.mrf.mxu0 }
 0x1cc   :  { %v1925_v52 = vpop.permute.xlu0 %1924 }
 0x1cd   :  { %1930 = vst.msk [vmem:[#allocation2 + $0x8] sm:$0xff] %vm1853_vm3, %v1925_v52  ;;  %v1376_v20 = vpop.f32.mrf.mxu0 }
 0x1ce   :  { %2050 = vrot.lane.b32.xlu1 %v1376_v20, %s6892_s19  ;;  %v6384_v20 = vld [vmem:[%s9209_s3 + $0x2c0] ss:$16 sps:$4 sm:$0xff]  }
 0x1cf   :  { %v1378_v23 = vpop.f32.mrf.mxu0 }
 0x1d0   :  { %v1927_v24 = vpop.permute.xlu1 %1926 }
 0x1d1   :  { %1931 = vst.msk [vmem:[#allocation2 + $0x60] sm:$0xff] %vm1853_vm3, %v1927_v24  ;;  %v1381_v25 = vpop.f32.mrf.mxu0  ;;  %1572 = vmatmul.mubr.bf16.gmra.mxu0 %v6303_v21  ;;  %v6387_v24 = vld [vmem:[%s9209_s3 + $0x2a0] ss:$16 sps:$4 sm:$0xff]  }
 0x1d2   :  { %2058 = vrot.lane.b32.xlu0 %v1381_v25, %s6893_s23  ;;  %1579 = vmatprep.mubr.bf16.mxu0 %v6314_v22 }
 0x1d3   :  { %v1383_v26 = vpop.f32.mrf.mxu0 }
 0x1d4   :  { %v1935_v27 = vpop.permute.xlu0 %1934  ;;  %v6357_v26 = vld [vmem:[%s9208_s0 + $0x390] ss:$8 sps:$4 sm:$0xff]  }
 0x1d5   :  { %1940 = vst.msk [vmem:[#allocation2 + $0x8] sm:$0xff] %vm1864_vm4, %v1935_v27  ;;  %v1384_v28 = vpop.f32.mrf.mxu0  ;;  %v6362_v27 = vld [vmem:[%s9208_s0 + $0x3a4] ss:$8 sps:$4 sm:$0xff]  }
 0x1d6   :  { %2060 = vrot.lane.b32.xlu1 %v1384_v28, %s6893_s23 }
 0x1d7   :  { %v1386_v31 = vpop.f32.mrf.mxu0 }
 0x1d8   :  { %v1937_v32 = vpop.permute.xlu1 %1936 }
 0x1d9   :  { %1941 = vst.msk [vmem:[#allocation2 + $0x60] sm:$0xff] %vm1864_vm4, %v1937_v32  ;;  %v1389_v33 = vpop.f32.mrf.mxu0  ;;  %1580 = vmatmul.mubr.bf16.gmra.mxu0 %v6312_v29  ;;  %v6398_v32 = vld [vmem:[%s9209_s3 + $0x264] ss:$16 sps:$4 sm:$0xff]  }
 0x1da   :  { %2068 = vrot.lane.b32.xlu0 %v1389_v33, %s6894_s28  ;;  %1587 = vmatprep.mubr.bf16.mxu0 %v6323_v30  ;;  %v6393_v30 = vld [vmem:[%s9209_s3 + $0x280] ss:$16 sps:$4 sm:$0xff]  }
 0x1db   :  { %v1391_v34 = vpop.f32.mrf.mxu0 }
 0x1dc   :  { %v1945_v35 = vpop.permute.xlu0 %1944 }
 0x1dd   :  { %1950 = vst.msk [vmem:[#allocation2 + $0x8] sm:$0xff] %vm1875_vm5, %v1945_v35  ;;  %v1392_v36 = vpop.f32.mrf.mxu0  ;;  %v6396_v35 = vld [vmem:[%s9209_s3 + $0x260] ss:$16 sps:$4 sm:$0xff]  }
 0x1de   :  { %2070 = vrot.lane.b32.xlu1 %v1392_v36, %s6894_s28 }
 0x1df   :  { %v1394_v39 = vpop.f32.mrf.mxu0 }
 0x1e0   :  { %v1947_v40 = vpop.permute.xlu1 %1946  ;;  %v6365_v39 = vld [vmem:[%s9208_s0 + $0x3b4] ss:$8 sps:$4 sm:$0xff]  }
 0x1e1   :  { %1951 = vst.msk [vmem:[#allocation2 + $0x60] sm:$0xff] %vm1875_vm5, %v1947_v40  ;;  %v1397_v41 = vpop.f32.mrf.mxu0  ;;  %1588 = vmatmul.mubr.bf16.gmra.mxu0 %v6321_v37  ;;  %v6360_v37 = vld [vmem:[%s9208_s0 + $0x3a0] ss:$8 sps:$4 sm:$0xff]  }
 0x1e2   :  { %2078 = vrot.lane.b32.xlu0 %v1397_v41, %s6895_s14  ;;  %1595 = vmatprep.mubr.bf16.mxu0 %v6332_v38  ;;  %v6404_v38 = vld [vmem:[%s9209_s3 + $0x244] ss:$16 sps:$4 sm:$0xff]  }
 0x1e3   :  { %v1399_v42 = vpop.f32.mrf.mxu0 }
 0x1e4   :  { %v1955_v43 = vpop.permute.xlu0 %1954  ;;  %v6402_v42 = vld [vmem:[%s9209_s3 + $0x240] ss:$16 sps:$4 sm:$0xff]  }
 0x1e5   :  { %1960 = vst.msk [vmem:[#allocation2 + $0x8] sm:$0xff] %vm1886_vm6, %v1955_v43  ;;  %v1400_v44 = vpop.f32.mrf.mxu0 }
 0x1e6   :  { %2080 = vrot.lane.b32.xlu1 %v1400_v44, %s6895_s14  ;;  %v6407_v44 = vld [vmem:[%s9209_s3 + $0x224] ss:$16 sps:$4 sm:$0xff]  }
 0x1e7   :  { %v1402_v47 = vpop.f32.mrf.mxu0 }
 0x1e8   :  { %v1957_v48 = vpop.permute.xlu1 %1956  ;;  %v6405_v47 = vld [vmem:[%s9209_s3 + $0x220] ss:$16 sps:$4 sm:$0xff]  }
 0x1e9   :  { %1961 = vst.msk [vmem:[#allocation2 + $0x60] sm:$0xff] %vm1886_vm6, %v1957_v48  ;;  %v1405_v50 = vpop.f32.mrf.mxu0  ;;  %1596 = vmatmul.mubr.bf16.gmra.mxu0 %v6330_v45 }
 0x1ea   :  { %2088 = vrot.lane.b32.xlu0 %v1405_v50, %s6896_s20  ;;  %1603 = vmatprep.mubr.bf16.mxu0 %v6341_v46  ;;  %v6363_v50 = vld [vmem:[%s9208_s0 + $0x3b0] ss:$8 sps:$4 sm:$0xff]  }
 0x1eb   :  { %v1407_v51 = vpop.f32.mrf.mxu0 }
 0x1ec   :  { %v1965_v53 = vpop.permute.xlu0 %1964  ;;  %v6413_v51 = vld [vmem:[%s9209_s3 + $0x204] ss:$16 sps:$4 sm:$0xff]  }
 0x1ed   :  { %1970 = vst.msk [vmem:[#allocation2 + $0x8] sm:$0xff] %vm1897_vm7, %v1965_v53  ;;  %v1408_v54 = vpop.f32.mrf.mxu0  ;;  %v6368_v53 = vld [vmem:[%s9208_s0 + $0x3c4] ss:$8 sps:$4 sm:$0xff]  }
 0x1ee   :  { %2090 = vrot.lane.b32.xlu1 %v1408_v54, %s6896_s20 }
 0x1ef   :  { %v1410_v57 = vpop.f32.mrf.mxu0 }
 0x1f0   :  { %v1892_v58 = vpop.permute.xlu0 %1891  ;;  %v1967_v59 = vpop.permute.xlu1 %1966 }
 0x1f1   :  { %1898 = vst.msk [vmem:[#allocation2] sm:$0xff] %vm1897_vm7, %v1892_v58  ;;  %1971 = vst.msk [vmem:[#allocation2 + $0x60] sm:$0xff] %vm1897_vm7, %v1967_v59  ;;  %v1413_v60 = vpop.f32.mrf.mxu0  ;;  %1604 = vmatmul.mubr.bf16.gmra.mxu0 %v6339_v55  ;;  %v6416_v58 = vld [vmem:[%s9209_s3 + $0x3e4] ss:$16 sps:$4 sm:$0xff]  }
 0x1f2   :  { %2098 = vrot.lane.b32.xlu0 %v1413_v60, %s6897_s25  ;;  %1611 = vmatprep.mubr.bf16.mxu0 %v6349_v56  ;;  %v6411_v56 = vld [vmem:[%s9209_s3 + $0x200] ss:$16 sps:$4 sm:$0xff]  }
 0x1f3   :  { %v1415_v61 = vpop.f32.mrf.mxu0 }
 0x1f4   :  { %v1894_v62 = vpop.permute.xlu1 %1893  ;;  %v2551_v5 = vld [vmem:[#allocation2 + $0x8] sm:$0xff]  ;;  %v6414_v61 = vld [vmem:[%s9209_s3 + $0x3e0] ss:$16 sps:$4 sm:$0xff]  }
 0x1f5   :  { %1899 = vst.msk [vmem:[#allocation2 + $0x58] sm:$0xff] %vm1897_vm7, %v1894_v62  ;;  %v1416_v63 = vpop.f32.mrf.mxu0 }
 0x1f6   :  { %2100 = vrot.lane.b32.xlu1 %v1416_v63, %s6897_s25  ;;  %v6366_v63 = vld [vmem:[%s9208_s0 + $0x3c0] ss:$8 sps:$4 sm:$0xff]  }
 0x1f7   :  { %v1418_v4 = vpop.f32.mrf.mxu0 }
 0x1f8   :  { %v2562_v7 = vld [vmem:[#allocation2 + $0x60] sm:$0xff] }
 0x1f9   :  { %v1421_v8 = vpop.f32.mrf.mxu0  ;;  %1612 = vmatmul.mubr.bf16.gmra.mxu0 %v6347_v1  ;;  %v7564_v9 = vpack.c.bf16 %v2562_v7, %v2551_v5  ;;  %v2550_v12 = vld [vmem:[#allocation2] sm:$0xff] }
 0x1fa   :  { %2108 = vrot.lane.b32.xlu0 %v1421_v8, %s6898_s26  ;;  %1619 = vmatprep.mubr.bf16.mxu0 %v6356_v3  ;;  %v6422_v1 = vld [vmem:[%s9209_s3 + $0x3c4] ss:$16 sps:$4 sm:$0xff]   ;;  %v6420_v7 = vld [vmem:[%s9209_s3 + $0x3c0] ss:$16 sps:$4 sm:$0xff]  }
 0x1fb   :  { %v1423_v10 = vpop.f32.mrf.mxu0  ;;  %4584 = vmatprep.mubr.bf16.mxu1 %v7564_v9  ;;  %v6371_v3 = vld [vmem:[%s9208_s0 + $0x3d4] ss:$8 sps:$4 sm:$0xff]  }
 0x1fc   :  { %v1977_v11 = vpop.permute.xlu0 %1976  ;;  %v2561_v13 = vld [vmem:[#allocation2 + $0x58] sm:$0xff]  ;;  %v6425_v10 = vld [vmem:[%s9209_s3 + $0x3a4] ss:$16 sps:$4 sm:$0xff]  }
 0x1fd   :  { %1982 = vst.msk [vmem:[#allocation2 + $0x10] sm:$0xff] %vm1831_vm1, %v1977_v11  ;;  %v1424_v14 = vpop.f32.mrf.mxu0  ;;  %v7572_v15 = vpack.c.bf16 %v2561_v13, %v2550_v12  ;;  %v6423_v13 = vld [vmem:[%s9209_s3 + $0x3a0] ss:$16 sps:$4 sm:$0xff]  }
 0x1fe   :  { %2036 = vrot.lane.b32.xlu0 %v7479_v2, %s6898_s26  ;;  %2110 = vrot.lane.b32.xlu1 %v1424_v14, %s6898_s26  ;;  %v6389_v2 = vld [vmem:[%s9209_s3 + $0x2a4] ss:$16 sps:$4 sm:$0xff]   ;;  %v6369_v14 = vld [vmem:[%s9208_s0 + $0x3d0] ss:$8 sps:$4 sm:$0xff]  }
 0x1ff   :  { %v1426_v19 = vpop.f32.mrf.mxu0  ;;  %4585 = vmatmul.mubr.bf16.vlgmr.msra.gmra.mxu1 %v7572_v15 }
 0x200   :  { %v1979_v52 = vpop.permute.xlu1 %1978  ;;  %4596 = vmatpush1.bf16.msra.mxu1 %v6378_v49 }
 0x201   :  { %1983 = vst.msk [vmem:[#allocation2 + $0x68] sm:$0xff] %vm1831_vm1, %v1979_v52  ;;  %v1429_v21 = vpop.f32.mrf.mxu0  ;;  %1620 = vmatmul.mubr.bf16.gmra.mxu0 %v6354_v16  ;;  %4597 = vmatprep.subr.bf16.mxu1 %v6386_v17  ;;  %v6431_v16 = vld [vmem:[%s9209_s3 + $0x384] ss:$16 sps:$4 sm:$0xff]   ;;  %v6429_v52 = vld [vmem:[%s9209_s3 + $0x380] ss:$16 sps:$4 sm:$0xff]  }
 0x202   :  { %2116 = vst.msk [vmem:[#allocation2 + $0x20] sm:$0xff] %vm1820_vm0, %v1429_v21  ;;  %2038 = vrot.lane.b32.xlu1 %v7485_v6, %s6898_s26  ;;  %1627 = vmatprep.mubr.bf16.mxu0 %v6359_v18  ;;  %v6395_v6 = vld [vmem:[%s9209_s3 + $0x284] ss:$16 sps:$4 sm:$0xff]  }
 0x203   :  { %v1431_v22 = vpop.f32.mrf.mxu0  ;;  %v6374_v17 = vld [vmem:[%s9208_s0 + $0x3e4] ss:$8 sps:$4 sm:$0xff]  }
 0x204   :  { %v1987_v23 = vpop.permute.xlu0 %1986  ;;  %4598 = vmatpush1.bf16.msra.mxu1 %v6384_v20  ;;  %v6434_v21 = vld [vmem:[%s9209_s3 + $0x364] ss:$16 sps:$4 sm:$0xff]   ;;  %v6432_v22 = vld [vmem:[%s9209_s3 + $0x360] ss:$16 sps:$4 sm:$0xff]  }
 0x205   :  { %1992 = vst.msk [vmem:[#allocation2 + $0x10] sm:$0xff] %vm1842_vm2, %v1987_v23  ;;  %v1432_v25 = vpop.f32.mrf.mxu0  ;;  %4599 = vmatprep.subr.bf16.mxu1 %v6389_v2 }
 0x206   :  { %2117 = vst.msk [vmem:[#allocation2 + $0x78] sm:$0xff] %vm1820_vm0, %v1432_v25  ;;  %v6440_v25 = vld [vmem:[%s9209_s3 + $0x344] ss:$16 sps:$4 sm:$0xff]  }
 0x207   :  { %v1434_v28 = vpop.f32.mrf.mxu0 }
 0x208   :  { %v1989_v29 = vpop.permute.xlu1 %1988  ;;  %4600 = vmatpush1.bf16.msra.mxu1 %v6387_v24  ;;  %v6372_v24 = vld [vmem:[%s9208_s0 + $0x3e0] ss:$8 sps:$4 sm:$0xff]  }
 0x209   :  { %1993 = vst.msk [vmem:[#allocation2 + $0x68] sm:$0xff] %vm1842_vm2, %v1989_v29  ;;  %v1437_v31 = vpop.f32.mrf.mxu0  ;;  %1628 = vmatmul.mubr.bf16.gmra.mxu0 %v6357_v26  ;;  %4601 = vmatprep.subr.bf16.mxu1 %v6395_v6  ;;  %v6377_v26 = vld [vmem:[%s9208_s0 + $0x3f4] ss:$8 sps:$4 sm:$0xff]  }
 0x20a   :  { %2120 = vrot.lane.b32.xlu0 %v1437_v31, %s6892_s19  ;;  %1635 = vmatprep.mubr.bf16.mxu0 %v6362_v27  ;;  %v6438_v27 = vld [vmem:[%s9209_s3 + $0x340] ss:$16 sps:$4 sm:$0xff]   ;;  %v6443_v29 = vld [vmem:[%s9209_s3 + $0x324] ss:$16 sps:$4 sm:$0xff]  }
 0x20b   :  { %v1439_v33 = vpop.f32.mrf.mxu0  ;;  %v6441_v31 = vld [vmem:[%s9209_s3 + $0x320] ss:$16 sps:$4 sm:$0xff]  }
 0x20c   :  { %v1997_v34 = vpop.permute.xlu0 %1996  ;;  %4602 = vmatpush1.bf16.msra.mxu1 %v6393_v30  ;;  %v6375_v33 = vld [vmem:[%s9208_s0 + $0x3f0] ss:$8 sps:$4 sm:$0xff]  }
 0x20d   :  { %2002 = vst.msk [vmem:[#allocation2 + $0x10] sm:$0xff] %vm1853_vm3, %v1997_v34  ;;  %v1440_v36 = vpop.f32.mrf.mxu0  ;;  %4603 = vmatprep.subr.bf16.mxu1 %v6398_v32  ;;  %v6449_v34 = vld [vmem:[%s9209_s3 + $0x304] ss:$16 sps:$4 sm:$0xff]  }
 0x20e   :  { %2122 = vrot.lane.b32.xlu1 %v1440_v36, %s6892_s19 }
 0x20f   :  { %v1442_v40 = vpop.f32.mrf.mxu0 }
 0x210   :  { %v1999_v41 = vpop.permute.xlu1 %1998  ;;  %4604 = vmatpush1.bf16.msra.mxu1 %v6396_v35  ;;  %v6383_v35 = vld [vmem:[%s9208_s0 + $0x404] ss:$8 sps:$4 sm:$0xff]  }
 0x211   :  { %2003 = vst.msk [vmem:[#allocation2 + $0x68] sm:$0xff] %vm1853_vm3, %v1999_v41  ;;  %v1445_v43 = vpop.f32.mrf.mxu0  ;;  %1636 = vmatmul.mubr.bf16.gmra.mxu0 %v6360_v37  ;;  %4605 = vmatprep.subr.bf16.mxu1 %v6404_v38  ;;  %v6447_v37 = vld [vmem:[%s9209_s3 + $0x300] ss:$16 sps:$4 sm:$0xff]  }
 0x212   :  { %2130 = vrot.lane.b32.xlu0 %v1445_v43, %s6893_s23  ;;  %1643 = vmatprep.mubr.bf16.mxu0 %v6365_v39  ;;  %v6476_v43 = vld [vmem:[%s9209_s3 + $0x4e4] ss:$16 sps:$4 sm:$0xff]  }
 0x213   :  { %v1447_v45 = vpop.f32.mrf.mxu0 }
 0x214   :  { %v2007_v46 = vpop.permute.xlu0 %2006  ;;  %4606 = vmatpush1.bf16.msra.mxu1 %v6402_v42  ;;  %v6381_v42 = vld [vmem:[%s9208_s0 + $0x400] ss:$8 sps:$4 sm:$0xff]  }
 0x215   :  { %2012 = vst.msk [vmem:[#allocation2 + $0x10] sm:$0xff] %vm1864_vm4, %v2007_v46  ;;  %v1448_v48 = vpop.f32.mrf.mxu0  ;;  %4607 = vmatprep.subr.bf16.mxu1 %v6407_v44  ;;  %v6392_v44 = vld [vmem:[%s9208_s0 + $0x414] ss:$8 sps:$4 sm:$0xff]  }
 0x216   :  { %2132 = vrot.lane.b32.xlu1 %v1448_v48, %s6893_s23 }
 0x217   :  { %v1450_v54 = vpop.f32.mrf.mxu0 }
 0x218   :  { %v2009_v55 = vpop.permute.xlu1 %2008  ;;  %4608 = vmatpush1.bf16.msra.mxu1 %v6405_v47  ;;  %v6401_v54 = vld [vmem:[%s9208_s0 + $0x424] ss:$8 sps:$4 sm:$0xff]  }
 0x219   :  { %2013 = vst.msk [vmem:[#allocation2 + $0x68] sm:$0xff] %vm1864_vm4, %v2009_v55  ;;  %v1453_v57 = vpop.f32.mrf.mxu0  ;;  %1644 = vmatmul.mubr.bf16.gmra.mxu0 %v6363_v50  ;;  %4609 = vmatprep.subr.bf16.mxu1 %v6413_v51 }
 0x21a   :  { %2140 = vrot.lane.b32.xlu0 %v1453_v57, %s6894_s28  ;;  %1651 = vmatprep.mubr.bf16.mxu0 %v6368_v53  ;;  %v6390_v53 = vld [vmem:[%s9208_s0 + $0x410] ss:$8 sps:$4 sm:$0xff]  }
 0x21b   :  { %v1455_v59 = vpop.f32.mrf.mxu0 }
 0x21c   :  { %v2017_v60 = vpop.permute.xlu0 %2016  ;;  %4610 = vmatpush1.bf16.msra.mxu1 %v6411_v56 }
 0x21d   :  { %2022 = vst.msk [vmem:[#allocation2 + $0x10] sm:$0xff] %vm1875_vm5, %v2017_v60  ;;  %v1456_v62 = vpop.f32.mrf.mxu0  ;;  %4611 = vmatprep.subr.bf16.mxu1 %v6416_v58 }
 0x21e   :  { %2142 = vrot.lane.b32.xlu1 %v1456_v62, %s6894_s28  ;;  %v6410_v62 = vld [vmem:[%s9208_s0 + $0x434] ss:$8 sps:$4 sm:$0xff]  }
 0x21f   :  { %v1458_v4 = vpop.f32.mrf.mxu0 }
 0x220   :  { %v2019_v5 = vpop.permute.xlu1 %2018  ;;  %4612 = vmatpush2.bf16.msra.mxu1 %v6414_v61  ;;  %v6399_v61 = vld [vmem:[%s9208_s0 + $0x420] ss:$8 sps:$4 sm:$0xff]  }
 0x221   :  { %2023 = vst.msk [vmem:[#allocation2 + $0x68] sm:$0xff] %vm1875_vm5, %v2019_v5  ;;  %v1461_v8 = vpop.f32.mrf.mxu0  ;;  %1652 = vmatmul.mubr.bf16.gmra.mxu0 %v6366_v63  ;;  %4613 = vmatprep.subr.bf16.mxu1 %v6422_v1 }
 0x222   :  { %2150 = vrot.lane.b32.xlu0 %v1461_v8, %s6895_s14  ;;  %1659 = vmatprep.mubr.bf16.mxu0 %v6371_v3  ;;  %v6408_v8 = vld [vmem:[%s9208_s0 + $0x430] ss:$8 sps:$4 sm:$0xff]  }
 0x223   :  { %v1463_v11 = vpop.f32.mrf.mxu0 }
 0x224   :  { %v2027_v12 = vpop.permute.xlu0 %2026  ;;  %4614 = vmatpush2.bf16.msra.mxu1 %v6420_v7 }
 0x225   :  { %2032 = vst.msk [vmem:[#allocation2 + $0x10] sm:$0xff] %vm1886_vm6, %v2027_v12  ;;  %v1464_v49 = vpop.f32.mrf.mxu0  ;;  %4615 = vmatprep.subr.bf16.mxu1 %v6425_v10  ;;  %v6419_v10 = vld [vmem:[%s9208_s0 + $0x444] ss:$8 sps:$4 sm:$0xff]  }
 0x226   :  { %2152 = vrot.lane.b32.xlu1 %v1464_v49, %s6895_s14 }
 0x227   :  { %v1466_v18 = vpop.f32.mrf.mxu0 }
 0x228   :  { %v2029_v19 = vpop.permute.xlu1 %2028  ;;  %4616 = vmatpush2.bf16.msra.mxu1 %v6423_v13  ;;  %v6428_v18 = vld [vmem:[%s9208_s0 + $0x454] ss:$8 sps:$4 sm:$0xff]  }
 0x229   :  { %2033 = vst.msk [vmem:[#allocation2 + $0x68] sm:$0xff] %vm1886_vm6, %v2029_v19  ;;  %v1469_v20 = vpop.f32.mrf.mxu0  ;;  %1660 = vmatmul.mubr.bf16.gmra.mxu0 %v6369_v14  ;;  %4617 = vmatprep.subr.bf16.mxu1 %v6431_v16 }
 0x22a   :  { %2160 = vrot.lane.b32.xlu0 %v1469_v20, %s6896_s20  ;;  %1667 = vmatprep.mubr.bf16.mxu0 %v6374_v17  ;;  %v6417_v17 = vld [vmem:[%s9208_s0 + $0x440] ss:$8 sps:$4 sm:$0xff]  }
 0x22b   :  { %v1471_v2 = vpop.f32.mrf.mxu0 }
 0x22c   :  { %4618 = vmatpush2.bf16.msra.mxu1 %v6429_v52 }
 0x22d   :  { %v1472_v23 = vpop.f32.mrf.mxu0  ;;  %4619 = vmatprep.subr.bf16.mxu1 %v6434_v21 }
 0x22e   :  { %2162 = vrot.lane.b32.xlu1 %v1472_v23, %s6896_s20  ;;  %v6426_v23 = vld [vmem:[%s9208_s0 + $0x450] ss:$8 sps:$4 sm:$0xff]  }
 0x22f   :  { %v1474_v6 = vpop.f32.mrf.mxu0 }
 0x230   :  { %4620 = vmatpush2.bf16.msra.mxu1 %v6432_v22 }
 0x231   :  { %v1477_v28 = vpop.f32.mrf.mxu0  ;;  %1668 = vmatmul.mubr.bf16.gmra.mxu0 %v6372_v24  ;;  %4621 = vmatprep.subr.bf16.mxu1 %v6440_v25  ;;  %v6437_v24 = vld [vmem:[%s9208_s0 + $0x464] ss:$8 sps:$4 sm:$0xff]  }
 0x232   :  { %2170 = vrot.lane.b32.xlu0 %v1477_v28, %s6897_s25  ;;  %1675 = vmatprep.mubr.bf16.mxu0 %v6377_v26 }
 0x233   :  { %v1479_v30 = vpop.f32.mrf.mxu0 }
 0x234   :  { %4622 = vmatpush2.bf16.msra.mxu1 %v6438_v27  ;;  %v6435_v30 = vld [vmem:[%s9208_s0 + $0x460] ss:$8 sps:$4 sm:$0xff]  }
 0x235   :  { %v1480_v32 = vpop.f32.mrf.mxu0  ;;  %4623 = vmatprep.subr.bf16.mxu1 %v6443_v29 }
 0x236   :  { %2172 = vrot.lane.b32.xlu1 %v1480_v32, %s6897_s25 }
 0x237   :  { %v1482_v36 = vpop.f32.mrf.mxu0 }
 0x238   :  { %4624 = vmatpush2.bf16.msra.mxu1 %v6441_v31  ;;  %v6446_v31 = vld [vmem:[%s9208_s0 + $0x474] ss:$8 sps:$4 sm:$0xff]  }
 0x239   :  { %v7743_v38 = vpop.f32.mrf.mxu0  ;;  %1676 = vmatmul.mubr.bf16.gmra.mxu0 %v6375_v33  ;;  %4625 = vmatprep.subr.bf16.mxu1 %v6449_v34 }
 0x23a   :  { %1683 = vmatprep.mubr.bf16.mxu0 %v6383_v35 }
 0x23b   :  { %v1487_v39 = vpop.f32.mrf.mxu0 }
 0x23c   :  { %v2049_v40 = vpop.permute.xlu0 %2048  ;;  %4626 = vmatpush2.bf16.msra.mxu1 %v6447_v37 }
 0x23d   :  { %2054 = vst.msk [vmem:[#allocation2 + $0x18] sm:$0xff] %vm1831_vm1, %v2049_v40  ;;  %v7746_v41 = vpop.f32.mrf.mxu0  ;;  %4638 = vmatprep.subr.bf16.mxu1 %v6476_v43  ;;  %v6444_v40 = vld [vmem:[%s9208_s0 + $0x470] ss:$8 sps:$4 sm:$0xff]  }
 0x23f   :  { %v1490_v45 = vpop.f32.mrf.mxu0 }
 0x240   :  { %v2051_v46 = vpop.permute.xlu1 %2050 }
 0x241   :  { %2055 = vst.msk [vmem:[#allocation2 + $0x70] sm:$0xff] %vm1831_vm1, %v2051_v46  ;;  %v1493_v47 = vpop.f32.mrf.mxu0  ;;  %1684 = vmatmul.mubr.bf16.gmra.mxu0 %v6381_v42  ;;  %v6452_v42 = vld [vmem:[%s9208_s0 + $0x484] ss:$8 sps:$4 sm:$0xff]  }
 0x242   :  { %2188 = vst.msk [vmem:[#allocation2 + $0x28] sm:$0xff] %vm1820_vm0, %v1493_v47  ;;  %1691 = vmatprep.mubr.bf16.mxu0 %v6392_v44 }
 0x243   :  { %v1495_v48 = vpop.f32.mrf.mxu0 }
 0x244   :  { %v2059_v50 = vpop.permute.xlu0 %2058 }
 0x245   :  { %2064 = vst.msk [vmem:[#allocation2 + $0x18] sm:$0xff] %vm1842_vm2, %v2059_v50  ;;  %v1496_v51 = vpop.f32.mrf.mxu0 }
 0x246   :  { %2189 = vst.msk [vmem:[#allocation2 + $0x80] sm:$0xff] %vm1820_vm0, %v1496_v51 }
 0x247   :  { %v1498_v55 = vpop.f32.mrf.mxu0 }
 0x248   :  { %v2061_v56 = vpop.permute.xlu1 %2060 }
 0x249   :  { %2065 = vst.msk [vmem:[#allocation2 + $0x70] sm:$0xff] %vm1842_vm2, %v2061_v56  ;;  %v1501_v57 = vpop.f32.mrf.mxu0  ;;  %1692 = vmatmul.mubr.bf16.gmra.mxu0 %v6390_v53 }
 0x24a   :  { %2192 = vrot.lane.b32.xlu0 %v1501_v57, %s6892_s19  ;;  %1699 = vmatprep.mubr.bf16.mxu0 %v6401_v54  ;;  %v6474_v54 = vld [vmem:[%s9209_s3 + $0x4e0] ss:$16 sps:$4 sm:$0xff]  }
 0x24b   :  { %v1503_v58 = vpop.f32.mrf.mxu0  ;;  %v6450_v57 = vld [vmem:[%s9208_s0 + $0x480] ss:$8 sps:$4 sm:$0xff]  }
 0x24c   :  { %v2069_v59 = vpop.permute.xlu0 %2068  ;;  %v6479_v58 = vld [vmem:[%s9209_s3 + $0x4c4] ss:$16 sps:$4 sm:$0xff]  }
 0x24d   :  { %2074 = vst.msk [vmem:[#allocation2 + $0x18] sm:$0xff] %vm1853_vm3, %v2069_v59  ;;  %v1504_v60 = vpop.f32.mrf.mxu0  ;;  %v6455_v59 = vld [vmem:[%s9208_s0 + $0x494] ss:$8 sps:$4 sm:$0xff]  }
 0x24e   :  { %2194 = vrot.lane.b32.xlu1 %v1504_v60, %s6892_s19 }
 0x24f   :  { %v1506_v63 = vpop.f32.mrf.mxu0 }
 0x250   :  { %v2071_v1 = vpop.permute.xlu1 %2070 }
 0x251   :  { %2075 = vst.msk [vmem:[#allocation2 + $0x70] sm:$0xff] %vm1853_vm3, %v2071_v1  ;;  %v1509_v3 = vpop.f32.mrf.mxu0  ;;  %1700 = vmatmul.mubr.bf16.gmra.mxu0 %v6399_v61 }
 0x252   :  { %2202 = vrot.lane.b32.xlu0 %v1509_v3, %s6893_s23  ;;  %1707 = vmatprep.mubr.bf16.mxu0 %v6410_v62  ;;  %v6477_v62 = vld [vmem:[%s9209_s3 + $0x4c0] ss:$16 sps:$4 sm:$0xff]  }
 0x253   :  { %v1511_v4 = vpop.f32.mrf.mxu0 }
 0x254   :  { %v2079_v5 = vpop.permute.xlu0 %2078  ;;  %v6480_v4 = vld [vmem:[%s9209_s3 + $0x4a0] ss:$16 sps:$4 sm:$0xff]  }
 0x255   :  { %2084 = vst.msk [vmem:[#allocation2 + $0x18] sm:$0xff] %vm1864_vm4, %v2079_v5  ;;  %v1512_v7 = vpop.f32.mrf.mxu0 }
 0x256   :  { %2204 = vrot.lane.b32.xlu1 %v1512_v7, %s6893_s23  ;;  %v6453_v7 = vld [vmem:[%s9208_s0 + $0x490] ss:$8 sps:$4 sm:$0xff]  }
 0x257   :  { %v1514_v11 = vpop.f32.mrf.mxu0 }
 0x258   :  { %v2081_v12 = vpop.permute.xlu1 %2080 }
 0x259   :  { %2085 = vst.msk [vmem:[#allocation2 + $0x70] sm:$0xff] %vm1864_vm4, %v2081_v12  ;;  %v1517_v13 = vpop.f32.mrf.mxu0  ;;  %1708 = vmatmul.mubr.bf16.gmra.mxu0 %v6408_v8  ;;  %v6458_v8 = vld [vmem:[%s9208_s0 + $0x4a4] ss:$8 sps:$4 sm:$0xff]   ;;  %v6483_v12 = vld [vmem:[%s9209_s3 + $0x480] ss:$16 sps:$4 sm:$0xff]  }
 0x25a   :  { %2212 = vrot.lane.b32.xlu0 %v1517_v13, %s6894_s28  ;;  %1715 = vmatprep.mubr.bf16.mxu0 %v6419_v10 }
 0x25b   :  { %v1519_v49 = vpop.f32.mrf.mxu0 }
 0x25c   :  { %v2089_v14 = vpop.permute.xlu0 %2088  ;;  %v6488_v49 = vld [vmem:[%s9209_s3 + $0x464] ss:$16 sps:$4 sm:$0xff]  }
 0x25d   :  { %2094 = vst.msk [vmem:[#allocation2 + $0x18] sm:$0xff] %vm1875_vm5, %v2089_v14  ;;  %v1520_v16 = vpop.f32.mrf.mxu0 }
 0x25e   :  { %2214 = vrot.lane.b32.xlu1 %v1520_v16, %s6894_s28 }
 0x25f   :  { %v1522_v19 = vpop.f32.mrf.mxu0 }
 0x260   :  { %v2091_v52 = vpop.permute.xlu1 %2090  ;;  %v6456_v19 = vld [vmem:[%s9208_s0 + $0x4a0] ss:$8 sps:$4 sm:$0xff]  }
 0x261   :  { %2095 = vst.msk [vmem:[#allocation2 + $0x70] sm:$0xff] %vm1875_vm5, %v2091_v52  ;;  %v1525_v20 = vpop.f32.mrf.mxu0  ;;  %1716 = vmatmul.mubr.bf16.gmra.mxu0 %v6417_v17  ;;  %v6486_v17 = vld [vmem:[%s9209_s3 + $0x460] ss:$16 sps:$4 sm:$0xff]   ;;  %v6491_v52 = vld [vmem:[%s9209_s3 + $0x444] ss:$16 sps:$4 sm:$0xff]  }
 0x262   :  { %2222 = vrot.lane.b32.xlu0 %v1525_v20, %s6895_s14  ;;  %1723 = vmatprep.mubr.bf16.mxu0 %v6428_v18  ;;  %v6461_v20 = vld [vmem:[%s9208_s0 + $0x4b4] ss:$8 sps:$4 sm:$0xff]  }
 0x263   :  { %v1527_v21 = vpop.f32.mrf.mxu0 }
 0x264   :  { %v2099_v2 = vpop.permute.xlu0 %2098 }
 0x265   :  { %2104 = vst.msk [vmem:[#allocation2 + $0x18] sm:$0xff] %vm1886_vm6, %v2099_v2  ;;  %v1528_v22 = vpop.f32.mrf.mxu0 }
 0x266   :  { %2224 = vrot.lane.b32.xlu1 %v1528_v22, %s6895_s14  ;;  %v6489_v22 = vld [vmem:[%s9209_s3 + $0x440] ss:$16 sps:$4 sm:$0xff]  }
 0x267   :  { %v1530_v25 = vpop.f32.mrf.mxu0 }
 0x268   :  { %v2101_v26 = vpop.permute.xlu1 %2100 }
 0x269   :  { %2105 = vst.msk [vmem:[#allocation2 + $0x70] sm:$0xff] %vm1886_vm6, %v2101_v26  ;;  %v1533_v6 = vpop.f32.mrf.mxu0  ;;  %1724 = vmatmul.mubr.bf16.gmra.mxu0 %v6426_v23 }
 0x26a   :  { %2232 = vrot.lane.b32.xlu0 %v1533_v6, %s6896_s20  ;;  %1731 = vmatprep.mubr.bf16.mxu0 %v6437_v24  ;;  %v6494_v24 = vld [vmem:[%s9209_s3 + $0x424] ss:$16 sps:$4 sm:$0xff]   ;;  %v6492_v6 = vld [vmem:[%s9209_s3 + $0x420] ss:$16 sps:$4 sm:$0xff]  }
 0x26b   :  { %v1535_v27 = vpop.f32.mrf.mxu0 }
 0x26c   :  { %v2109_v28 = vpop.permute.xlu0 %2108 }
 0x26d   :  { %2114 = vst.msk [vmem:[#allocation2 + $0x18] sm:$0xff] %vm1897_vm7, %v2109_v28  ;;  %v1536_v29 = vpop.f32.mrf.mxu0  ;;  %v6459_v28 = vld [vmem:[%s9208_s0 + $0x4b0] ss:$8 sps:$4 sm:$0xff]  }
 0x26e   :  { %2234 = vrot.lane.b32.xlu1 %v1536_v29, %s6896_s20  ;;  %v6497_v29 = vld [vmem:[%s9209_s3 + $0x404] ss:$16 sps:$4 sm:$0xff]  }
 0x26f   :  { %v1538_v32 = vpop.f32.mrf.mxu0 }
 0x270   :  { %v2037_v33 = vpop.permute.xlu0 %2036  ;;  %v2111_v34 = vpop.permute.xlu1 %2110 }
 0x271   :  { %2042 = vst.msk [vmem:[#allocation2 + $0x10] sm:$0xff] %vm1897_vm7, %v2037_v33  ;;  %2115 = vst.msk [vmem:[#allocation2 + $0x70] sm:$0xff] %vm1897_vm7, %v2111_v34  ;;  %v1541_v35 = vpop.f32.mrf.mxu0  ;;  %1732 = vmatmul.mubr.bf16.gmra.mxu0 %v6435_v30  ;;  %v6464_v30 = vld [vmem:[%s9208_s0 + $0x4c4] ss:$8 sps:$4 sm:$0xff]   ;;  %v6495_v33 = vld [vmem:[%s9209_s3 + $0x400] ss:$16 sps:$4 sm:$0xff]  }
 0x272   :  { %2242 = vrot.lane.b32.xlu0 %v1541_v35, %s6897_s25  ;;  %1739 = vmatprep.mubr.bf16.mxu0 %v6446_v31  ;;  %v6500_v35 = vld [vmem:[%s9209_s3 + $0x5e4] ss:$16 sps:$4 sm:$0xff]  }
 0x273   :  { %v1543_v36 = vpop.f32.mrf.mxu0 }
 0x274   :  { %v2039_v37 = vpop.permute.xlu1 %2038  ;;  %v2553_v44 = vld [vmem:[#allocation2 + $0x18] sm:$0xff] }
 0x275   :  { %2043 = vst.msk [vmem:[#allocation2 + $0x68] sm:$0xff] %vm1897_vm7, %v2039_v37  ;;  %v1544_v39 = vpop.f32.mrf.mxu0 }
 0x276   :  { %2244 = vrot.lane.b32.xlu1 %v1544_v39, %s6897_s25  ;;  %v6498_v39 = vld [vmem:[%s9209_s3 + $0x5e0] ss:$16 sps:$4 sm:$0xff]  }
 0x277   :  { %v1546_v43 = vpop.f32.mrf.mxu0 }
 0x278   :  { %v2564_v45 = vld [vmem:[#allocation2 + $0x70] sm:$0xff] }
 0x279   :  { %v1549_v46 = vpop.f32.mrf.mxu0  ;;  %1740 = vmatmul.mubr.bf16.gmra.mxu0 %v6444_v40  ;;  %v7828_v47 = vpack.c.bf16 %v2564_v45, %v2553_v44  ;;  %v2552_v51 = vld [vmem:[#allocation2 + $0x10] sm:$0xff] }
 0x27a   :  { %2252 = vrot.lane.b32.xlu0 %v1549_v46, %s6898_s26  ;;  %1747 = vmatprep.mubr.bf16.mxu0 %v6452_v42  ;;  %v6462_v42 = vld [vmem:[%s9208_s0 + $0x4c0] ss:$8 sps:$4 sm:$0xff]   ;;  %v6503_v43 = vld [vmem:[%s9209_s3 + $0x5c4] ss:$16 sps:$4 sm:$0xff]  }
 0x27b   :  { %v1551_v48 = vpop.f32.mrf.mxu0  ;;  %4627 = vmatprep.mubr.bf16.mxu1 %v7828_v47  ;;  %v6467_v44 = vld [vmem:[%s9208_s0 + $0x4d4] ss:$8 sps:$4 sm:$0xff]  }
 0x27c   :  { %v2121_v50 = vpop.permute.xlu0 %2120  ;;  %v2563_v53 = vld [vmem:[#allocation2 + $0x68] sm:$0xff]  ;;  %v6501_v48 = vld [vmem:[%s9209_s3 + $0x5c0] ss:$16 sps:$4 sm:$0xff]  }
 0x27d   :  { %2126 = vst.msk [vmem:[#allocation2 + $0x20] sm:$0xff] %vm1831_vm1, %v2121_v50  ;;  %v1552_v55 = vpop.f32.mrf.mxu0  ;;  %v7836_v56 = vpack.c.bf16 %v2563_v53, %v2552_v51  ;;  %v6506_v51 = vld [vmem:[%s9209_s3 + $0x5a4] ss:$16 sps:$4 sm:$0xff]  }
 0x27e   :  { %2180 = vrot.lane.b32.xlu0 %v7743_v38, %s6898_s26  ;;  %2254 = vrot.lane.b32.xlu1 %v1552_v55, %s6898_s26  ;;  %v6482_v38 = vld [vmem:[%s9209_s3 + $0x4a4] ss:$16 sps:$4 sm:$0xff]   ;;  %v6504_v55 = vld [vmem:[%s9209_s3 + $0x5a0] ss:$16 sps:$4 sm:$0xff]  }
 0x27f   :  { %v1554_v60 = vpop.f32.mrf.mxu0  ;;  %4628 = vmatmul.mubr.bf16.vlgmr.msra.gmra.mxu1 %v7836_v56 }
 0x280   :  { %v2123_v61 = vpop.permute.xlu1 %2122  ;;  %4639 = vmatpush1.bf16.msra.mxu1 %v6474_v54  ;;  %v6470_v60 = vld [vmem:[%s9208_s0 + $0x4e4] ss:$8 sps:$4 sm:$0xff]  }
 0x281   :  { %2127 = vst.msk [vmem:[#allocation2 + $0x78] sm:$0xff] %vm1831_vm1, %v2123_v61  ;;  %v1557_v63 = vpop.f32.mrf.mxu0  ;;  %1748 = vmatmul.mubr.bf16.gmra.mxu0 %v6450_v57  ;;  %4640 = vmatprep.subr.bf16.mxu1 %v6479_v58  ;;  %v6465_v58 = vld [vmem:[%s9208_s0 + $0x4d0] ss:$8 sps:$4 sm:$0xff]  }
 0x282   :  { %2260 = vst.msk [vmem:[#allocation2 + $0x30] sm:$0xff] %vm1820_vm0, %v1557_v63  ;;  %2182 = vrot.lane.b32.xlu1 %v7746_v41, %s6898_s26  ;;  %1755 = vmatprep.mubr.bf16.mxu0 %v6455_v59  ;;  %v6485_v41 = vld [vmem:[%s9209_s3 + $0x484] ss:$16 sps:$4 sm:$0xff]   ;;  %v6507_v63 = vld [vmem:[%s9209_s3 + $0x580] ss:$16 sps:$4 sm:$0xff]  }
 0x283   :  { %v1559_v1 = vpop.f32.mrf.mxu0  ;;  %v6509_v59 = vld [vmem:[%s9209_s3 + $0x584] ss:$16 sps:$4 sm:$0xff]  }
 0x284   :  { %v2131_v3 = vpop.permute.xlu0 %2130  ;;  %4641 = vmatpush1.bf16.msra.mxu1 %v6477_v62  ;;  %v6512_v1 = vld [vmem:[%s9209_s3 + $0x564] ss:$16 sps:$4 sm:$0xff]  }
 0x285   :  { %2136 = vst.msk [vmem:[#allocation2 + $0x20] sm:$0xff] %vm1842_vm2, %v2131_v3  ;;  %v1560_v5 = vpop.f32.mrf.mxu0  ;;  %4642 = vmatprep.subr.bf16.mxu1 %v6482_v38 }
 0x286   :  { %2261 = vst.msk [vmem:[#allocation2 + $0x88] sm:$0xff] %vm1820_vm0, %v1560_v5 }
 0x287   :  { %v1562_v10 = vpop.f32.mrf.mxu0 }
 0x288   :  { %v2133_v11 = vpop.permute.xlu1 %2132  ;;  %4643 = vmatpush1.bf16.msra.mxu1 %v6480_v4  ;;  %v6510_v4 = vld [vmem:[%s9209_s3 + $0x560] ss:$16 sps:$4 sm:$0xff]  }
 0x289   :  { %2137 = vst.msk [vmem:[#allocation2 + $0x78] sm:$0xff] %vm1842_vm2, %v2133_v11  ;;  %v1565_v13 = vpop.f32.mrf.mxu0  ;;  %1756 = vmatmul.mubr.bf16.gmra.mxu0 %v6453_v7  ;;  %4644 = vmatprep.subr.bf16.mxu1 %v6485_v41  ;;  %v6468_v7 = vld [vmem:[%s9208_s0 + $0x4e0] ss:$8 sps:$4 sm:$0xff]   ;;  %v6515_v41 = vld [vmem:[%s9209_s3 + $0x544] ss:$16 sps:$4 sm:$0xff]  }
 0x28a   :  { %2264 = vrot.lane.b32.xlu0 %v1565_v13, %s6892_s19  ;;  %1763 = vmatprep.mubr.bf16.mxu0 %v6458_v8  ;;  %v6473_v8 = vld [vmem:[%s9208_s0 + $0x4f4] ss:$8 sps:$4 sm:$0xff]   ;;  %v6513_v11 = vld [vmem:[%s9209_s3 + $0x540] ss:$16 sps:$4 sm:$0xff]  }
 0x28b   :  { %v1567_v14 = vpop.f32.mrf.mxu0  ;;  %v6518_v13 = vld [vmem:[%s9209_s3 + $0x524] ss:$16 sps:$4 sm:$0xff]  }
 0x28c   :  { %v2141_v16 = vpop.permute.xlu0 %2140  ;;  %4645 = vmatpush1.bf16.msra.mxu1 %v6483_v12  ;;  %v6516_v14 = vld [vmem:[%s9209_s3 + $0x520] ss:$16 sps:$4 sm:$0xff]  }
 0x28d   :  { %2146 = vst.msk [vmem:[#allocation2 + $0x20] sm:$0xff] %vm1853_vm3, %v2141_v16  ;;  %v1568_v18 = vpop.f32.mrf.mxu0  ;;  %4646 = vmatprep.subr.bf16.mxu1 %v6488_v49 }
 0x28e   :  { %2266 = vrot.lane.b32.xlu1 %v1568_v18, %s6892_s19  ;;  %v6521_v18 = vld [vmem:[%s9209_s3 + $0x504] ss:$16 sps:$4 sm:$0xff]  }
 0x28f   :  { %v1570_v21 = vpop.f32.mrf.mxu0 }
 0x290   :  { %v2143_v2 = vpop.permute.xlu1 %2142  ;;  %4647 = vmatpush1.bf16.msra.mxu1 %v6486_v17  ;;  %v6471_v17 = vld [vmem:[%s9208_s0 + $0x4f0] ss:$8 sps:$4 sm:$0xff]  }
 0x291   :  { %2147 = vst.msk [vmem:[#allocation2 + $0x78] sm:$0xff] %vm1853_vm3, %v2143_v2  ;;  %v1573_v23 = vpop.f32.mrf.mxu0  ;;  %1764 = vmatmul.mubr.bf16.gmra.mxu0 %v6456_v19  ;;  %4648 = vmatprep.subr.bf16.mxu1 %v6491_v52  ;;  %v6524_v19 = vld [vmem:[%s9208_s0 + $0x504] ss:$8 sps:$4 sm:$0xff]  }
 0x292   :  { %2274 = vrot.lane.b32.xlu0 %v1573_v23, %s6893_s23  ;;  %1771 = vmatprep.mubr.bf16.mxu0 %v6461_v20  ;;  %v6519_v20 = vld [vmem:[%s9209_s3 + $0x500] ss:$16 sps:$4 sm:$0xff]  }
 0x293   :  { %v1575_v25 = vpop.f32.mrf.mxu0 }
 0x294   :  { %v2151_v26 = vpop.permute.xlu0 %2150  ;;  %4649 = vmatpush1.bf16.msra.mxu1 %v6489_v22  ;;  %v6527_v25 = vld [vmem:[%s9209_s3 + $0x6e4] ss:$16 sps:$4 sm:$0xff]  }
 0x295   :  { %2156 = vst.msk [vmem:[#allocation2 + $0x20] sm:$0xff] %vm1864_vm4, %v2151_v26  ;;  %v1576_v27 = vpop.f32.mrf.mxu0  ;;  %4650 = vmatprep.subr.bf16.mxu1 %v6494_v24  ;;  %v6522_v24 = vld [vmem:[%s9208_s0 + $0x500] ss:$8 sps:$4 sm:$0xff]  }
 0x296   :  { %2276 = vrot.lane.b32.xlu1 %v1576_v27, %s6893_s23 }
 0x297   :  { %v1578_v31 = vpop.f32.mrf.mxu0 }
 0x298   :  { %v2153_v32 = vpop.permute.xlu1 %2152  ;;  %4651 = vmatpush1.bf16.msra.mxu1 %v6492_v6 }
 0x299   :  { %2157 = vst.msk [vmem:[#allocation2 + $0x78] sm:$0xff] %vm1864_vm4, %v2153_v32  ;;  %v1581_v34 = vpop.f32.mrf.mxu0  ;;  %1772 = vmatmul.mubr.bf16.gmra.mxu0 %v6459_v28  ;;  %4652 = vmatprep.subr.bf16.mxu1 %v6497_v29 }
 0x29a   :  { %2284 = vrot.lane.b32.xlu0 %v1581_v34, %s6894_s28  ;;  %1779 = vmatprep.mubr.bf16.mxu0 %v6464_v30 }
 0x29b   :  { %v1583_v36 = vpop.f32.mrf.mxu0 }
 0x29c   :  { %v2161_v37 = vpop.permute.xlu0 %2160  ;;  %4653 = vmatpush1.bf16.msra.mxu1 %v6495_v33 }
 0x29d   :  { %2166 = vst.msk [vmem:[#allocation2 + $0x20] sm:$0xff] %vm1875_vm5, %v2161_v37  ;;  %v1584_v40 = vpop.f32.mrf.mxu0  ;;  %4654 = vmatprep.subr.bf16.mxu1 %v6500_v35 }
 0x29e   :  { %2286 = vrot.lane.b32.xlu1 %v1584_v40, %s6894_s28 }
 0x29f   :  { %v1586_v45 = vpop.f32.mrf.mxu0 }
 0x2a0   :  { %v2163_v46 = vpop.permute.xlu1 %2162  ;;  %4655 = vmatpush2.bf16.msra.mxu1 %v6498_v39 }
 0x2a1   :  { %2167 = vst.msk [vmem:[#allocation2 + $0x78] sm:$0xff] %vm1875_vm5, %v2163_v46  ;;  %v1589_v50 = vpop.f32.mrf.mxu0  ;;  %1780 = vmatmul.mubr.bf16.gmra.mxu0 %v6462_v42  ;;  %4656 = vmatprep.subr.bf16.mxu1 %v6503_v43 }
 0x2a2   :  { %2294 = vrot.lane.b32.xlu0 %v1589_v50, %s6895_s14  ;;  %1787 = vmatprep.mubr.bf16.mxu0 %v6467_v44 }
 0x2a3   :  { %v1591_v53 = vpop.f32.mrf.mxu0 }
 0x2a4   :  { %v2171_v54 = vpop.permute.xlu0 %2170  ;;  %4657 = vmatpush2.bf16.msra.mxu1 %v6501_v48 }
 0x2a5   :  { %2176 = vst.msk [vmem:[#allocation2 + $0x20] sm:$0xff] %vm1886_vm6, %v2171_v54  ;;  %v1592_v57 = vpop.f32.mrf.mxu0  ;;  %4658 = vmatprep.subr.bf16.mxu1 %v6506_v51 }
 0x2a6   :  { %2296 = vrot.lane.b32.xlu1 %v1592_v57, %s6895_s14 }
 0x2a7   :  { %v1594_v61 = vpop.f32.mrf.mxu0 }
 0x2a8   :  { %v2173_v62 = vpop.permute.xlu1 %2172  ;;  %4659 = vmatpush2.bf16.msra.mxu1 %v6504_v55 }
 0x2a9   :  { %2177 = vst.msk [vmem:[#allocation2 + $0x78] sm:$0xff] %vm1886_vm6, %v2173_v62  ;;  %v1597_v38 = vpop.f32.mrf.mxu0  ;;  %1788 = vmatmul.mubr.bf16.gmra.mxu0 %v6465_v58  ;;  %4660 = vmatprep.subr.bf16.mxu1 %v6509_v59 }
 0x2aa   :  { %2304 = vrot.lane.b32.xlu0 %v1597_v38, %s6896_s20  ;;  %1795 = vmatprep.mubr.bf16.mxu0 %v6470_v60 }
 0x2ab   :  { %v1599_v3 = vpop.f32.mrf.mxu0 }
 0x2ac   :  { %4661 = vmatpush2.bf16.msra.mxu1 %v6507_v63 }
 0x2ad   :  { %v1600_v5 = vpop.f32.mrf.mxu0  ;;  %4662 = vmatprep.subr.bf16.mxu1 %v6512_v1 }
 0x2ae   :  { %2306 = vrot.lane.b32.xlu1 %v1600_v5, %s6896_s20 }
 0x2af   :  { %v1602_v10 = vpop.f32.mrf.mxu0 }
 0x2b0   :  { %4663 = vmatpush2.bf16.msra.mxu1 %v6510_v4 }
 0x2b1   :  { %v1605_v12 = vpop.f32.mrf.mxu0  ;;  %1796 = vmatmul.mubr.bf16.gmra.mxu0 %v6468_v7  ;;  %4664 = vmatprep.subr.bf16.mxu1 %v6515_v41 }
 0x2b2   :  { %2314 = vrot.lane.b32.xlu0 %v1605_v12, %s6897_s25  ;;  %1803 = vmatprep.mubr.bf16.mxu0 %v6473_v8 }
 0x2b3   :  { %v1607_v49 = vpop.f32.mrf.mxu0 }
 0x2b4   :  { %4665 = vmatpush2.bf16.msra.mxu1 %v6513_v11 }
 0x2b5   :  { %v1608_v16 = vpop.f32.mrf.mxu0  ;;  %4666 = vmatprep.subr.bf16.mxu1 %v6518_v13 }
 0x2b6   :  { %2316 = vrot.lane.b32.xlu1 %v1608_v16, %s6897_s25 }
 0x2b7   :  { %v1610_v52 = vpop.f32.mrf.mxu0 }
 0x2b8   :  { %4667 = vmatpush2.bf16.msra.mxu1 %v6516_v14 }
 0x2b9   :  { %v8007_v21 = vpop.f32.mrf.mxu0  ;;  %1804 = vmatmul.mubr.bf16.gmra.mxu0 %v6471_v17  ;;  %4668 = vmatprep.subr.bf16.mxu1 %v6521_v18 }
 0x2ba   :  { %1811 = vmatprep.mubr.bf16.mxu0 %v6524_v19 }
 0x2bb   :  { %v1615_v2 = vpop.f32.mrf.mxu0 }
 0x2bc   :  { %v2193_v22 = vpop.permute.xlu0 %2192  ;;  %4669 = vmatpush2.bf16.msra.mxu1 %v6519_v20  ;;  %v6525_v20 = vld [vmem:[%s9209_s3 + $0x6e0] ss:$16 sps:$4 sm:$0xff]  }
 0x2bd   :  { %2198 = vst.msk [vmem:[#allocation2 + $0x28] sm:$0xff] %vm1831_vm1, %v2193_v22  ;;  %v8010_v23 = vpop.f32.mrf.mxu0  ;;  %4681 = vmatprep.subr.bf16.mxu1 %v6527_v25 }
 0x2bf   :  { %v1618_v26 = vpop.f32.mrf.mxu0 }
 0x2c0   :  { %v2195_v6 = vpop.permute.xlu1 %2194 }
 0x2c1   :  { %2199 = vst.msk [vmem:[#allocation2 + $0x80] sm:$0xff] %vm1831_vm1, %v2195_v6  ;;  %v1621_v27 = vpop.f32.mrf.mxu0  ;;  %1812 = vmatmul.mubr.bf16.gmra.mxu0 %v6522_v24  ;;  %v6530_v24 = vld [vmem:[%s9209_s3 + $0x6c4] ss:$16 sps:$4 sm:$0xff]   ;;  %v6528_v6 = vld [vmem:[%s9209_s3 + $0x6c0] ss:$16 sps:$4 sm:$0xff]  }
 0x2c2   :  { %2332 = vst.msk [vmem:[#allocation2 + $0x38] sm:$0xff] %vm1820_vm0, %v1621_v27 }
 0x2c3   :  { %v1623_v28 = vpop.f32.mrf.mxu0 }
 0x2c4   :  { %v2203_v29 = vpop.permute.xlu0 %2202  ;;  %v6533_v28 = vld [vmem:[%s9209_s3 + $0x6a4] ss:$16 sps:$4 sm:$0xff]  }
 0x2c5   :  { %2208 = vst.msk [vmem:[#allocation2 + $0x28] sm:$0xff] %vm1842_vm2, %v2203_v29  ;;  %v1624_v30 = vpop.f32.mrf.mxu0 }
 0x2c6   :  { %2333 = vst.msk [vmem:[#allocation2 + $0x90] sm:$0xff] %vm1820_vm0, %v1624_v30  ;;  %v6531_v30 = vld [vmem:[%s9209_s3 + $0x6a0] ss:$16 sps:$4 sm:$0xff]  }
 0x2c7   :  { %v1626_v31 = vpop.f32.mrf.mxu0 }
 0x2c8   :  { %v2205_v32 = vpop.permute.xlu1 %2204 }
 0x2c9   :  { %2209 = vst.msk [vmem:[#allocation2 + $0x80] sm:$0xff] %vm1842_vm2, %v2205_v32  ;;  %v1629_v33 = vpop.f32.mrf.mxu0  ;;  %v6536_v32 = vld [vmem:[%s9209_s3 + $0x684] ss:$16 sps:$4 sm:$0xff]  }
 0x2ca   :  { %2336 = vrot.lane.b32.xlu0 %v1629_v33, %s6892_s19 }
 0x2cb   :  { %v1631_v34 = vpop.f32.mrf.mxu0 }
 0x2cc   :  { %v2213_v35 = vpop.permute.xlu0 %2212 }
 0x2cd   :  { %2218 = vst.msk [vmem:[#allocation2 + $0x28] sm:$0xff] %vm1853_vm3, %v2213_v35  ;;  %v1632_v36 = vpop.f32.mrf.mxu0 }
 0x2ce   :  { %2338 = vrot.lane.b32.xlu1 %v1632_v36, %s6892_s19  ;;  %v6539_v36 = vld [vmem:[%s9209_s3 + $0x664] ss:$16 sps:$4 sm:$0xff]  }
 0x2cf   :  { %v1634_v37 = vpop.f32.mrf.mxu0 }
 0x2d0   :  { %v2215_v39 = vpop.permute.xlu1 %2214 }
 0x2d1   :  { %2219 = vst.msk [vmem:[#allocation2 + $0x80] sm:$0xff] %vm1853_vm3, %v2215_v39  ;;  %v1637_v40 = vpop.f32.mrf.mxu0 }
 0x2d2   :  { %2346 = vrot.lane.b32.xlu0 %v1637_v40, %s6893_s23  ;;  %v6537_v40 = vld [vmem:[%s9209_s3 + $0x660] ss:$16 sps:$4 sm:$0xff]  }
 0x2d3   :  { %v1639_v42 = vpop.f32.mrf.mxu0 }
 0x2d4   :  { %v2223_v43 = vpop.permute.xlu0 %2222 }
 0x2d5   :  { %2228 = vst.msk [vmem:[#allocation2 + $0x28] sm:$0xff] %vm1864_vm4, %v2223_v43  ;;  %v1640_v44 = vpop.f32.mrf.mxu0  ;;  %v6542_v43 = vld [vmem:[%s9209_s3 + $0x644] ss:$16 sps:$4 sm:$0xff]  }
 0x2d6   :  { %2348 = vrot.lane.b32.xlu1 %v1640_v44, %s6893_s23 }
 0x2d7   :  { %v1642_v45 = vpop.f32.mrf.mxu0 }
 0x2d8   :  { %v2225_v46 = vpop.permute.xlu1 %2224 }
 0x2d9   :  { %2229 = vst.msk [vmem:[#allocation2 + $0x80] sm:$0xff] %vm1864_vm4, %v2225_v46  ;;  %v1645_v48 = vpop.f32.mrf.mxu0  ;;  %v6540_v46 = vld [vmem:[%s9209_s3 + $0x640] ss:$16 sps:$4 sm:$0xff]  }
 0x2da   :  { %2356 = vrot.lane.b32.xlu0 %v1645_v48, %s6894_s28 }
 0x2db   :  { %v1647_v50 = vpop.f32.mrf.mxu0 }
 0x2dc   :  { %v2233_v51 = vpop.permute.xlu0 %2232  ;;  %v6545_v50 = vld [vmem:[%s9209_s3 + $0x624] ss:$16 sps:$4 sm:$0xff]  }
 0x2dd   :  { %2238 = vst.msk [vmem:[#allocation2 + $0x28] sm:$0xff] %vm1875_vm5, %v2233_v51  ;;  %v1648_v53 = vpop.f32.mrf.mxu0 }
 0x2de   :  { %2358 = vrot.lane.b32.xlu1 %v1648_v53, %s6894_s28 }
 0x2df   :  { %v1650_v54 = vpop.f32.mrf.mxu0 }
 0x2e0   :  { %v2235_v55 = vpop.permute.xlu1 %2234  ;;  %v6543_v54 = vld [vmem:[%s9209_s3 + $0x620] ss:$16 sps:$4 sm:$0xff]  }
 0x2e1   :  { %2239 = vst.msk [vmem:[#allocation2 + $0x80] sm:$0xff] %vm1875_vm5, %v2235_v55  ;;  %v1653_v57 = vpop.f32.mrf.mxu0 }
 0x2e2   :  { %2366 = vrot.lane.b32.xlu0 %v1653_v57, %s6895_s14  ;;  %v6548_v57 = vld [vmem:[%s9209_s3 + $0x604] ss:$16 sps:$4 sm:$0xff]  }
 0x2e3   :  { %v1655_v58 = vpop.f32.mrf.mxu0 }
 0x2e4   :  { %v2243_v59 = vpop.permute.xlu0 %2242 }
 0x2e5   :  { %2248 = vst.msk [vmem:[#allocation2 + $0x28] sm:$0xff] %vm1886_vm6, %v2243_v59  ;;  %v1656_v60 = vpop.f32.mrf.mxu0 }
 0x2e6   :  { %2368 = vrot.lane.b32.xlu1 %v1656_v60, %s6895_s14  ;;  %v6546_v60 = vld [vmem:[%s9209_s3 + $0x600] ss:$16 sps:$4 sm:$0xff]  }
 0x2e7   :  { %v1658_v61 = vpop.f32.mrf.mxu0 }
 0x2e8   :  { %v2245_v62 = vpop.permute.xlu1 %2244 }
 0x2e9   :  { %2249 = vst.msk [vmem:[#allocation2 + $0x80] sm:$0xff] %vm1886_vm6, %v2245_v62  ;;  %v1661_v63 = vpop.f32.mrf.mxu0  ;;  %v6551_v62 = vld [vmem:[%s9209_s3 + $0x7e4] ss:$16 sps:$4 sm:$0xff]  }
 0x2ea   :  { %2376 = vrot.lane.b32.xlu0 %v1661_v63, %s6896_s20  ;;  %v5139_v63 = vld [vmem:[%s9210_s5 + $0x1f8] sm:$0xff] }
 0x2eb   :  { %v1663_v38 = vpop.f32.mrf.mxu0  ;;  %6018 = vmatprep.subr.mxu0 %v5139_v63 }
 0x2ec   :  { %v2253_v1 = vpop.permute.xlu0 %2252  ;;  %v5123_v38 = vld [vmem:[%s9210_s5 + $0x178] sm:$0xff] }
 0x2ed   :  { %2258 = vst.msk [vmem:[#allocation2 + $0x28] sm:$0xff] %vm1897_vm7, %v2253_v1  ;;  %v1664_v3 = vpop.f32.mrf.mxu0  ;;  %6019 = vmatpush3.msra.mxu0 %v5123_v38 }
 0x2ee   :  { %2378 = vrot.lane.b32.xlu1 %v1664_v3, %s6896_s20 }
 0x2ef   :  { %v1666_v4 = vpop.f32.mrf.mxu0 }
 0x2f0   :  { %v2181_v5 = vpop.permute.xlu0 %2180  ;;  %v2255_v7 = vpop.permute.xlu1 %2254  ;;  %v6549_v4 = vld [vmem:[%s9209_s3 + $0x7e0] ss:$16 sps:$4 sm:$0xff]  }
 0x2f1   :  { %2186 = vst.msk [vmem:[#allocation2 + $0x20] sm:$0xff] %vm1897_vm7, %v2181_v5  ;;  %2259 = vst.msk [vmem:[#allocation2 + $0x80] sm:$0xff] %vm1897_vm7, %v2255_v7  ;;  %v1669_v41 = vpop.f32.mrf.mxu0  ;;  %v6554_v7 = vld [vmem:[%s9209_s3 + $0x7c4] ss:$16 sps:$4 sm:$0xff]  }
 0x2f2   :  { %2386 = vrot.lane.b32.xlu0 %v1669_v41, %s6897_s25 }
 0x2f3   :  { %v1671_v8 = vpop.f32.mrf.mxu0 }
 0x2f4   :  { %v2183_v10 = vpop.permute.xlu1 %2182  ;;  %v2555_v13 = vld [vmem:[#allocation2 + $0x28] sm:$0xff] }
 0x2f5   :  { %2187 = vst.msk [vmem:[#allocation2 + $0x78] sm:$0xff] %vm1897_vm7, %v2183_v10  ;;  %v1672_v11 = vpop.f32.mrf.mxu0  ;;  %v6552_v10 = vld [vmem:[%s9209_s3 + $0x7c0] ss:$16 sps:$4 sm:$0xff]  }
 0x2f6   :  { %2388 = vrot.lane.b32.xlu1 %v1672_v11, %s6897_s25 }
 0x2f7   :  { %v1674_v12 = vpop.f32.mrf.mxu0 }
 0x2f8   :  { %v2566_v49 = vld [vmem:[#allocation2 + $0x80] sm:$0xff] }
 0x2f9   :  { %v1677_v14 = vpop.f32.mrf.mxu0  ;;  %v8047_v16 = vpack.c.bf16 %v2566_v49, %v2555_v13  ;;  %v2554_v19 = vld [vmem:[#allocation2 + $0x20] sm:$0xff] }
 0x2fa   :  { %2396 = vrot.lane.b32.xlu0 %v1677_v14, %s6898_s26  ;;  %v6557_v12 = vld [vmem:[%s9209_s3 + $0x7a4] ss:$16 sps:$4 sm:$0xff]   ;;  %v6555_v14 = vld [vmem:[%s9209_s3 + $0x7a0] ss:$16 sps:$4 sm:$0xff]  }
 0x2fb   :  { %v1679_v17 = vpop.f32.mrf.mxu0  ;;  %4670 = vmatprep.mubr.bf16.mxu1 %v8047_v16 }
 0x2fc   :  { %v2265_v18 = vpop.permute.xlu0 %2264  ;;  %v2565_v52 = vld [vmem:[#allocation2 + $0x78] sm:$0xff] }
 0x2fd   :  { %2270 = vst.msk [vmem:[#allocation2 + $0x30] sm:$0xff] %vm1831_vm1, %v2265_v18  ;;  %v1680_v2 = vpop.f32.mrf.mxu0  ;;  %v8055_v22 = vpack.c.bf16 %v2565_v52, %v2554_v19  ;;  %v6560_v18 = vld [vmem:[%s9209_s3 + $0x784] ss:$16 sps:$4 sm:$0xff]  }
 0x2fe   :  { %2324 = vrot.lane.b32.xlu0 %v8007_v21, %s6898_s26  ;;  %2398 = vrot.lane.b32.xlu1 %v1680_v2, %s6898_s26 }
 0x2ff   :  { %v1682_v25 = vpop.f32.mrf.mxu0  ;;  %4671 = vmatmul.mubr.bf16.vlgmr.msra.gmra.mxu1 %v8055_v22 }
 0x300   :  { %v2267_v26 = vpop.permute.xlu1 %2266  ;;  %4682 = vmatpush1.bf16.msra.mxu1 %v6525_v20  ;;  %v6558_v20 = vld [vmem:[%s9209_s3 + $0x780] ss:$16 sps:$4 sm:$0xff]  }
 0x301   :  { %2271 = vst.msk [vmem:[#allocation2 + $0x88] sm:$0xff] %vm1831_vm1, %v2267_v26  ;;  %v1685_v27 = vpop.f32.mrf.mxu0  ;;  %4683 = vmatprep.subr.bf16.mxu1 %v6530_v24  ;;  %v6563_v24 = vld [vmem:[%s9209_s3 + $0x764] ss:$16 sps:$4 sm:$0xff]   ;;  %v6561_v26 = vld [vmem:[%s9209_s3 + $0x760] ss:$16 sps:$4 sm:$0xff]  }
 0x302   :  { %2404 = vst.msk [vmem:[#allocation2 + $0x40] sm:$0xff] %vm1820_vm0, %v1685_v27  ;;  %2326 = vrot.lane.b32.xlu1 %v8010_v23, %s6898_s26  ;;  %v6534_v23 = vld [vmem:[%s9209_s3 + $0x680] ss:$16 sps:$4 sm:$0xff]   ;;  %v6566_v27 = vld [vmem:[%s9209_s3 + $0x744] ss:$16 sps:$4 sm:$0xff]  }
 0x303   :  { %v1687_v21 = vpop.f32.mrf.mxu0 }
 0x304   :  { %v2275_v29 = vpop.permute.xlu0 %2274  ;;  %4684 = vmatpush1.bf16.msra.mxu1 %v6528_v6  ;;  %v6564_v21 = vld [vmem:[%s9209_s3 + $0x740] ss:$16 sps:$4 sm:$0xff]  }
 0x305   :  { %2280 = vst.msk [vmem:[#allocation2 + $0x30] sm:$0xff] %vm1842_vm2, %v2275_v29  ;;  %v1688_v31 = vpop.f32.mrf.mxu0  ;;  %4685 = vmatprep.subr.bf16.mxu1 %v6533_v28 }
 0x306   :  { %2405 = vst.msk [vmem:[#allocation2 + $0x98] sm:$0xff] %vm1820_vm0, %v1688_v31 }
 0x307   :  { %v1690_v33 = vpop.f32.mrf.mxu0 }
 0x308   :  { %v2277_v34 = vpop.permute.xlu1 %2276  ;;  %4686 = vmatpush1.bf16.msra.mxu1 %v6531_v30  ;;  %v6569_v30 = vld [vmem:[%s9209_s3 + $0x724] ss:$16 sps:$4 sm:$0xff]  }
 0x309   :  { %2281 = vst.msk [vmem:[#allocation2 + $0x88] sm:$0xff] %vm1842_vm2, %v2277_v34  ;;  %v1693_v35 = vpop.f32.mrf.mxu0  ;;  %4687 = vmatprep.subr.bf16.mxu1 %v6536_v32  ;;  %v6567_v32 = vld [vmem:[%s9209_s3 + $0x720] ss:$16 sps:$4 sm:$0xff]   ;;  %v6572_v34 = vld [vmem:[%s9209_s3 + $0x704] ss:$16 sps:$4 sm:$0xff]  }
 0x30a   :  { %2408 = vrot.lane.b32.xlu0 %v1693_v35, %s6892_s19  ;;  %v6570_v35 = vld [vmem:[%s9209_s3 + $0x700] ss:$16 sps:$4 sm:$0xff]  }
 0x30b   :  { %v1695_v37 = vpop.f32.mrf.mxu0 }
 0x30c   :  { %v2285_v39 = vpop.permute.xlu0 %2284  ;;  %4688 = vmatpush1.bf16.msra.mxu1 %v6534_v23 }
 0x30d   :  { %2290 = vst.msk [vmem:[#allocation2 + $0x30] sm:$0xff] %vm1853_vm3, %v2285_v39  ;;  %v1696_v42 = vpop.f32.mrf.mxu0  ;;  %4689 = vmatprep.subr.bf16.mxu1 %v6539_v36 }
 0x30e   :  { %2410 = vrot.lane.b32.xlu1 %v1696_v42, %s6892_s19  ;;  %v6575_v42 = vld [vmem:[%s9209_s3 + $0x8e4] ss:$16 sps:$4 sm:$0xff]  }
 0x30f   :  { %v1698_v44 = vpop.f32.mrf.mxu0 }
 0x310   :  { %v2287_v45 = vpop.permute.xlu1 %2286  ;;  %4690 = vmatpush1.bf16.msra.mxu1 %v6537_v40 }
 0x311   :  { %2291 = vst.msk [vmem:[#allocation2 + $0x88] sm:$0xff] %vm1853_vm3, %v2287_v45  ;;  %v1701_v48 = vpop.f32.mrf.mxu0  ;;  %4691 = vmatprep.subr.bf16.mxu1 %v6542_v43 }
 0x312   :  { %2418 = vrot.lane.b32.xlu0 %v1701_v48, %s6893_s23 }
 0x313   :  { %v1703_v51 = vpop.f32.mrf.mxu0 }
 0x314   :  { %v2295_v53 = vpop.permute.xlu0 %2294  ;;  %4692 = vmatpush1.bf16.msra.mxu1 %v6540_v46  ;;  %v5122_v51 = vld [vmem:[%s9210_s5 + $0x170] sm:$0xff] }
 0x315   :  { %2300 = vst.msk [vmem:[#allocation2 + $0x30] sm:$0xff] %vm1864_vm4, %v2295_v53  ;;  %v1704_v55 = vpop.f32.mrf.mxu0  ;;  %4693 = vmatprep.subr.bf16.mxu1 %v6545_v50  ;;  %v5138_v50 = vld [vmem:[%s9210_s5 + $0x1f0] sm:$0xff] }
 0x316   :  { %2420 = vrot.lane.b32.xlu1 %v1704_v55, %s6893_s23  ;;  %6020 = vmatprep.subr.mxu0 %v5138_v50 }
 0x317   :  { %v1706_v58 = vpop.f32.mrf.mxu0  ;;  %6021 = vmatpush3.msra.mxu0 %v5122_v51 }
 0x318   :  { %v2297_v59 = vpop.permute.xlu1 %2296  ;;  %4694 = vmatpush1.bf16.msra.mxu1 %v6543_v54 }
 0x319   :  { %2301 = vst.msk [vmem:[#allocation2 + $0x88] sm:$0xff] %vm1864_vm4, %v2297_v59  ;;  %v1709_v61 = vpop.f32.mrf.mxu0  ;;  %4695 = vmatprep.subr.bf16.mxu1 %v6548_v57 }
 0x31a   :  { %2428 = vrot.lane.b32.xlu0 %v1709_v61, %s6894_s28 }
 0x31b   :  { %v1711_v1 = vpop.f32.mrf.mxu0 }
 0x31c   :  { %v2305_v3 = vpop.permute.xlu0 %2304  ;;  %4696 = vmatpush1.bf16.msra.mxu1 %v6546_v60 }
 0x31d   :  { %2310 = vst.msk [vmem:[#allocation2 + $0x30] sm:$0xff] %vm1875_vm5, %v2305_v3  ;;  %v1712_v5 = vpop.f32.mrf.mxu0  ;;  %4697 = vmatprep.subr.bf16.mxu1 %v6551_v62 }
 0x31e   :  { %2430 = vrot.lane.b32.xlu1 %v1712_v5, %s6894_s28 }
 0x31f   :  { %v1714_v41 = vpop.f32.mrf.mxu0 }
 0x320   :  { %v2307_v8 = vpop.permute.xlu1 %2306  ;;  %4698 = vmatpush2.bf16.msra.mxu1 %v6549_v4 }
 0x321   :  { %2311 = vst.msk [vmem:[#allocation2 + $0x88] sm:$0xff] %vm1875_vm5, %v2307_v8  ;;  %v1717_v11 = vpop.f32.mrf.mxu0  ;;  %4699 = vmatprep.subr.bf16.mxu1 %v6554_v7 }
 0x322   :  { %2438 = vrot.lane.b32.xlu0 %v1717_v11, %s6895_s14 }
 0x323   :  { %v1719_v13 = vpop.f32.mrf.mxu0 }
 0x324   :  { %v2315_v49 = vpop.permute.xlu0 %2314  ;;  %4700 = vmatpush2.bf16.msra.mxu1 %v6552_v10 }
 0x325   :  { %2320 = vst.msk [vmem:[#allocation2 + $0x30] sm:$0xff] %vm1886_vm6, %v2315_v49  ;;  %v1720_v17 = vpop.f32.mrf.mxu0  ;;  %4701 = vmatprep.subr.bf16.mxu1 %v6557_v12 }
 0x326   :  { %2440 = vrot.lane.b32.xlu1 %v1720_v17, %s6895_s14 }
 0x327   :  { %v1722_v19 = vpop.f32.mrf.mxu0 }
 0x328   :  { %v2317_v52 = vpop.permute.xlu1 %2316  ;;  %4702 = vmatpush2.bf16.msra.mxu1 %v6555_v14 }
 0x329   :  { %2321 = vst.msk [vmem:[#allocation2 + $0x88] sm:$0xff] %vm1886_vm6, %v2317_v52  ;;  %v1725_v2 = vpop.f32.mrf.mxu0  ;;  %4703 = vmatprep.subr.bf16.mxu1 %v6560_v18 }
 0x32a   :  { %2448 = vrot.lane.b32.xlu0 %v1725_v2, %s6896_s20  ;;  %v5121_v2 = vld [vmem:[%s9210_s5 + $0x168] sm:$0xff] }
 0x32b   :  { %v1727_v25 = vpop.f32.mrf.mxu0 }
 0x32c   :  { %4704 = vmatpush2.bf16.msra.mxu1 %v6558_v20  ;;  %v5137_v20 = vld [vmem:[%s9210_s5 + $0x1e8] sm:$0xff] }
 0x32d   :  { %v1728_v6 = vpop.f32.mrf.mxu0  ;;  %4705 = vmatprep.subr.bf16.mxu1 %v6563_v24  ;;  %6022 = vmatprep.subr.mxu0 %v5137_v20  ;;  %v6600_v20 = vld [vmem:[%s9209_s3 + $0x9c0] ss:$16 sps:$4 sm:$0xff]  }
 0x32e   :  { %2450 = vrot.lane.b32.xlu1 %v1728_v6, %s6896_s20  ;;  %6023 = vmatpush3.msra.mxu0 %v5121_v2  ;;  %v6605_v2 = vld [vmem:[%s9209_s3 + $0x9a4] ss:$16 sps:$4 sm:$0xff]  }
 0x32f   :  { %v1730_v28 = vpop.f32.mrf.mxu0 }
 0x330   :  { %4706 = vmatpush2.bf16.msra.mxu1 %v6561_v26 }
 0x331   :  { %v1733_v29 = vpop.f32.mrf.mxu0  ;;  %4707 = vmatprep.subr.bf16.mxu1 %v6566_v27 }
 0x332   :  { %2458 = vrot.lane.b32.xlu0 %v1733_v29, %s6897_s25 }
 0x333   :  { %v1735_v31 = vpop.f32.mrf.mxu0 }
 0x334   :  { %4708 = vmatpush2.bf16.msra.mxu1 %v6564_v21 }
 0x335   :  { %v1736_v33 = vpop.f32.mrf.mxu0  ;;  %4709 = vmatprep.subr.bf16.mxu1 %v6569_v30 }
 0x336   :  { %2460 = vrot.lane.b32.xlu1 %v1736_v33, %s6897_s25 }
 0x337   :  { %v1738_v23 = vpop.f32.mrf.mxu0 }
 0x338   :  { %4710 = vmatpush2.bf16.msra.mxu1 %v6567_v32 }
 0x339   :  { %v8184_v36 = vpop.f32.mrf.mxu0  ;;  %4711 = vmatprep.subr.bf16.mxu1 %v6572_v34 }
 0x33b   :  { %v1743_v37 = vpop.f32.mrf.mxu0 }
 0x33c   :  { %v2337_v39 = vpop.permute.xlu0 %2336  ;;  %4712 = vmatpush2.bf16.msra.mxu1 %v6570_v35 }
 0x33d   :  { %2342 = vst.msk [vmem:[#allocation2 + $0x38] sm:$0xff] %vm1831_vm1, %v2337_v39  ;;  %v8187_v40 = vpop.f32.mrf.mxu0  ;;  %4724 = vmatprep.subr.bf16.mxu1 %v6575_v42 }
 0x33f   :  { %v1746_v43 = vpop.f32.mrf.mxu0 }
 0x340   :  { %v2339_v44 = vpop.permute.xlu1 %2338 }
 0x341   :  { %2343 = vst.msk [vmem:[#allocation2 + $0x90] sm:$0xff] %vm1831_vm1, %v2339_v44  ;;  %v1749_v45 = vpop.f32.mrf.mxu0  ;;  %v6573_v44 = vld [vmem:[%s9209_s3 + $0x8e0] ss:$16 sps:$4 sm:$0xff]  }
 0x342   :  { %2476 = vst.msk [vmem:[#allocation2 + $0x48] sm:$0xff] %vm1820_vm0, %v1749_v45 }
 0x343   :  { %v1751_v46 = vpop.f32.mrf.mxu0 }
 0x344   :  { %v2347_v48 = vpop.permute.xlu0 %2346 }
 0x345   :  { %2352 = vst.msk [vmem:[#allocation2 + $0x38] sm:$0xff] %vm1842_vm2, %v2347_v48  ;;  %v1752_v53 = vpop.f32.mrf.mxu0  ;;  %v6578_v48 = vld [vmem:[%s9209_s3 + $0x8c4] ss:$16 sps:$4 sm:$0xff]  }
 0x346   :  { %2477 = vst.msk [vmem:[#allocation2 + $0xa0] sm:$0xff] %vm1820_vm0, %v1752_v53  ;;  %v6576_v53 = vld [vmem:[%s9209_s3 + $0x8c0] ss:$16 sps:$4 sm:$0xff]  }
 0x347   :  { %v1754_v54 = vpop.f32.mrf.mxu0 }
 0x348   :  { %v2349_v55 = vpop.permute.xlu1 %2348  ;;  %v6581_v54 = vld [vmem:[%s9209_s3 + $0x8a4] ss:$16 sps:$4 sm:$0xff]  }
 0x349   :  { %2353 = vst.msk [vmem:[#allocation2 + $0x90] sm:$0xff] %vm1842_vm2, %v2349_v55  ;;  %v1757_v57 = vpop.f32.mrf.mxu0 }
 0x34a   :  { %2480 = vrot.lane.b32.xlu0 %v1757_v57, %s6892_s19 }
 0x34b   :  { %v1759_v58 = vpop.f32.mrf.mxu0 }
 0x34c   :  { %v2357_v59 = vpop.permute.xlu0 %2356  ;;  %v6579_v58 = vld [vmem:[%s9209_s3 + $0x8a0] ss:$16 sps:$4 sm:$0xff]  }
 0x34d   :  { %2362 = vst.msk [vmem:[#allocation2 + $0x38] sm:$0xff] %vm1853_vm3, %v2357_v59  ;;  %v1760_v60 = vpop.f32.mrf.mxu0  ;;  %v6584_v59 = vld [vmem:[%s9209_s3 + $0x884] ss:$16 sps:$4 sm:$0xff]  }
 0x34e   :  { %2482 = vrot.lane.b32.xlu1 %v1760_v60, %s6892_s19 }
 0x34f   :  { %v1762_v61 = vpop.f32.mrf.mxu0 }
 0x350   :  { %v2359_v62 = vpop.permute.xlu1 %2358 }
 0x351   :  { %2363 = vst.msk [vmem:[#allocation2 + $0x90] sm:$0xff] %vm1853_vm3, %v2359_v62  ;;  %v1765_v63 = vpop.f32.mrf.mxu0  ;;  %v6582_v62 = vld [vmem:[%s9209_s3 + $0x880] ss:$16 sps:$4 sm:$0xff]  }
 0x352   :  { %2490 = vrot.lane.b32.xlu0 %v1765_v63, %s6893_s23  ;;  %v6587_v63 = vld [vmem:[%s9209_s3 + $0x864] ss:$16 sps:$4 sm:$0xff]  }
 0x353   :  { %v1767_v38 = vpop.f32.mrf.mxu0 }
 0x354   :  { %v2367_v1 = vpop.permute.xlu0 %2366 }
 0x355   :  { %2372 = vst.msk [vmem:[#allocation2 + $0x38] sm:$0xff] %vm1864_vm4, %v2367_v1  ;;  %v1768_v3 = vpop.f32.mrf.mxu0  ;;  %v6585_v1 = vld [vmem:[%s9209_s3 + $0x860] ss:$16 sps:$4 sm:$0xff]  }
 0x356   :  { %2492 = vrot.lane.b32.xlu1 %v1768_v3, %s6893_s23  ;;  %v6590_v3 = vld [vmem:[%s9209_s3 + $0x844] ss:$16 sps:$4 sm:$0xff]  }
 0x357   :  { %v1770_v4 = vpop.f32.mrf.mxu0 }
 0x358   :  { %v2369_v5 = vpop.permute.xlu1 %2368 }
 0x359   :  { %2373 = vst.msk [vmem:[#allocation2 + $0x90] sm:$0xff] %vm1864_vm4, %v2369_v5  ;;  %v1773_v7 = vpop.f32.mrf.mxu0  ;;  %v6588_v5 = vld [vmem:[%s9209_s3 + $0x840] ss:$16 sps:$4 sm:$0xff]  }
 0x35a   :  { %2500 = vrot.lane.b32.xlu0 %v1773_v7, %s6894_s28  ;;  %v6593_v7 = vld [vmem:[%s9209_s3 + $0x824] ss:$16 sps:$4 sm:$0xff]  }
 0x35b   :  { %v1775_v41 = vpop.f32.mrf.mxu0 }
 0x35c   :  { %v2377_v8 = vpop.permute.xlu0 %2376 }
 0x35d   :  { %2382 = vst.msk [vmem:[#allocation2 + $0x38] sm:$0xff] %vm1875_vm5, %v2377_v8  ;;  %v1776_v10 = vpop.f32.mrf.mxu0  ;;  %v6591_v8 = vld [vmem:[%s9209_s3 + $0x820] ss:$16 sps:$4 sm:$0xff]  }
 0x35e   :  { %2502 = vrot.lane.b32.xlu1 %v1776_v10, %s6894_s28  ;;  %v5136_v10 = vld [vmem:[%s9210_s5 + $0x1e0] sm:$0xff] }
 0x35f   :  { %v1778_v11 = vpop.f32.mrf.mxu0  ;;  %6024 = vmatprep.subr.mxu0 %v5136_v10 }
 0x360   :  { %v2379_v12 = vpop.permute.xlu1 %2378  ;;  %v5120_v11 = vld [vmem:[%s9210_s5 + $0x160] sm:$0xff] }
 0x361   :  { %2383 = vst.msk [vmem:[#allocation2 + $0x90] sm:$0xff] %vm1875_vm5, %v2379_v12  ;;  %v1781_v13 = vpop.f32.mrf.mxu0  ;;  %v6596_v12 = vld [vmem:[%s9209_s3 + $0x804] ss:$16 sps:$4 sm:$0xff]   ;;  %6025 = vmatpush3.msra.mxu0 %v5120_v11  ;;  %v6624_v11 = vld [vmem:[%s9209_s3 + $0xe8] ss:$16 sps:$4 sm:$0xff]  }
 0x362   :  { %2510 = vrot.lane.b32.xlu0 %v1781_v13, %s6895_s14 }
 0x363   :  { %v1783_v49 = vpop.f32.mrf.mxu0 }
 0x364   :  { %v2387_v14 = vpop.permute.xlu0 %2386  ;;  %v6594_v49 = vld [vmem:[%s9209_s3 + $0x800] ss:$16 sps:$4 sm:$0xff]  }
 0x365   :  { %2392 = vst.msk [vmem:[#allocation2 + $0x38] sm:$0xff] %vm1886_vm6, %v2387_v14  ;;  %v1784_v17 = vpop.f32.mrf.mxu0  ;;  %v6599_v14 = vld [vmem:[%s9209_s3 + $0x9e4] ss:$16 sps:$4 sm:$0xff]  }
 0x366   :  { %2512 = vrot.lane.b32.xlu1 %v1784_v17, %s6895_s14 }
 0x367   :  { %v1786_v18 = vpop.f32.mrf.mxu0 }
 0x368   :  { %v2389_v19 = vpop.permute.xlu1 %2388  ;;  %v6597_v18 = vld [vmem:[%s9209_s3 + $0x9e0] ss:$16 sps:$4 sm:$0xff]  }
 0x369   :  { %2393 = vst.msk [vmem:[#allocation2 + $0x90] sm:$0xff] %vm1886_vm6, %v2389_v19  ;;  %v1789_v52 = vpop.f32.mrf.mxu0  ;;  %v6602_v19 = vld [vmem:[%s9209_s3 + $0x9c4] ss:$16 sps:$4 sm:$0xff]  }
 0x36a   :  { %2520 = vrot.lane.b32.xlu0 %v1789_v52, %s6896_s20 }
 0x36b   :  { %v1791_v24 = vpop.f32.mrf.mxu0 }
 0x36c   :  { %v2397_v25 = vpop.permute.xlu0 %2396 }
 0x36d   :  { %2402 = vst.msk [vmem:[#allocation2 + $0x38] sm:$0xff] %vm1897_vm7, %v2397_v25  ;;  %v1792_v26 = vpop.f32.mrf.mxu0  ;;  %v6603_v25 = vld [vmem:[%s9209_s3 + $0x9a0] ss:$16 sps:$4 sm:$0xff]  }
 0x36e   :  { %2522 = vrot.lane.b32.xlu1 %v1792_v26, %s6896_s20  ;;  %v6608_v26 = vld [vmem:[%s9209_s3 + $0x984] ss:$16 sps:$4 sm:$0xff]  }
 0x36f   :  { %v1794_v6 = vpop.f32.mrf.mxu0 }
 0x370   :  { %v2325_v27 = vpop.permute.xlu0 %2324  ;;  %v2399_v28 = vpop.permute.xlu1 %2398 }
 0x371   :  { %2330 = vst.msk [vmem:[#allocation2 + $0x30] sm:$0xff] %vm1897_vm7, %v2325_v27  ;;  %2403 = vst.msk [vmem:[#allocation2 + $0x90] sm:$0xff] %vm1897_vm7, %v2399_v28  ;;  %v1797_v21 = vpop.f32.mrf.mxu0  ;;  %v6606_v27 = vld [vmem:[%s9209_s3 + $0x980] ss:$16 sps:$4 sm:$0xff]   ;;  %v6611_v28 = vld [vmem:[%s9209_s3 + $0x964] ss:$16 sps:$4 sm:$0xff]  }
 0x372   :  { %2530 = vrot.lane.b32.xlu0 %v1797_v21, %s6897_s25  ;;  %v6609_v21 = vld [vmem:[%s9209_s3 + $0x960] ss:$16 sps:$4 sm:$0xff]  }
 0x373   :  { %v1799_v29 = vpop.f32.mrf.mxu0 }
 0x374   :  { %v2327_v30 = vpop.permute.xlu1 %2326  ;;  %v2557_v33 = vld [vmem:[#allocation2 + $0x38] sm:$0xff]  ;;  %v6614_v29 = vld [vmem:[%s9209_s3 + $0x944] ss:$16 sps:$4 sm:$0xff]  }
 0x375   :  { %2331 = vst.msk [vmem:[#allocation2 + $0x88] sm:$0xff] %vm1897_vm7, %v2327_v30  ;;  %v1800_v31 = vpop.f32.mrf.mxu0  ;;  %v6612_v30 = vld [vmem:[%s9209_s3 + $0x940] ss:$16 sps:$4 sm:$0xff]  }
 0x376   :  { %2532 = vrot.lane.b32.xlu1 %v1800_v31, %s6897_s25  ;;  %v6617_v31 = vld [vmem:[%s9209_s3 + $0x924] ss:$16 sps:$4 sm:$0xff]  }
 0x377   :  { %v1802_v32 = vpop.f32.mrf.mxu0 }
 0x378   :  { %v2568_v34 = vld [vmem:[#allocation2 + $0x90] sm:$0xff] }
 0x379   :  { %v1805_v23 = vpop.f32.mrf.mxu0  ;;  %v8233_v35 = vpack.c.bf16 %v2568_v34, %v2557_v33  ;;  %v2556_v42 = vld [vmem:[#allocation2 + $0x30] sm:$0xff] }
 0x37a   :  { %2540 = vrot.lane.b32.xlu0 %v1805_v23, %s6898_s26  ;;  %v6615_v32 = vld [vmem:[%s9209_s3 + $0x920] ss:$16 sps:$4 sm:$0xff]   ;;  %v6620_v33 = vld [vmem:[%s9209_s3 + $0x904] ss:$16 sps:$4 sm:$0xff]  }
 0x37b   :  { %v1807_v37 = vpop.f32.mrf.mxu0  ;;  %4713 = vmatprep.mubr.bf16.mxu1 %v8233_v35  ;;  %v6618_v34 = vld [vmem:[%s9209_s3 + $0x900] ss:$16 sps:$4 sm:$0xff]   ;;  %v6623_v23 = vld [vmem:[%s9209_s3 + $0xa04] ss:$16 sps:$4 sm:$0xff]  }
 0x37c   :  { %v2409_v39 = vpop.permute.xlu0 %2408  ;;  %v2567_v43 = vld [vmem:[#allocation2 + $0x88] sm:$0xff] }
 0x37d   :  { %2414 = vst.msk [vmem:[#allocation2 + $0x40] sm:$0xff] %vm1831_vm1, %v2409_v39  ;;  %v1808_v45 = vpop.f32.mrf.mxu0  ;;  %v8241_v46 = vpack.c.bf16 %v2567_v43, %v2556_v42  ;;  %v5135_v39 = vld [vmem:[%s9210_s5 + $0x1d8] sm:$0xff] }
 0x37e   :  { %2468 = vrot.lane.b32.xlu0 %v8184_v36, %s6898_s26  ;;  %2542 = vrot.lane.b32.xlu1 %v1808_v45, %s6898_s26  ;;  %v5119_v42 = vld [vmem:[%s9210_s5 + $0x158] sm:$0xff] }
 0x37f   :  { %v1810_v50 = vpop.f32.mrf.mxu0  ;;  %4714 = vmatmul.mubr.bf16.vlgmr.msra.gmra.mxu1 %v8241_v46  ;;  %6026 = vmatprep.subr.mxu0 %v5135_v39  ;;  %v6660_v39 = vld [vmem:[%s9209_s3 + $0x168] ss:$16 sps:$4 sm:$0xff]  }
 0x380   :  { %v2411_v51 = vpop.permute.xlu1 %2410  ;;  %4725 = vmatpush1.bf16.msra.mxu1 %v6573_v44  ;;  %6027 = vmatpush3.msra.mxu0 %v5119_v42  ;;  %v6665_v42 = vld [vmem:[%s9209_s3 + $0x14c] ss:$16 sps:$4 sm:$0xff]  }
 0x381   :  { %2415 = vst.msk [vmem:[#allocation2 + $0x98] sm:$0xff] %vm1831_vm1, %v2411_v51  ;;  %4726 = vmatprep.subr.bf16.mxu1 %v6578_v48  ;;  %v1813_v55 = vpop.f32.mrf.mxu0 }
 0x382   :  { %2470 = vrot.lane.b32.xlu1 %v8187_v40, %s6898_s26  ;;  %2548 = vst.msk [vmem:[#allocation2 + $0x50] sm:$0xff] %vm1820_vm0, %v1813_v55 }
 0x383   :  { %v1815_v36 = vpop.f32.mrf.mxu0 }
 0x384   :  { %v2419_v57 = vpop.permute.xlu0 %2418  ;;  %4727 = vmatpush1.bf16.msra.mxu1 %v6576_v53 }
 0x385   :  { %2424 = vst.msk [vmem:[#allocation2 + $0x40] sm:$0xff] %vm1842_vm2, %v2419_v57  ;;  %4728 = vmatprep.subr.bf16.mxu1 %v6581_v54  ;;  %v1816_v60 = vpop.f32.mrf.mxu0  ;;  %v5134_v57 = vld [vmem:[%s9210_s5 + $0x1d0] sm:$0xff] }
 0x386   :  { %2549 = vst.msk [vmem:[#allocation2 + $0xa8] sm:$0xff] %vm1820_vm0, %v1816_v60  ;;  %6028 = vmatprep.subr.mxu0 %v5134_v57  ;;  %v6675_v57 = vld [vmem:[%s9209_s3 + $0x2c8] ss:$16 sps:$4 sm:$0xff]  }
 0x387   :  { %v1818_v40 = vpop.f32.mrf.mxu0 }
 0x388   :  { %v2421_v61 = vpop.permute.xlu1 %2420  ;;  %4729 = vmatpush1.bf16.msra.mxu1 %v6579_v58  ;;  %v5118_v58 = vld [vmem:[%s9210_s5 + $0x150] sm:$0xff] }
 0x389   :  { %2425 = vst.msk [vmem:[#allocation2 + $0x98] sm:$0xff] %vm1842_vm2, %v2421_v61  ;;  %4730 = vmatprep.subr.bf16.mxu1 %v6584_v59  ;;  %6029 = vmatpush3.msra.mxu0 %v5118_v58  ;;  %v6680_v58 = vld [vmem:[%s9209_s3 + $0x2ac] ss:$16 sps:$4 sm:$0xff]  }
 0x38c   :  { %v2429_v38 = vpop.permute.xlu0 %2428  ;;  %4731 = vmatpush1.bf16.msra.mxu1 %v6582_v62 }
 0x38d   :  { %2434 = vst.msk [vmem:[#allocation2 + $0x40] sm:$0xff] %vm1853_vm3, %v2429_v38  ;;  %4732 = vmatprep.subr.bf16.mxu1 %v6587_v63  ;;  %v2571_v10 = vld [vmem:[#allocation2 + $0xa8] sm:$0xff] }
 0x390   :  { %v2431_v4 = vpop.permute.xlu1 %2430  ;;  %4733 = vmatpush1.bf16.msra.mxu1 %v6585_v1 }
 0x391   :  { %2435 = vst.msk [vmem:[#allocation2 + $0x98] sm:$0xff] %vm1853_vm3, %v2431_v4  ;;  %4734 = vmatprep.subr.bf16.mxu1 %v6590_v3 }
 0x394   :  { %v2439_v41 = vpop.permute.xlu0 %2438  ;;  %4735 = vmatpush1.bf16.msra.mxu1 %v6588_v5  ;;  %v6621_v5 = vld [vmem:[%s9209_s3 + $0xa00] ss:$16 sps:$4 sm:$0xff]  }
 0x395   :  { %2444 = vst.msk [vmem:[#allocation2 + $0x40] sm:$0xff] %vm1864_vm4, %v2439_v41  ;;  %4736 = vmatprep.subr.bf16.mxu1 %v6593_v7  ;;  %v6626_v41 = vld [vmem:[%s9209_s3 + $0xec] ss:$16 sps:$4 sm:$0xff]  }
 0x398   :  { %v2441_v13 = vpop.permute.xlu1 %2440  ;;  %4737 = vmatpush1.bf16.msra.mxu1 %v6591_v8  ;;  %v2560_v8 = vld [vmem:[#allocation2 + $0x50] sm:$0xff] }
 0x399   :  { %2445 = vst.msk [vmem:[#allocation2 + $0x98] sm:$0xff] %vm1864_vm4, %v2441_v13  ;;  %4738 = vmatprep.subr.bf16.mxu1 %v6596_v12  ;;  %v8405_v12 = vpack.c.bf16 %v2571_v10, %v2560_v8  ;;  %v6629_v13 = vld [vmem:[%s9209_s3 + $0xcc] ss:$16 sps:$4 sm:$0xff]   ;;  %v6696_v10 = vld [vmem:[%s9209_s3 + $0x3e8] ss:$16 sps:$4 sm:$0xff]  }
 0x39a   :  { %v6698_v8 = vld [vmem:[%s9209_s3 + $0x3ec] ss:$16 sps:$4 sm:$0xff]  }
 0x39c   :  { %v2449_v17 = vpop.permute.xlu0 %2448  ;;  %4739 = vmatpush1.bf16.msra.mxu1 %v6594_v49  ;;  %v6627_v49 = vld [vmem:[%s9209_s3 + $0xc8] ss:$16 sps:$4 sm:$0xff]  }
 0x39d   :  { %2454 = vst.msk [vmem:[#allocation2 + $0x40] sm:$0xff] %vm1875_vm5, %v2449_v17  ;;  %4740 = vmatprep.subr.bf16.mxu1 %v6599_v14  ;;  %v6632_v14 = vld [vmem:[%s9209_s3 + $0xac] ss:$16 sps:$4 sm:$0xff]   ;;  %v6630_v17 = vld [vmem:[%s9209_s3 + $0xa8] ss:$16 sps:$4 sm:$0xff]  }
 0x3a0   :  { %v2451_v52 = vpop.permute.xlu1 %2450  ;;  %4741 = vmatpush2.bf16.msra.mxu1 %v6597_v18  ;;  %v5133_v18 = vld [vmem:[%s9210_s5 + $0x1c8] sm:$0xff] }
 0x3a1   :  { %2455 = vst.msk [vmem:[#allocation2 + $0x98] sm:$0xff] %vm1875_vm5, %v2451_v52  ;;  %4742 = vmatprep.subr.bf16.mxu1 %v6602_v19  ;;  %6030 = vmatprep.subr.mxu0 %v5133_v18  ;;  %v5117_v19 = vld [vmem:[%s9210_s5 + $0x148] sm:$0xff] }
 0x3a2   :  { %6031 = vmatpush3.msra.mxu0 %v5117_v19  ;;  %v6633_v52 = vld [vmem:[%s9209_s3 + $0x88] ss:$16 sps:$4 sm:$0xff]  }
 0x3a3   :  { %v6705_v18 = vld [vmem:[%s9209_s3 + $0x388] ss:$16 sps:$4 sm:$0xff]  }
 0x3a4   :  { %v2459_v24 = vpop.permute.xlu0 %2458  ;;  %4743 = vmatpush2.bf16.msra.mxu1 %v6600_v20  ;;  %v6638_v20 = vld [vmem:[%s9209_s3 + $0x6c] ss:$16 sps:$4 sm:$0xff]   ;;  %v6708_v19 = vld [vmem:[%s9209_s3 + $0x368] ss:$16 sps:$4 sm:$0xff]  }
 0x3a5   :  { %2464 = vst.msk [vmem:[#allocation2 + $0x40] sm:$0xff] %vm1886_vm6, %v2459_v24  ;;  %4744 = vmatprep.subr.bf16.mxu1 %v6605_v2  ;;  %v6636_v2 = vld [vmem:[%s9209_s3 + $0x68] ss:$16 sps:$4 sm:$0xff]   ;;  %v6641_v24 = vld [vmem:[%s9209_s3 + $0x4c] ss:$16 sps:$4 sm:$0xff]  }
 0x3a8   :  { %v2461_v6 = vpop.permute.xlu1 %2460  ;;  %4745 = vmatpush2.bf16.msra.mxu1 %v6603_v25  ;;  %v6639_v25 = vld [vmem:[%s9209_s3 + $0x48] ss:$16 sps:$4 sm:$0xff]  }
 0x3a9   :  { %2465 = vst.msk [vmem:[#allocation2 + $0x98] sm:$0xff] %vm1886_vm6, %v2461_v6  ;;  %4746 = vmatprep.subr.bf16.mxu1 %v6608_v26  ;;  %v6644_v26 = vld [vmem:[%s9209_s3 + $0x2c] ss:$16 sps:$4 sm:$0xff]   ;;  %v6642_v6 = vld [vmem:[%s9209_s3 + $0x28] ss:$16 sps:$4 sm:$0xff]  }
 0x3ac   :  { %4747 = vmatpush2.bf16.msra.mxu1 %v6606_v27  ;;  %v6647_v27 = vld [vmem:[%s9209_s3 + $0xc] ss:$16 sps:$4 sm:$0xff]  }
 0x3ad   :  { %4748 = vmatprep.subr.bf16.mxu1 %v6611_v28  ;;  %v6645_v28 = vld [vmem:[%s9209_s3 + $0x8] ss:$16 sps:$4 sm:$0xff]  }
 0x3b0   :  { %4749 = vmatpush2.bf16.msra.mxu1 %v6609_v21  ;;  %v6650_v21 = vld [vmem:[%s9209_s3 + $0x1ec] ss:$16 sps:$4 sm:$0xff]  }
 0x3b1   :  { %4750 = vmatprep.subr.bf16.mxu1 %v6614_v29  ;;  %v6648_v29 = vld [vmem:[%s9209_s3 + $0x1e8] ss:$16 sps:$4 sm:$0xff]  }
 0x3b4   :  { %4751 = vmatpush2.bf16.msra.mxu1 %v6612_v30  ;;  %v6653_v30 = vld [vmem:[%s9209_s3 + $0x1cc] ss:$16 sps:$4 sm:$0xff]  }
 0x3b5   :  { %4752 = vmatprep.subr.bf16.mxu1 %v6617_v31  ;;  %v6651_v31 = vld [vmem:[%s9209_s3 + $0x1c8] ss:$16 sps:$4 sm:$0xff]  }
 0x3b8   :  { %4753 = vmatpush2.bf16.msra.mxu1 %v6615_v32  ;;  %v6656_v32 = vld [vmem:[%s9209_s3 + $0x1ac] ss:$16 sps:$4 sm:$0xff]  }
 0x3b9   :  { %4754 = vmatprep.subr.bf16.mxu1 %v6620_v33  ;;  %v6654_v33 = vld [vmem:[%s9209_s3 + $0x1a8] ss:$16 sps:$4 sm:$0xff]  }
 0x3bc   :  { %v2481_v37 = vpop.permute.xlu0 %2480  ;;  %4755 = vmatpush2.bf16.msra.mxu1 %v6618_v34  ;;  %v6659_v34 = vld [vmem:[%s9209_s3 + $0x18c] ss:$16 sps:$4 sm:$0xff]  }
 0x3bd   :  { %2486 = vst.msk [vmem:[#allocation2 + $0x48] sm:$0xff] %vm1831_vm1, %v2481_v37  ;;  %4781 = vmatprep.subr.bf16.mxu1 %v6623_v23  ;;  %v6657_v23 = vld [vmem:[%s9209_s3 + $0x188] ss:$16 sps:$4 sm:$0xff]   ;;  %v6662_v37 = vld [vmem:[%s9209_s3 + $0x16c] ss:$16 sps:$4 sm:$0xff]  }
 0x3c0   :  { %v2483_v43 = vpop.permute.xlu1 %2482 }
 0x3c1   :  { %2487 = vst.msk [vmem:[#allocation2 + $0xa0] sm:$0xff] %vm1831_vm1, %v2483_v43  ;;  %v5132_v43 = vld [vmem:[%s9210_s5 + $0x1c0] sm:$0xff] }
 0x3c2   :  { %6032 = vmatprep.subr.mxu0 %v5132_v43  ;;  %v6743_v43 = vld [vmem:[%s9209_s3 + $0x40c] ss:$16 sps:$4 sm:$0xff]  }
 0x3c4   :  { %v2491_v44 = vpop.permute.xlu0 %2490 }
 0x3c5   :  { %2496 = vst.msk [vmem:[#allocation2 + $0x48] sm:$0xff] %vm1842_vm2, %v2491_v44  ;;  %v6663_v44 = vld [vmem:[%s9209_s3 + $0x148] ss:$16 sps:$4 sm:$0xff]  }
 0x3c8   :  { %v2493_v45 = vpop.permute.xlu1 %2492 }
 0x3c9   :  { %2497 = vst.msk [vmem:[#allocation2 + $0xa0] sm:$0xff] %vm1842_vm2, %v2493_v45  ;;  %v5116_v45 = vld [vmem:[%s9210_s5 + $0x140] sm:$0xff] }
 0x3ca   :  { %6033 = vmatpush3.msra.mxu0 %v5116_v45  ;;  %v6746_v45 = vld [vmem:[%s9209_s3 + $0x5ec] ss:$16 sps:$4 sm:$0xff]  }
 0x3cc   :  { %v2501_v48 = vpop.permute.xlu0 %2500 }
 0x3cd   :  { %2506 = vst.msk [vmem:[#allocation2 + $0x48] sm:$0xff] %vm1853_vm3, %v2501_v48  ;;  %v6668_v48 = vld [vmem:[%s9209_s3 + $0x12c] ss:$16 sps:$4 sm:$0xff]  }
 0x3d0   :  { %v2503_v50 = vpop.permute.xlu1 %2502 }
 0x3d1   :  { %2507 = vst.msk [vmem:[#allocation2 + $0xa0] sm:$0xff] %vm1853_vm3, %v2503_v50  ;;  %v6666_v50 = vld [vmem:[%s9209_s3 + $0x128] ss:$16 sps:$4 sm:$0xff]  }
 0x3d4   :  { %v2511_v51 = vpop.permute.xlu0 %2510 }
 0x3d5   :  { %2516 = vst.msk [vmem:[#allocation2 + $0x48] sm:$0xff] %vm1864_vm4, %v2511_v51  ;;  %v6671_v51 = vld [vmem:[%s9209_s3 + $0x10c] ss:$16 sps:$4 sm:$0xff]  }
 0x3d8   :  { %v2513_v53 = vpop.permute.xlu1 %2512 }
 0x3d9   :  { %2517 = vst.msk [vmem:[#allocation2 + $0xa0] sm:$0xff] %vm1864_vm4, %v2513_v53  ;;  %v6669_v53 = vld [vmem:[%s9209_s3 + $0x108] ss:$16 sps:$4 sm:$0xff]  }
 0x3dc   :  { %v2521_v54 = vpop.permute.xlu0 %2520 }
 0x3dd   :  { %2526 = vst.msk [vmem:[#allocation2 + $0x48] sm:$0xff] %vm1875_vm5, %v2521_v54  ;;  %v6674_v54 = vld [vmem:[%s9209_s3 + $0x2ec] ss:$16 sps:$4 sm:$0xff]  }
 0x3e0   :  { %v2523_v55 = vpop.permute.xlu1 %2522 }
 0x3e1   :  { %2527 = vst.msk [vmem:[#allocation2 + $0xa0] sm:$0xff] %vm1875_vm5, %v2523_v55  ;;  %v6672_v55 = vld [vmem:[%s9209_s3 + $0x2e8] ss:$16 sps:$4 sm:$0xff]  }
 0x3e4   :  { %v2531_v36 = vpop.permute.xlu0 %2530 }
 0x3e5   :  { %2536 = vst.msk [vmem:[#allocation2 + $0x48] sm:$0xff] %vm1886_vm6, %v2531_v36  ;;  %v6677_v36 = vld [vmem:[%s9209_s3 + $0x2cc] ss:$16 sps:$4 sm:$0xff]  }
 0x3e8   :  { %v2533_v59 = vpop.permute.xlu1 %2532 }
 0x3e9   :  { %2537 = vst.msk [vmem:[#allocation2 + $0xa0] sm:$0xff] %vm1886_vm6, %v2533_v59  ;;  %v6678_v59 = vld [vmem:[%s9209_s3 + $0x2a8] ss:$16 sps:$4 sm:$0xff]  }
 0x3ec   :  { %v2541_v60 = vpop.permute.xlu0 %2540 }
 0x3ed   :  { %2546 = vst.msk [vmem:[#allocation2 + $0x48] sm:$0xff] %vm1897_vm7, %v2541_v60  ;;  %v6686_v60 = vld [vmem:[%s9209_s3 + $0x26c] ss:$16 sps:$4 sm:$0xff]  }
 0x3f0   :  { %v2469_v40 = vpop.permute.xlu0 %2468  ;;  %v2543_v61 = vpop.permute.xlu1 %2542 }
 0x3f1   :  { %2474 = vst.msk [vmem:[#allocation2 + $0x40] sm:$0xff] %vm1897_vm7, %v2469_v40  ;;  %2547 = vst.msk [vmem:[#allocation2 + $0xa0] sm:$0xff] %vm1897_vm7, %v2543_v61  ;;  %v6684_v40 = vld [vmem:[%s9209_s3 + $0x268] ss:$16 sps:$4 sm:$0xff]   ;;  %v6689_v61 = vld [vmem:[%s9209_s3 + $0x24c] ss:$16 sps:$4 sm:$0xff]  }
 0x3f4   :  { %v2471_v62 = vpop.permute.xlu1 %2470  ;;  %v2559_v63 = vld [vmem:[#allocation2 + $0x48] sm:$0xff] }
 0x3f5   :  { %2475 = vst.msk [vmem:[#allocation2 + $0x98] sm:$0xff] %vm1897_vm7, %v2471_v62  ;;  %v6687_v62 = vld [vmem:[%s9209_s3 + $0x248] ss:$16 sps:$4 sm:$0xff]  }
 0x3f8   :  { %v2570_v38 = vld [vmem:[#allocation2 + $0xa0] sm:$0xff] }
 0x3f9   :  { %v8389_v1 = vpack.c.bf16 %v2570_v38, %v2559_v63  ;;  %v2558_v3 = vld [vmem:[#allocation2 + $0x40] sm:$0xff]  ;;  %v6692_v63 = vld [vmem:[%s9209_s3 + $0x22c] ss:$16 sps:$4 sm:$0xff]   ;;  %v6690_v38 = vld [vmem:[%s9209_s3 + $0x228] ss:$16 sps:$4 sm:$0xff]  }
 0x3fb   :  { %4756 = vmatprep.mubr.bf16.mxu1 %v8389_v1 }
 0x3fc   :  { %v2569_v4 = vld [vmem:[#allocation2 + $0x98] sm:$0xff] }
 0x3fd   :  { %v8395_v7 = vpack.c.bf16 %v2569_v4, %v2558_v3  ;;  %v6695_v3 = vld [vmem:[%s9209_s3 + $0x20c] ss:$16 sps:$4 sm:$0xff]  }
 0x3fe   :  { %v5131_v4 = vld [vmem:[%s9210_s5 + $0x1b8] sm:$0xff] }
 0x3ff   :  { %4757 = vmatmul.mubr.bf16.vlgmr.msra.gmra.mxu1 %v8395_v7  ;;  %6034 = vmatprep.subr.mxu0 %v5131_v4  ;;  %v6773_v4 = vld [vmem:[%s9209_s3 + $0x6cc] ss:$16 sps:$4 sm:$0xff]  }
 0x400   :  { %4782 = vmatpush1.bf16.msra.mxu1 %v6621_v5  ;;  %4799 = vmatprep.mubr.bf16.mxu1 %v6891_v0  ;;  %v6693_v5 = vld [vmem:[%s9209_s3 + $0x208] ss:$16 sps:$4 sm:$0xff]  }
 0x401   :  { %4810 = vmatprep.subr.bf16.mxu1 %v6626_v41  ;;  %v5115_v41 = vld [vmem:[%s9210_s5 + $0x138] sm:$0xff] }
 0x402   :  { %6035 = vmatpush3.msra.mxu0 %v5115_v41  ;;  %v6776_v41 = vld [vmem:[%s9209_s3 + $0x6ac] ss:$16 sps:$4 sm:$0xff]  }
 0x407   :  { %5974 = vmatmul.mubr.msk.bf16.vlgmr.msra.gmra.mxu1 %vm1820_vm0, %v8405_v12 }
 0x408   :  { %4811 = vmatpush1.bf16.msra.mxu1 %v6624_v11  ;;  %4842 = vmatprep.mubr.bf16.mxu1 %v7564_v9  ;;  %v6635_v9 = vld [vmem:[%s9209_s3 + $0x8c] ss:$16 sps:$4 sm:$0xff]  }
 0x409   :  { %4812 = vmatprep.subr.bf16.mxu1 %v6629_v13  ;;  %v6701_v11 = vld [vmem:[%s9209_s3 + $0x3cc] ss:$16 sps:$4 sm:$0xff]   ;;  %v6699_v13 = vld [vmem:[%s9209_s3 + $0x3c8] ss:$16 sps:$4 sm:$0xff]  }
 0x40c   :  { %4813 = vmatpush1.bf16.msra.mxu1 %v6627_v49  ;;  %v6704_v49 = vld [vmem:[%s9209_s3 + $0x3ac] ss:$16 sps:$4 sm:$0xff]  }
 0x40d   :  { %4814 = vmatprep.subr.bf16.mxu1 %v6632_v14  ;;  %v6702_v14 = vld [vmem:[%s9209_s3 + $0x3a8] ss:$16 sps:$4 sm:$0xff]  }
 0x410   :  { %4815 = vmatpush1.bf16.msra.mxu1 %v6630_v17  ;;  %v6707_v17 = vld [vmem:[%s9209_s3 + $0x38c] ss:$16 sps:$4 sm:$0xff]  }
 0x411   :  { %4816 = vmatprep.subr.bf16.mxu1 %v6635_v9  ;;  %v6710_v9 = vld [vmem:[%s9209_s3 + $0x36c] ss:$16 sps:$4 sm:$0xff]  }
 0x414   :  { %4817 = vmatpush1.bf16.msra.mxu1 %v6633_v52  ;;  %v6713_v52 = vld [vmem:[%s9209_s3 + $0x34c] ss:$16 sps:$4 sm:$0xff]  }
 0x415   :  { %4818 = vmatprep.subr.bf16.mxu1 %v6638_v20  ;;  %v6711_v20 = vld [vmem:[%s9209_s3 + $0x348] ss:$16 sps:$4 sm:$0xff]  }
 0x418   :  { %4819 = vmatpush1.bf16.msra.mxu1 %v6636_v2  ;;  %v6716_v2 = vld [vmem:[%s9209_s3 + $0x32c] ss:$16 sps:$4 sm:$0xff]  }
 0x419   :  { %4820 = vmatprep.subr.bf16.mxu1 %v6641_v24  ;;  %v6714_v24 = vld [vmem:[%s9209_s3 + $0x328] ss:$16 sps:$4 sm:$0xff]  }
 0x41c   :  { %4821 = vmatpush1.bf16.msra.mxu1 %v6639_v25  ;;  %v6719_v25 = vld [vmem:[%s9209_s3 + $0x30c] ss:$16 sps:$4 sm:$0xff]  }
 0x41d   :  { %4822 = vmatprep.subr.bf16.mxu1 %v6644_v26  ;;  %v6717_v26 = vld [vmem:[%s9209_s3 + $0x308] ss:$16 sps:$4 sm:$0xff]  }
 0x420   :  { %4823 = vmatpush1.bf16.msra.mxu1 %v6642_v6  ;;  %v6722_v6 = vld [vmem:[%s9209_s3 + $0x4ec] ss:$16 sps:$4 sm:$0xff]  }
 0x421   :  { %4824 = vmatprep.subr.bf16.mxu1 %v6647_v27  ;;  %v6720_v27 = vld [vmem:[%s9209_s3 + $0x4e8] ss:$16 sps:$4 sm:$0xff]  }
 0x424   :  { %4825 = vmatpush1.bf16.msra.mxu1 %v6645_v28  ;;  %v6725_v28 = vld [vmem:[%s9209_s3 + $0x4cc] ss:$16 sps:$4 sm:$0xff]  }
 0x425   :  { %4826 = vmatprep.subr.bf16.mxu1 %v6650_v21  ;;  %v6723_v21 = vld [vmem:[%s9209_s3 + $0x4c8] ss:$16 sps:$4 sm:$0xff]  }
 0x428   :  { %4827 = vmatpush2.bf16.msra.mxu1 %v6648_v29  ;;  %v5130_v29 = vld [vmem:[%s9210_s5 + $0x1b0] sm:$0xff] }
 0x429   :  { %4828 = vmatprep.subr.bf16.mxu1 %v6653_v30  ;;  %v6728_v30 = vld [vmem:[%s9209_s3 + $0x4ac] ss:$16 sps:$4 sm:$0xff]   ;;  %6036 = vmatprep.subr.mxu0 %v5130_v29 }
 0x42a   :  { %v6806_v29 = vld [vmem:[%s9209_s3 + $0x76c] ss:$16 sps:$4 sm:$0xff]  }
 0x42c   :  { %4829 = vmatpush2.bf16.msra.mxu1 %v6651_v31  ;;  %v6731_v31 = vld [vmem:[%s9209_s3 + $0x48c] ss:$16 sps:$4 sm:$0xff]  }
 0x42d   :  { %4830 = vmatprep.subr.bf16.mxu1 %v6656_v32  ;;  %v6729_v32 = vld [vmem:[%s9209_s3 + $0x488] ss:$16 sps:$4 sm:$0xff]  }
 0x430   :  { %4831 = vmatpush2.bf16.msra.mxu1 %v6654_v33  ;;  %v6734_v33 = vld [vmem:[%s9209_s3 + $0x46c] ss:$16 sps:$4 sm:$0xff]  }
 0x431   :  { %4832 = vmatprep.subr.bf16.mxu1 %v6659_v34  ;;  %v6732_v34 = vld [vmem:[%s9209_s3 + $0x468] ss:$16 sps:$4 sm:$0xff]  }
 0x434   :  { %4833 = vmatpush2.bf16.msra.mxu1 %v6657_v23  ;;  %v6737_v23 = vld [vmem:[%s9209_s3 + $0x44c] ss:$16 sps:$4 sm:$0xff]  }
 0x435   :  { %4834 = vmatprep.subr.bf16.mxu1 %v6662_v37  ;;  %v6735_v37 = vld [vmem:[%s9209_s3 + $0x448] ss:$16 sps:$4 sm:$0xff]  }
 0x438   :  { %4835 = vmatpush2.bf16.msra.mxu1 %v6660_v39  ;;  %v6740_v39 = vld [vmem:[%s9209_s3 + $0x42c] ss:$16 sps:$4 sm:$0xff]  }
 0x439   :  { %4836 = vmatprep.subr.bf16.mxu1 %v6665_v42  ;;  %v6738_v42 = vld [vmem:[%s9209_s3 + $0x428] ss:$16 sps:$4 sm:$0xff]  }
 0x43c   :  { %4837 = vmatpush2.bf16.msra.mxu1 %v6663_v44  ;;  %v6741_v44 = vld [vmem:[%s9209_s3 + $0x408] ss:$16 sps:$4 sm:$0xff]  }
 0x43d   :  { %4838 = vmatprep.subr.bf16.mxu1 %v6668_v48  ;;  %v6744_v48 = vld [vmem:[%s9209_s3 + $0x5e8] ss:$16 sps:$4 sm:$0xff]  }
 0x440   :  { %4839 = vmatpush2.bf16.msra.mxu1 %v6666_v50  ;;  %v6749_v50 = vld [vmem:[%s9209_s3 + $0x5cc] ss:$16 sps:$4 sm:$0xff]  }
 0x441   :  { %4840 = vmatprep.subr.bf16.mxu1 %v6671_v51  ;;  %v6747_v51 = vld [vmem:[%s9209_s3 + $0x5c8] ss:$16 sps:$4 sm:$0xff]  }
 0x444   :  { %4841 = vmatpush2.bf16.msra.mxu1 %v6669_v53  ;;  %v6752_v53 = vld [vmem:[%s9209_s3 + $0x5ac] ss:$16 sps:$4 sm:$0xff]  }
 0x445   :  { %4853 = vmatprep.subr.bf16.mxu1 %v6674_v54  ;;  %v6750_v54 = vld [vmem:[%s9209_s3 + $0x5a8] ss:$16 sps:$4 sm:$0xff]  }
 0x447   :  { %4843 = vmatmul.mubr.bf16.vlgmr.msra.gmra.mxu1 %v7572_v15  ;;  %v6683_v15 = vld [vmem:[%s9209_s3 + $0x28c] ss:$16 sps:$4 sm:$0xff]  }
 0x448   :  { %4854 = vmatpush1.bf16.msra.mxu1 %v6672_v55  ;;  %4885 = vmatprep.mubr.bf16.mxu1 %v7828_v47  ;;  %v6681_v47 = vld [vmem:[%s9209_s3 + $0x288] ss:$16 sps:$4 sm:$0xff]   ;;  %v6755_v55 = vld [vmem:[%s9209_s3 + $0x58c] ss:$16 sps:$4 sm:$0xff]  }
 0x449   :  { %4855 = vmatprep.subr.bf16.mxu1 %v6677_v36  ;;  %v6753_v36 = vld [vmem:[%s9209_s3 + $0x588] ss:$16 sps:$4 sm:$0xff]  }
 0x44c   :  { %4856 = vmatpush1.bf16.msra.mxu1 %v6675_v57  ;;  %v5129_v57 = vld [vmem:[%s9210_s5 + $0x1a8] sm:$0xff] }
 0x44d   :  { %4857 = vmatprep.subr.bf16.mxu1 %v6680_v58  ;;  %v5113_v58 = vld [vmem:[%s9210_s5 + $0x128] sm:$0xff] }
 0x450   :  { %4858 = vmatpush1.bf16.msra.mxu1 %v6678_v59  ;;  %v6758_v59 = vld [vmem:[%s9209_s3 + $0x56c] ss:$16 sps:$4 sm:$0xff]  }
 0x451   :  { %4859 = vmatprep.subr.bf16.mxu1 %v6683_v15  ;;  %v6756_v15 = vld [vmem:[%s9209_s3 + $0x568] ss:$16 sps:$4 sm:$0xff]  }
 0x454   :  { %4860 = vmatpush1.bf16.msra.mxu1 %v6681_v47  ;;  %v6761_v47 = vld [vmem:[%s9209_s3 + $0x54c] ss:$16 sps:$4 sm:$0xff]  }
 0x455   :  { %4861 = vmatprep.subr.bf16.mxu1 %v6686_v60  ;;  %v6759_v60 = vld [vmem:[%s9209_s3 + $0x548] ss:$16 sps:$4 sm:$0xff]  }
 0x458   :  { %4862 = vmatpush1.bf16.msra.mxu1 %v6684_v40  ;;  %v6764_v40 = vld [vmem:[%s9209_s3 + $0x52c] ss:$16 sps:$4 sm:$0xff]  }
 0x459   :  { %4863 = vmatprep.subr.bf16.mxu1 %v6689_v61  ;;  %v6762_v61 = vld [vmem:[%s9209_s3 + $0x528] ss:$16 sps:$4 sm:$0xff]  }
 0x45c   :  { %4864 = vmatpush1.bf16.msra.mxu1 %v6687_v62  ;;  %v6767_v62 = vld [vmem:[%s9209_s3 + $0x50c] ss:$16 sps:$4 sm:$0xff]  }
 0x45d   :  { %4865 = vmatprep.subr.bf16.mxu1 %v6692_v63  ;;  %v6765_v63 = vld [vmem:[%s9209_s3 + $0x508] ss:$16 sps:$4 sm:$0xff]  }
 0x460   :  { %4866 = vmatpush1.bf16.msra.mxu1 %v6690_v38  ;;  %v6770_v38 = vld [vmem:[%s9209_s3 + $0x6ec] ss:$16 sps:$4 sm:$0xff]  }
 0x461   :  { %4867 = vmatprep.subr.bf16.mxu1 %v6695_v3  ;;  %v6768_v3 = vld [vmem:[%s9209_s3 + $0x6e8] ss:$16 sps:$4 sm:$0xff]  }
 0x464   :  { %4868 = vmatpush1.bf16.msra.mxu1 %v6693_v5  ;;  %v6771_v5 = vld [vmem:[%s9209_s3 + $0x6c8] ss:$16 sps:$4 sm:$0xff]  }
 0x465   :  { %4869 = vmatprep.subr.bf16.mxu1 %v6698_v8  ;;  %v6774_v8 = vld [vmem:[%s9209_s3 + $0x6a8] ss:$16 sps:$4 sm:$0xff]  }
 0x468   :  { %4870 = vmatpush2.bf16.msra.mxu1 %v6696_v10  ;;  %v6782_v10 = vld [vmem:[%s9209_s3 + $0x66c] ss:$16 sps:$4 sm:$0xff]  }
 0x469   :  { %4871 = vmatprep.subr.bf16.mxu1 %v6701_v11  ;;  %v6780_v11 = vld [vmem:[%s9209_s3 + $0x668] ss:$16 sps:$4 sm:$0xff]  }
 0x46c   :  { %4872 = vmatpush2.bf16.msra.mxu1 %v6699_v13  ;;  %v6785_v13 = vld [vmem:[%s9209_s3 + $0x64c] ss:$16 sps:$4 sm:$0xff]  }
 0x46d   :  { %4873 = vmatprep.subr.bf16.mxu1 %v6704_v49  ;;  %v6783_v49 = vld [vmem:[%s9209_s3 + $0x648] ss:$16 sps:$4 sm:$0xff]  }
 0x470   :  { %4874 = vmatpush2.bf16.msra.mxu1 %v6702_v14  ;;  %v6788_v14 = vld [vmem:[%s9209_s3 + $0x62c] ss:$16 sps:$4 sm:$0xff]  }
 0x471   :  { %4875 = vmatprep.subr.bf16.mxu1 %v6707_v17  ;;  %v5128_v17 = vld [vmem:[%s9210_s5 + $0x1a0] sm:$0xff] }
 0x474   :  { %4876 = vmatpush2.bf16.msra.mxu1 %v6705_v18  ;;  %v5112_v18 = vld [vmem:[%s9210_s5 + $0x120] sm:$0xff] }
 0x475   :  { %4877 = vmatprep.subr.bf16.mxu1 %v6710_v9  ;;  %v6786_v9 = vld [vmem:[%s9209_s3 + $0x628] ss:$16 sps:$4 sm:$0xff]  }
 0x478   :  { %4878 = vmatpush2.bf16.msra.mxu1 %v6708_v19  ;;  %v6791_v19 = vld [vmem:[%s9209_s3 + $0x60c] ss:$16 sps:$4 sm:$0xff]  }
 0x479   :  { %4879 = vmatprep.subr.bf16.mxu1 %v6713_v52  ;;  %v6789_v52 = vld [vmem:[%s9209_s3 + $0x608] ss:$16 sps:$4 sm:$0xff]  }
 0x47c   :  { %4880 = vmatpush2.bf16.msra.mxu1 %v6711_v20  ;;  %v6794_v20 = vld [vmem:[%s9209_s3 + $0x7ec] ss:$16 sps:$4 sm:$0xff]  }
 0x47d   :  { %4881 = vmatprep.subr.bf16.mxu1 %v6716_v2  ;;  %v6792_v2 = vld [vmem:[%s9209_s3 + $0x7e8] ss:$16 sps:$4 sm:$0xff]  }
 0x480   :  { %4882 = vmatpush2.bf16.msra.mxu1 %v6714_v24  ;;  %v6797_v24 = vld [vmem:[%s9209_s3 + $0x7cc] ss:$16 sps:$4 sm:$0xff]  }
 0x481   :  { %4883 = vmatprep.subr.bf16.mxu1 %v6719_v25  ;;  %v6795_v25 = vld [vmem:[%s9209_s3 + $0x7c8] ss:$16 sps:$4 sm:$0xff]  }
 0x484   :  { %4884 = vmatpush2.bf16.msra.mxu1 %v6717_v26  ;;  %v6800_v26 = vld [vmem:[%s9209_s3 + $0x7ac] ss:$16 sps:$4 sm:$0xff]  }
 0x485   :  { %4896 = vmatprep.subr.bf16.mxu1 %v6722_v6  ;;  %v6798_v6 = vld [vmem:[%s9209_s3 + $0x7a8] ss:$16 sps:$4 sm:$0xff]  }
 0x487   :  { %4886 = vmatmul.mubr.bf16.vlgmr.msra.gmra.mxu1 %v7836_v56  ;;  %v5114_v56 = vld [vmem:[%s9210_s5 + $0x130] sm:$0xff] }
 0x488   :  { %4897 = vmatpush1.bf16.msra.mxu1 %v6720_v27  ;;  %4928 = vmatprep.mubr.bf16.mxu1 %v8047_v16  ;;  %v6726_v16 = vld [vmem:[%s9209_s3 + $0x4a8] ss:$16 sps:$4 sm:$0xff]   ;;  %v6803_v27 = vld [vmem:[%s9209_s3 + $0x78c] ss:$16 sps:$4 sm:$0xff]  }
 0x489   :  { %4898 = vmatprep.subr.bf16.mxu1 %v6725_v28  ;;  %6037 = vmatpush3.msra.mxu0 %v5114_v56  ;;  %v8803_v28 = vpop.f32.mrf.mxu1  ;;  %v5127_v56 = vld [vmem:[%s9210_s5 + $0x198] sm:$0xff] }
 0x48a   :  { %6038 = vmatprep.subr.mxu0 %v5129_v57 }
 0x48b   :  { %6039 = vmatpush3.msra.mxu0 %v5113_v58  ;;  %v5126_v58 = vld [vmem:[%s9210_s5 + $0x190] sm:$0xff] }
 0x48c   :  { %4899 = vmatpush1.bf16.msra.mxu1 %v6723_v21  ;;  %6040 = vmatprep.subr.mxu0 %v5128_v17  ;;  %v6801_v21 = vld [vmem:[%s9209_s3 + $0x788] ss:$16 sps:$4 sm:$0xff]  }
 0x48d   :  { %4900 = vmatprep.subr.bf16.mxu1 %v6728_v30  ;;  %6041 = vmatpush3.msra.mxu0 %v5112_v18  ;;  %v8811_v30 = vpop.f32.mrf.mxu1  ;;  %v6843_v18 = vld [vmem:[%s9209_s3 + $0x9c8] ss:$16 sps:$4 sm:$0xff]  }
 0x48e   :  { %6042 = vmatprep.subr.mxu0 %v5127_v56 }
 0x490   :  { %4901 = vmatpush1.bf16.msra.mxu1 %v6726_v16  ;;  %v5111_v16 = vld [vmem:[%s9210_s5 + $0x118] sm:$0xff] }
 0x491   :  { %4902 = vmatprep.subr.bf16.mxu1 %v6731_v31  ;;  %v6804_v31 = vld [vmem:[%s9209_s3 + $0x768] ss:$16 sps:$4 sm:$0xff]   ;;  %6043 = vmatpush3.msra.mxu0 %v5111_v16 }
 0x492   :  { %6044 = vmatprep.subr.mxu0 %v5126_v58  ;;  %v6852_v16 = vld [vmem:[%s9209_s3 + $0x968] ss:$16 sps:$4 sm:$0xff]  }
 0x494   :  { %4903 = vmatpush1.bf16.msra.mxu1 %v6729_v32  ;;  %v6809_v32 = vld [vmem:[%s9209_s3 + $0x74c] ss:$16 sps:$4 sm:$0xff]  }
 0x495   :  { %4904 = vmatprep.subr.bf16.mxu1 %v6734_v33  ;;  %v8825_v33 = vpop.f32.mrf.mxu1 }
 0x498   :  { %4905 = vmatpush1.bf16.msra.mxu1 %v6732_v34  ;;  %v6807_v34 = vld [vmem:[%s9209_s3 + $0x748] ss:$16 sps:$4 sm:$0xff]  }
 0x499   :  { %4906 = vmatprep.subr.bf16.mxu1 %v6737_v23  ;;  %v6812_v23 = vld [vmem:[%s9209_s3 + $0x72c] ss:$16 sps:$4 sm:$0xff]  }
 0x49c   :  { %4907 = vmatpush1.bf16.msra.mxu1 %v6735_v37  ;;  %v8833_v37 = vpop.f32.mrf.mxu1 }
 0x49d   :  { %4908 = vmatprep.subr.bf16.mxu1 %v6740_v39  ;;  %v6810_v39 = vld [vmem:[%s9209_s3 + $0x728] ss:$16 sps:$4 sm:$0xff]  }
 0x4a0   :  { %4909 = vmatpush1.bf16.msra.mxu1 %v6738_v42  ;;  %v8838_v42 = vpop.f32.mrf.mxu1 }
 0x4a1   :  { %4910 = vmatprep.subr.bf16.mxu1 %v6743_v43  ;;  %v6815_v43 = vld [vmem:[%s9209_s3 + $0x70c] ss:$16 sps:$4 sm:$0xff]  }
 0x4a4   :  { %4911 = vmatpush1.bf16.msra.mxu1 %v6741_v44  ;;  %v6813_v44 = vld [vmem:[%s9209_s3 + $0x708] ss:$16 sps:$4 sm:$0xff]  }
 0x4a5   :  { %4912 = vmatprep.subr.bf16.mxu1 %v6746_v45  ;;  %v8846_v45 = vpop.f32.mrf.mxu1 }
 0x4a8   :  { %4913 = vmatpush2.bf16.msra.mxu1 %v6744_v48  ;;  %v6818_v48 = vld [vmem:[%s9209_s3 + $0x8ec] ss:$16 sps:$4 sm:$0xff]  }
 0x4a9   :  { %4914 = vmatprep.subr.bf16.mxu1 %v6749_v50  ;;  %v6816_v50 = vld [vmem:[%s9209_s3 + $0x8e8] ss:$16 sps:$4 sm:$0xff]  }
 0x4ac   :  { %4915 = vmatpush2.bf16.msra.mxu1 %v6747_v51  ;;  %v8854_v51 = vpop.f32.mrf.mxu1 }
 0x4ad   :  { %4916 = vmatprep.subr.bf16.mxu1 %v6752_v53  ;;  %v6821_v53 = vld [vmem:[%s9209_s3 + $0x8cc] ss:$16 sps:$4 sm:$0xff]  }
 0x4b0   :  { %4917 = vmatpush2.bf16.msra.mxu1 %v6750_v54  ;;  %v6819_v54 = vld [vmem:[%s9209_s3 + $0x8c8] ss:$16 sps:$4 sm:$0xff]  }
 0x4b1   :  { %4918 = vmatprep.subr.bf16.mxu1 %v6755_v55  ;;  %v8864_v55 = vpop.f32.mrf.mxu1 }
 0x4b3   :  { %v8869_v57 = vpop.f32.mrf.mxu1 }
 0x4b4   :  { %4919 = vmatpush2.bf16.msra.mxu1 %v6753_v36  ;;  %v6824_v36 = vld [vmem:[%s9209_s3 + $0x8ac] ss:$16 sps:$4 sm:$0xff]  }
 0x4b5   :  { %4920 = vmatprep.subr.bf16.mxu1 %v6758_v59  ;;  %v5110_v59 = vld [vmem:[%s9210_s5 + $0x110] sm:$0xff] }
 0x4b6   :  { %6045 = vmatpush3.msra.mxu0 %v5110_v59  ;;  %v5091_v59 = vld [vmem:[%s9210_s5 + $0x78] sm:$0xff] }
 0x4b8   :  { %4921 = vmatpush2.bf16.msra.mxu1 %v6756_v15  ;;  %v4674_v15 = vpop.f32.mrf.mxu1 }
 0x4b9   :  { %4922 = vmatprep.subr.bf16.mxu1 %v6761_v47  ;;  %v6825_v47 = vld [vmem:[%s9209_s3 + $0x888] ss:$16 sps:$4 sm:$0xff]  }
 0x4bc   :  { %4923 = vmatpush2.bf16.msra.mxu1 %v6759_v60  ;;  %v6830_v60 = vld [vmem:[%s9209_s3 + $0x86c] ss:$16 sps:$4 sm:$0xff]  }
 0x4bd   :  { %4924 = vmatprep.subr.bf16.mxu1 %v6764_v40  ;;  %v8889_v40 = vpop.f32.mrf.mxu1 }
 0x4c0   :  { %4925 = vmatpush2.bf16.msra.mxu1 %v6762_v61  ;;  %v6828_v61 = vld [vmem:[%s9209_s3 + $0x868] ss:$16 sps:$4 sm:$0xff]  }
 0x4c1   :  { %4926 = vmatprep.subr.bf16.mxu1 %v6767_v62  ;;  %v6833_v62 = vld [vmem:[%s9209_s3 + $0x84c] ss:$16 sps:$4 sm:$0xff]  }
 0x4c4   :  { %4927 = vmatpush2.bf16.msra.mxu1 %v6765_v63  ;;  %v8897_v63 = vpop.f32.mrf.mxu1 }
 0x4c5   :  { %4939 = vmatprep.subr.bf16.mxu1 %v6770_v38  ;;  %v6831_v38 = vld [vmem:[%s9209_s3 + $0x848] ss:$16 sps:$4 sm:$0xff]  }
 0x4c7   :  { %4929 = vmatmul.mubr.bf16.vlgmr.msra.gmra.mxu1 %v8055_v22  ;;  %v6779_v22 = vld [vmem:[%s9209_s3 + $0x68c] ss:$16 sps:$4 sm:$0xff]  }
 0x4c8   :  { %4940 = vmatpush1.bf16.msra.mxu1 %v6768_v3  ;;  %4971 = vmatprep.mubr.bf16.mxu1 %v8233_v35  ;;  %v6777_v35 = vld [vmem:[%s9209_s3 + $0x688] ss:$16 sps:$4 sm:$0xff]   ;;  %v8902_v3 = vpop.f32.mrf.mxu1 }
 0x4c9   :  { %4941 = vmatprep.subr.bf16.mxu1 %v6773_v4  ;;  %v6836_v4 = vld [vmem:[%s9209_s3 + $0x82c] ss:$16 sps:$4 sm:$0xff]  }
 0x4cc   :  { %4942 = vmatpush1.bf16.msra.mxu1 %v6771_v5  ;;  %v6834_v5 = vld [vmem:[%s9209_s3 + $0x828] ss:$16 sps:$4 sm:$0xff]  }
 0x4cd   :  { %4943 = vmatprep.subr.bf16.mxu1 %v6776_v41  ;;  %v4717_v41 = vpop.f32.mrf.mxu1 }
 0x4d0   :  { %4944 = vmatpush1.bf16.msra.mxu1 %v6774_v8  ;;  %v6839_v8 = vld [vmem:[%s9209_s3 + $0x80c] ss:$16 sps:$4 sm:$0xff]  }
 0x4d1   :  { %4945 = vmatprep.subr.bf16.mxu1 %v6779_v22  ;;  %v6837_v22 = vld [vmem:[%s9209_s3 + $0x808] ss:$16 sps:$4 sm:$0xff]  }
 0x4d4   :  { %4946 = vmatpush1.bf16.msra.mxu1 %v6777_v35  ;;  %v8916_v35 = vpop.f32.mrf.mxu1 }
 0x4d5   :  { %4947 = vmatprep.subr.bf16.mxu1 %v6782_v10  ;;  %v6842_v10 = vld [vmem:[%s9209_s3 + $0x9ec] ss:$16 sps:$4 sm:$0xff]  }
 0x4d8   :  { %4948 = vmatpush1.bf16.msra.mxu1 %v6780_v11  ;;  %v6840_v11 = vld [vmem:[%s9209_s3 + $0x9e8] ss:$16 sps:$4 sm:$0xff]  }
 0x4d9   :  { %4949 = vmatprep.subr.bf16.mxu1 %v6785_v13  ;;  %v8924_v13 = vpop.f32.mrf.mxu1 }
 0x4db   :  { %v8929_v17 = vpop.f32.mrf.mxu1 }
 0x4dc   :  { %4950 = vmatpush1.bf16.msra.mxu1 %v6783_v49  ;;  %v6845_v49 = vld [vmem:[%s9209_s3 + $0x9cc] ss:$16 sps:$4 sm:$0xff]  }
 0x4dd   :  { %4951 = vmatprep.subr.bf16.mxu1 %v6788_v14  ;;  %v2909_v14 = vlaneseq }
 0x4e0   :  { %4952 = vmatpush1.bf16.msra.mxu1 %v6786_v9  ;;  %v6848_v9 = vld [vmem:[%s9209_s3 + $0x9ac] ss:$16 sps:$4 sm:$0xff]  }
 0x4e1   :  { %4953 = vmatprep.subr.bf16.mxu1 %v6791_v19  ;;  %v8938_v19 = vshrl.u32 %v2909_v14, 7 }
 0x4e3   :  { %v2911_v58 = vsub.s32 0, %v8938_v19 }
 0x4e4   :  { %4954 = vmatpush1.bf16.msra.mxu1 %v6789_v52  ;;  %v4760_v52 = vpop.f32.mrf.mxu1 }
 0x4e5   :  { %4955 = vmatprep.subr.bf16.mxu1 %v6794_v20  ;;  %v2915_v20 = vsub.s32 1, %v8938_v19 }
 0x4e8   :  { %4956 = vmatpush2.bf16.msra.mxu1 %v6792_v2  ;;  %v6846_v2 = vld [vmem:[%s9209_s3 + $0x9a8] ss:$16 sps:$4 sm:$0xff]  }
 0x4e9   :  { %4957 = vmatprep.subr.bf16.mxu1 %v6797_v24  ;;  %v6851_v24 = vld [vmem:[%s9209_s3 + $0x98c] ss:$16 sps:$4 sm:$0xff]  }
 0x4ec   :  { %4958 = vmatpush2.bf16.msra.mxu1 %v6795_v25  ;;  %v8950_v25 = vld [vmem:[%s9211_s4] sm:$0xf] }
 0x4ed   :  { %4959 = vmatprep.subr.bf16.mxu1 %v6800_v26  ;;  %v8952_v26 = vpop.f32.mrf.mxu1 }
 0x4f0   :  { %4960 = vmatpush2.bf16.msra.mxu1 %v6798_v6  ;;  %v8955_v6 = vrot.slane %v8950_v25, %v2915_v20 }
 0x4f1   :  { %4961 = vmatprep.subr.bf16.mxu1 %v6803_v27  ;;  %v6849_v27 = vld [vmem:[%s9209_s3 + $0x988] ss:$16 sps:$4 sm:$0xff]  }
 0x4f2   :  { %v4589_v56 = vadd.f32 %v8811_v30, %v8955_v6  ;;  %v6855_v30 = vld [vmem:[%s9209_s3 + $0x948] ss:$16 sps:$4 sm:$0xff]  }
 0x4f4   :  { %4962 = vmatpush2.bf16.msra.mxu1 %v6801_v21  ;;  %v6854_v21 = vld [vmem:[%s9209_s3 + $0x96c] ss:$16 sps:$4 sm:$0xff]  }
 0x4f5   :  { %4963 = vmatprep.subr.bf16.mxu1 %v6806_v29  ;;  %v8963_v29 = vpop.f32.mrf.mxu1 }
 0x4f8   :  { %4964 = vmatpush2.bf16.msra.mxu1 %v6804_v31  ;;  %v6857_v31 = vld [vmem:[%s9209_s3 + $0x94c] ss:$16 sps:$4 sm:$0xff]  }
 0x4f9   :  { %4965 = vmatprep.subr.bf16.mxu1 %v6809_v32  ;;  %v4632_v32 = vadd.f32 %v8846_v45, %v4589_v56  ;;  %v6858_v45 = vld [vmem:[%s9209_s3 + $0x928] ss:$16 sps:$4 sm:$0xff]  }
 0x4fc   :  { %4966 = vmatpush2.bf16.msra.mxu1 %v6807_v34  ;;  %v8974_v34 = vpop.f32.mrf.mxu1 }
 0x4fd   :  { %4967 = vmatprep.subr.bf16.mxu1 %v6812_v23  ;;  %v4675_v23 = vadd.f32 %v4674_v15, %v4632_v32  ;;  %v5106_v15 = vld [vmem:[%s9210_s5 + $0xf0] sm:$0xff] }
 0x500   :  { %4968 = vmatpush2.bf16.msra.mxu1 %v6810_v39  ;;  %v6860_v39 = vld [vmem:[%s9209_s3 + $0x92c] ss:$16 sps:$4 sm:$0xff]  }
 0x501   :  { %4969 = vmatprep.subr.bf16.mxu1 %v6815_v43  ;;  %v4718_v43 = vadd.f32 %v4717_v41, %v4675_v23  ;;  %v5104_v41 = vld [vmem:[%s9210_s5 + $0xe0] sm:$0xff] }
 0x504   :  { %4970 = vmatpush2.bf16.msra.mxu1 %v6813_v44  ;;  %v4803_v44 = vpop.f32.mrf.mxu1 }
 0x505   :  { %4982 = vmatprep.subr.bf16.mxu1 %v6818_v48  ;;  %v4761_v48 = vadd.f32 %v4760_v52, %v4718_v43  ;;  %v5095_v43 = vld [vmem:[%s9210_s5 + $0x98] sm:$0xff] }
 0x506   :  { %v4805_v20 = vpop.f32.mrf.mxu1 }
 0x507   :  { %4972 = vmatmul.mubr.bf16.vlgmr.msra.gmra.mxu1 %v8241_v46  ;;  %v6822_v46 = vld [vmem:[%s9209_s3 + $0x8a8] ss:$16 sps:$4 sm:$0xff]  }
 0x508   :  { %4983 = vmatpush1.bf16.msra.mxu1 %v6816_v50  ;;  %5014 = vmatprep.mubr.bf16.mxu1 %v8389_v1  ;;  %v6827_v1 = vld [vmem:[%s9209_s3 + $0x88c] ss:$16 sps:$4 sm:$0xff]   ;;  %v4807_v56 = vpop.f32.mrf.mxu1 }
 0x509   :  { %4984 = vmatprep.subr.bf16.mxu1 %v6821_v53  ;;  %v6863_v50 = vld [vmem:[%s9209_s3 + $0x90c] ss:$16 sps:$4 sm:$0xff]   ;;  %v4804_v53 = vadd.f32 %v4803_v44, %v4761_v48  ;;  %v5094_v48 = vld [vmem:[%s9210_s5 + $0x90] sm:$0xff] }
 0x50a   :  { %v5079_v44 = vld [vmem:[%s9210_s5 + $0x18] sm:$0xff] }
 0x50b   :  { %6867 = vtanh.f32 %v4804_v53  ;;  %v5077_v53 = vld [vmem:[%s9210_s5 + $0x8] sm:$0xff] }
 0x50c   :  { %4985 = vmatpush1.bf16.msra.mxu1 %v6819_v54  ;;  %v6861_v54 = vld [vmem:[%s9209_s3 + $0x908] ss:$16 sps:$4 sm:$0xff]  }
 0x50d   :  { %4986 = vmatprep.subr.bf16.mxu1 %v6824_v36  ;;  %v6866_v36 = vld [vmem:[%s9209_s3 + $0xa0c] ss:$16 sps:$4 sm:$0xff]  }
 0x510   :  { %4987 = vmatpush1.bf16.msra.mxu1 %v6822_v46  ;;  %v6864_v46 = vld [vmem:[%s9209_s3 + $0xa08] ss:$16 sps:$4 sm:$0xff]  }
 0x511   :  { %4988 = vmatprep.subr.bf16.mxu1 %v6827_v1  ;;  %v5107_v1 = vld [vmem:[%s9210_s5 + $0xf8] sm:$0xff] }
 0x514   :  { %4989 = vmatpush1.bf16.msra.mxu1 %v6825_v47  ;;  %v5125_v47 = vld [vmem:[%s9210_s5 + $0x188] sm:$0xff] }
 0x515   :  { %4990 = vmatprep.subr.bf16.mxu1 %v6830_v60  ;;  %6046 = vmatprep.subr.mxu0 %v5125_v47  ;;  %v5312_v47 = vld [vmem:[%s9212_s7 + $0x68] sm:$0xff] }
 0x518   :  { %4991 = vmatpush1.bf16.msra.mxu1 %v6828_v61  ;;  %v6868_v60 = vpop.eup %6867  ;;  %v2912_v61 = vrot.slane %v8950_v25, %v2911_v58 }
 0x519   :  { %4992 = vmatprep.subr.bf16.mxu1 %v6833_v62  ;;  %v5090_v62 = vld [vmem:[%s9210_s5 + $0x70] sm:$0xff] }
 0x51c   :  { %4993 = vmatpush1.bf16.msra.mxu1 %v6831_v38  ;;  %v5124_v38 = vld [vmem:[%s9210_s5 + $0x180] sm:$0xff] }
 0x51d   :  { %4994 = vmatprep.subr.bf16.mxu1 %v6836_v4  ;;  %v5105_v4 = vld [vmem:[%s9210_s5 + $0xe8] sm:$0xff] }
 0x520   :  { %4995 = vmatpush1.bf16.msra.mxu1 %v6834_v5  ;;  %v5108_v5 = vld [vmem:[%s9210_s5 + $0x100] sm:$0xff] }
 0x521   :  { %4996 = vmatprep.subr.bf16.mxu1 %v6839_v8  ;;  %v4587_v8 = vadd.f32 %v8803_v28, %v2912_v61  ;;  %v5087_v28 = vld [vmem:[%s9210_s5 + $0x58] sm:$0xff] }
 0x524   :  { %4997 = vmatpush1.bf16.msra.mxu1 %v6837_v22  ;;  %v5088_v22 = vld [vmem:[%s9210_s5 + $0x60] sm:$0xff] }
 0x525   :  { %4998 = vmatprep.subr.bf16.mxu1 %v6842_v10  ;;  %v4593_v10 = vadd.f32 %v8833_v37, %v8955_v6  ;;  %v4591_v37 = vadd.f32 %v8825_v33, %v2912_v61  ;;  %v5085_v33 = vld [vmem:[%s9210_s5 + $0x48] sm:$0xff] }
 0x528   :  { %4999 = vmatpush2.bf16.msra.mxu1 %v6840_v11  ;;  %v5103_v11 = vld [vmem:[%s9210_s5 + $0xd8] sm:$0xff] }
 0x529   :  { %5000 = vmatprep.subr.bf16.mxu1 %v6845_v49  ;;  %v4630_v49 = vadd.f32 %v8838_v42, %v4587_v8  ;;  %v5086_v42 = vld [vmem:[%s9210_s5 + $0x50] sm:$0xff] }
 0x52b   :  { %v4673_v52 = vadd.f32 %v8869_v57, %v4630_v49 }
 0x52c   :  { %5001 = vmatpush2.bf16.msra.mxu1 %v6843_v18  ;;  %v4636_v18 = vadd.f32 %v8864_v55, %v4593_v10  ;;  %v5101_v55 = vld [vmem:[%s9210_s5 + $0xc8] sm:$0xff] }
 0x52d   :  { %5002 = vmatprep.subr.bf16.mxu1 %v6848_v9  ;;  %v5102_v9 = vld [vmem:[%s9210_s5 + $0xd0] sm:$0xff]  ;;  %v4716_v6 = vadd.f32 %v8902_v3, %v4673_v52 }
 0x530   :  { %5003 = vmatpush2.bf16.msra.mxu1 %v6846_v2  ;;  %v4679_v2 = vadd.f32 %v8897_v63, %v4636_v18  ;;  %v5100_v63 = vld [vmem:[%s9210_s5 + $0xc0] sm:$0xff]  ;;  %v2919_v18 = vsub.s32 2, %v8938_v19 }
 0x531   :  { %5004 = vmatprep.subr.bf16.mxu1 %v6851_v24  ;;  %v4634_v24 = vadd.f32 %v8854_v51, %v4591_v37  ;;  %v5084_v51 = vld [vmem:[%s9210_s5 + $0x40] sm:$0xff] }
 0x532   :  { %v4722_v57 = vadd.f32 %v8924_v13, %v4679_v2  ;;  %v5099_v13 = vld [vmem:[%s9210_s5 + $0xb8] sm:$0xff]  ;;  %v2920_v52 = vrot.slane %v8950_v25, %v2919_v18 }
 0x534   :  { %5005 = vmatpush2.bf16.msra.mxu1 %v6849_v27  ;;  %v4677_v27 = vadd.f32 %v8889_v40, %v4634_v24  ;;  %v4765_v3 = vadd.f32 %v8963_v29, %v4722_v57  ;;  %v5083_v40 = vld [vmem:[%s9210_s5 + $0x38] sm:$0xff]  ;;  %v5098_v29 = vld [vmem:[%s9210_s5 + $0xb0] sm:$0xff] }
 0x535   :  { %5006 = vmatprep.subr.bf16.mxu1 %v6854_v21  ;;  %v4759_v21 = vadd.f32 %v8929_v17, %v4716_v6 }
 0x536   :  { %v4808_v17 = vadd.f32 %v4807_v56, %v4765_v3 }
 0x538   :  { %5007 = vmatpush2.bf16.msra.mxu1 %v6852_v16  ;;  %v4720_v16 = vadd.f32 %v8916_v35, %v4677_v27  ;;  %v5082_v35 = vld [vmem:[%s9210_s5 + $0x30] sm:$0xff] }
 0x539   :  { %5008 = vmatprep.subr.bf16.mxu1 %v6857_v31  ;;  %v4802_v31 = vadd.f32 %v8974_v34, %v4759_v21  ;;  %v5097_v34 = vld [vmem:[%s9210_s5 + $0xa8] sm:$0xff] }
 0x53a   :  { %v4763_v32 = vadd.f32 %v8952_v26, %v4720_v16  ;;  %v5096_v26 = vld [vmem:[%s9210_s5 + $0xa0] sm:$0xff] }
 0x53b   :  { %6869 = vtanh.f32 %v4802_v31 }
 0x53c   :  { %5009 = vmatpush2.bf16.msra.mxu1 %v6855_v30  ;;  %v4806_v23 = vadd.f32 %v4805_v20, %v4763_v32  ;;  %v5081_v30 = vld [vmem:[%s9210_s5 + $0x28] sm:$0xff]  ;;  %6871 = vtanh.f32 %v4808_v17 }
 0x53d   :  { %5010 = vmatprep.subr.bf16.mxu1 %v6860_v39  ;;  %v5080_v39 = vld [vmem:[%s9210_s5 + $0x20] sm:$0xff] }
 0x53e   :  { %6873 = vtanh.f32 %v4806_v23 }
 0x540   :  { %5011 = vmatpush2.bf16.msra.mxu1 %v6858_v45  ;;  %v5078_v45 = vld [vmem:[%s9210_s5 + $0x10] sm:$0xff] }
 0x541   :  { %5012 = vmatprep.subr.bf16.mxu1 %v6863_v50  ;;  %v5093_v50 = vld [vmem:[%s9210_s5 + $0x88] sm:$0xff] }
 0x544   :  { %5013 = vmatpush2.bf16.msra.mxu1 %v6861_v54  ;;  %v5092_v54 = vld [vmem:[%s9210_s5 + $0x80] sm:$0xff] }
 0x545   :  { %5039 = vmatprep.subr.bf16.mxu1 %v6866_v36  ;;  %v5076_v36 = vld [vmem:[%s9210_s5] sm:$0xff] }
 0x547   :  { %5015 = vmatmul.mubr.bf16.vlgmr.msra.gmra.mxu1 %v8395_v7  ;;  %v5109_v7 = vld [vmem:[%s9210_s5 + $0x108] sm:$0xff] }
 0x548   :  { %5040 = vmatpush1.bf16.msra.mxu1 %v6864_v46  ;;  %5057 = vmatprep.mubr.bf16.mxu1 %v6891_v0  ;;  %v6870_v46 = vpop.eup %6869 }
 0x549   :  { %5980 = vmatprep.subr.mxu1 %v5107_v1  ;;  %6047 = vmatpush3.msra.mxu0 %v5109_v7  ;;  %v6872_v1 = vpop.eup %6871  ;;  %v5311_v7 = vld [vmem:[%s9212_s7 + $0x60] sm:$0xff] }
 0x54a   :  { %6048 = vmatprep.subr.mxu0 %v5124_v38 }
 0x54b   :  { %6049 = vmatpush3.msra.mxu0 %v5108_v5  ;;  %v6874_v58 = vpop.eup %6873 }
 0x54f   :  { %5975 = vmatmul.mubr.msk.bf16.vlgmr.msra.gmra.mxu1 %vm1820_vm0, %v8405_v12  ;;  %v5089_v12 = vld [vmem:[%s9210_s5 + $0x68] sm:$0xff] }
 0x550   :  { %5981 = vmatpush3.msra.mxu1 %v5091_v59  ;;  %5211 = vmatprep.mubr.f32.mxu1 %v6868_v60  ;;  %v5314_v59 = vld [vmem:[%s9212_s7 + $0x78] sm:$0xff]  ;;  %v4844_v60 = vpop.f32.mrf.mxu1 }
 0x551   :  { %5982 = vmatprep.subr.mxu1 %v5106_v15  ;;  %v5313_v15 = vld [vmem:[%s9212_s7 + $0x70] sm:$0xff]  ;;  %v4845_v2 = vadd.f32 %v4844_v60, %v2920_v52  ;;  %v5304_v60 = vld [vmem:[%s9212_s7 + $0x28] sm:$0xff] }
 0x552   :  { %5983 = vmatpush3.msra.mxu1 %v5090_v62  ;;  %v4846_v61 = vpop.f32.mrf.mxu1 }
 0x553   :  { %5984 = vmatprep.subr.mxu1 %v5105_v4 }
 0x554   :  { %5985 = vmatpush3.msra.mxu1 %v5089_v12  ;;  %v4848_v62 = vpop.f32.mrf.mxu1 }
 0x555   :  { %5986 = vmatprep.subr.mxu1 %v5104_v41 }
 0x556   :  { %5987 = vmatpush3.msra.mxu1 %v5088_v22  ;;  %v4850_v38 = vpop.f32.mrf.mxu1 }
 0x557   :  { %5988 = vmatprep.subr.mxu1 %v5103_v11 }
 0x558   :  { %5989 = vmatpush3.msra.mxu1 %v5087_v28  ;;  %v4887_v4 = vpop.f32.mrf.mxu1 }
 0x559   :  { %5990 = vmatprep.subr.mxu1 %v5102_v9  ;;  %v2923_v9 = vsub.s32 3, %v8938_v19  ;;  %v4888_v6 = vadd.f32 %v4887_v4, %v4845_v2  ;;  %v5300_v4 = vld [vmem:[%s9212_s7 + $0x8] sm:$0xff] }
 0x55a   :  { %5991 = vmatpush3.msra.mxu1 %v5086_v42  ;;  %v4889_v5 = vpop.f32.mrf.mxu1 }
 0x55b   :  { %5992 = vmatprep.subr.mxu1 %v5101_v55  ;;  %v2924_v20 = vrot.slane %v8950_v25, %v2923_v9 }
 0x55c   :  { %5993 = vmatpush3.msra.mxu1 %v5085_v33  ;;  %v4891_v12 = vpop.f32.mrf.mxu1 }
 0x55d   :  { %5994 = vmatprep.subr.mxu1 %v5100_v63  ;;  %v4847_v24 = vadd.f32 %v4846_v61, %v2924_v20  ;;  %v4849_v63 = vadd.f32 %v4848_v62, %v2920_v52  ;;  %v4851_v56 = vadd.f32 %v4850_v38, %v2924_v20  ;;  %v5303_v61 = vld [vmem:[%s9212_s7 + $0x20] sm:$0xff]  ;;  %v5302_v62 = vld [vmem:[%s9212_s7 + $0x18] sm:$0xff]  ;;  %v5301_v38 = vld [vmem:[%s9212_s7 + $0x10] sm:$0xff] }
 0x55e   :  { %5995 = vmatpush3.msra.mxu1 %v5084_v51  ;;  %v4893_v41 = vpop.f32.mrf.mxu1 }
 0x55f   :  { %5996 = vmatprep.subr.mxu1 %v5099_v13  ;;  %v4890_v57 = vadd.f32 %v4889_v5, %v4847_v24  ;;  %v4892_v3 = vadd.f32 %v4891_v12, %v4849_v63  ;;  %v4894_v16 = vadd.f32 %v4893_v41, %v4851_v56  ;;  %v5299_v5 = vld [vmem:[%s9212_s7] sm:$0xff]  ;;  %v6900_v63 = vmov 1  }
 0x560   :  { %5997 = vmatpush3.msra.mxu1 %v5083_v40  ;;  %6119 = vset.pattern.permute.xlu0 %v6900_v63 }
 0x561   :  { %5998 = vmatprep.subr.mxu1 %v5098_v29 }
 0x562   :  { %5999 = vmatpush3.msra.mxu1 %v5082_v35 }
 0x563   :  { %6000 = vmatprep.subr.mxu1 %v5097_v34 }
 0x564   :  { %6001 = vmatpush3.msra.mxu1 %v5081_v30 }
 0x565   :  { %6002 = vmatprep.subr.mxu1 %v5096_v26 }
 0x566   :  { %6003 = vmatpush3.msra.mxu1 %v5080_v39 }
 0x567   :  { %6004 = vmatprep.subr.mxu1 %v5095_v43 }
 0x568   :  { %6005 = vmatpush3.msra.mxu1 %v5079_v44 }
 0x569   :  { %6006 = vmatprep.subr.mxu1 %v5094_v48 }
 0x56a   :  { %6007 = vmatpush3.msra.mxu1 %v5078_v45 }
 0x56b   :  { %6008 = vmatprep.subr.mxu1 %v5093_v50 }
 0x56c   :  { %6009 = vmatpush3.msra.mxu1 %v5077_v53 }
 0x56d   :  { %6010 = vmatprep.subr.mxu1 %v5092_v54 }
 0x56e   :  { %6011 = vmatpush3.msra.mxu1 %v5076_v36 }
 0x56f   :  { %5212 = vmatmul.mubr.f32.vlgmr.msra.gmra.mxu1 %v6870_v46  ;;  %6074 = vmatprep.subr.mxu1 %v5314_v59 }
 0x570   :  { %5216 = vmatprep.mubr.f32.mxu1 %v6872_v1  ;;  %6075 = vmatpush3.msra.mxu1 %v5314_v59  ;;  %v5310_v1 = vld [vmem:[%s9212_s7 + $0x58] sm:$0xff]  ;;  %v5308_v59 = vld [vmem:[%s9212_s7 + $0x48] sm:$0xff] }
 0x571   :  { %6076 = vmatprep.subr.mxu1 %v5313_v15 }
 0x572   :  { %6077 = vmatpush3.msra.mxu1 %v5313_v15  ;;  %v5307_v15 = vld [vmem:[%s9212_s7 + $0x40] sm:$0xff] }
 0x573   :  { %5217 = vmatmul.mubr.f32.gmra.mxu1 %v6874_v58  ;;  %6078 = vmatprep.subr.mxu1 %v5312_v47  ;;  %v5309_v58 = vld [vmem:[%s9212_s7 + $0x50] sm:$0xff] }
 0x574   :  { %6079 = vmatpush3.msra.mxu1 %v5312_v47  ;;  %v5306_v47 = vld [vmem:[%s9212_s7 + $0x38] sm:$0xff] }
 0x575   :  { %6080 = vmatprep.subr.mxu1 %v5311_v7 }
 0x576   :  { %6081 = vmatpush3.msra.mxu1 %v5311_v7  ;;  %v5305_v7 = vld [vmem:[%s9212_s7 + $0x30] sm:$0xff] }
 0x577   :  { %6082 = vmatprep.subr.mxu1 %v5310_v1 }
 0x578   :  { %6083 = vmatpush3.msra.mxu1 %v5310_v1 }
 0x579   :  { %6084 = vmatprep.subr.mxu1 %v5309_v58 }
 0x57a   :  { %6085 = vmatpush3.msra.mxu1 %v5309_v58 }
 0x57b   :  { %6086 = vmatprep.subr.mxu1 %v5308_v59 }
 0x57c   :  { %6087 = vmatpush3.msra.mxu1 %v5308_v59 }
 0x57d   :  { %6088 = vmatprep.subr.mxu1 %v5307_v15 }
 0x57e   :  { %6089 = vmatpush3.msra.mxu1 %v5307_v15 }
 0x57f   :  { %6090 = vmatprep.subr.mxu1 %v5306_v47 }
 0x580   :  { %6091 = vmatpush3.msra.mxu1 %v5306_v47 }
 0x581   :  { %6092 = vmatprep.subr.mxu1 %v5305_v7 }
 0x582   :  { %6093 = vmatpush3.msra.mxu1 %v5305_v7 }
 0x583   :  { %6094 = vmatprep.subr.mxu1 %v5304_v60 }
 0x584   :  { %6095 = vmatpush3.msra.mxu1 %v5304_v60 }
 0x585   :  { %6096 = vmatprep.subr.mxu1 %v5303_v61 }
 0x586   :  { %6097 = vmatpush3.msra.mxu1 %v5303_v61 }
 0x587   :  { %v4930_v8 = vpop.f32.mrf.mxu1  ;;  %6098 = vmatprep.subr.mxu1 %v5302_v62 }
 0x588   :  { %v4931_v27 = vadd.f32 %v4930_v8, %v4888_v6  ;;  %6099 = vmatpush3.msra.mxu1 %v5302_v62 }
 0x589   :  { %v4932_v22 = vpop.f32.mrf.mxu1  ;;  %6100 = vmatprep.subr.mxu1 %v5301_v38 }
 0x58a   :  { %v4933_v51 = vadd.f32 %v4932_v22, %v4890_v57  ;;  %6101 = vmatpush3.msra.mxu1 %v5301_v38  ;;  %v6899_v57 = vmov 2  }
 0x58b   :  { %v4934_v10 = vpop.f32.mrf.mxu1  ;;  %6102 = vmatprep.subr.mxu1 %v5300_v4  ;;  %6120 = vset.pattern.permute.xlu1 %v6899_v57 }
 0x58c   :  { %v4935_v40 = vadd.f32 %v4934_v10, %v4892_v3  ;;  %6103 = vmatpush3.msra.mxu1 %v5300_v4  ;;  %v5976_v10 = vld [vmem:[%s9213_s6] ss:$0 sm:$0xff] }
 0x58d   :  { %v4936_v11 = vpop.f32.mrf.mxu1  ;;  %6104 = vmatprep.subr.mxu1 %v5299_v5 }
 0x58e   :  { %v4937_v29 = vadd.f32 %v4936_v11, %v4894_v16  ;;  %6105 = vmatpush3.msra.mxu1 %v5299_v5  ;;  %v5399_v16 = vld [vmem:[%s9215_s1] sm:$0xff] }
 0x5c7   :  { %v4973_v49 = vpop.f32.mrf.mxu1 }
 0x5c8   :  { %v4974_v13 = vadd.f32 %v4973_v49, %v4931_v27  ;;  %v5977_v27 = vld [vmem:[%s9214_s8] ss:$0 sm:$0xff] }
 0x5c9   :  { %v4975_v28 = vpop.f32.mrf.mxu1 }
 0x5ca   :  { %v4976_v31 = vadd.f32 %v4975_v28, %v4933_v51 }
 0x5cb   :  { %v4977_v37 = vpop.f32.mrf.mxu1 }
 0x5cc   :  { %v4978_v35 = vadd.f32 %v4977_v37, %v4935_v40 }
 0x5cd   :  { %v4979_v42 = vpop.f32.mrf.mxu1 }
 0x5ce   :  { %v4980_v30 = vadd.f32 %v4979_v42, %v4937_v29 }
 0x607   :  { %v5016_v55 = vpop.f32.mrf.mxu1 }
 0x608   :  { %v5017_v17 = vadd.f32 %v5016_v55, %v4974_v13  ;;  %v5400_v13 = vld [vmem:[%s9215_s1 + $0x8] sm:$0xff] }
 0x609   :  { %v5018_v33 = vpop.f32.mrf.mxu1 }
 0x60a   :  { %v5019_v32 = vadd.f32 %v5018_v33, %v4976_v31 }
 0x60b   :  { %v5020_v21 = vpop.f32.mrf.mxu1 }
 0x60c   :  { %v5021_v39 = vadd.f32 %v5020_v21, %v4978_v35 }
 0x60d   :  { %v5022_v19 = vpop.f32.mrf.mxu1 }
 0x60e   :  { %v5023_v44 = vadd.f32 %v5022_v19, %v4980_v30 }
 0x60f   :  { %v5059_v25 = vpop.f32.mrf.mxu1 }
 0x610   :  { %v5060_v34 = vadd.f32 %v5059_v25, %v5017_v17  ;;  %v5978_v17 = vld [vmem:[%s9216_s9] ss:$0 sm:$0xff] }
 0x611   :  { %v5061_v23 = vpop.f32.mrf.mxu1 }
 0x612   :  { %v5062_v26 = vadd.f32 %v5061_v23, %v5019_v32 }
 0x613   :  { %v5063_v43 = vpop.f32.mrf.mxu1 }
 0x614   :  { %6875 = vtanh.f32 %v5062_v26  ;;  %v5064_v48 = vadd.f32 %v5063_v43, %v5021_v39  ;;  %v5979_v26 = vld [vmem:[%s9217_s10] ss:$0 sm:$0xff] }
 0x615   :  { %6877 = vtanh.f32 %v5060_v34  ;;  %v5065_v45 = vpop.f32.mrf.mxu1 }
 0x616   :  { %v5066_v50 = vadd.f32 %v5065_v45, %v5023_v44 }
 0x618   :  { %6879 = vtanh.f32 %v5066_v50 }
 0x619   :  { %6881 = vtanh.f32 %v5064_v48 }
 0x621   :  { %v6876_v53 = vpop.eup %6875 }
 0x622   :  { %v6878_v54 = vpop.eup %6877  ;;  %5286 = vmatprep.mubr.f32.mxu0 %v6876_v53 }
 0x623   :  { %5287 = vmatmul.mubr.f32.vlgmr.msra.gmra.mxu0 %v6878_v54  ;;  %v5433_v54 = vand.u32 127, %v2909_v14 }
 0x625   :  { %v6880_v36 = vpop.eup %6879  ;;  %vm5436_vm9 = vcmp.eq.s32.totalorder %v5433_v54, 2  ;;  %vm5435_vm10 = vcmp.eq.s32.totalorder %v5433_v54, 1  ;;  %vm5434_vm11 = vcmp.eq.s32.totalorder %v5433_v54, 0 }
 0x626   :  { %v6882_v46 = vpop.eup %6881  ;;  %5291 = vmatprep.mubr.f32.mxu0 %v6880_v36 }
 0x627   :  { %5292 = vmatmul.mubr.f32.gmra.mxu0 %v6882_v46 }
 0x62f   :  { %v6012_v12 = vpop.f32.mrf.mxu1 }
 0x631   :  { %v6013_v41 = vpop.f32.mrf.mxu1 }
 0x632   :  { %v6014_v22 = vadd.f32 %v6013_v41, %v6012_v12 }
 0x633   :  { %v6015_v8 = vpop.f32.mrf.mxu1 }
 0x634   :  { %v5214_v18 = vadd.f32 %v6014_v22, %v5976_v10 }
 0x635   :  { %v6016_v11 = vpop.f32.mrf.mxu1 }
 0x636   :  { %v6017_v9 = vadd.f32 %v6016_v11, %v6015_v8 }
 0x638   :  { %v5219_v2 = vadd.f32 %v6017_v9, %v5976_v10 }
 0x6e3   :  { %v6050_v49 = vpop.f32.mrf.mxu0 }
 0x6e5   :  { %v6051_v28 = vpop.f32.mrf.mxu0 }
 0x6e6   :  { %v6052_v37 = vadd.f32 %v6051_v28, %v6050_v49 }
 0x6e7   :  { %v6053_v52 = vpop.f32.mrf.mxu0 }
 0x6e8   :  { %v5289_v20 = vadd.f32 %v6052_v37, %v5214_v18 }
 0x6e9   :  { %v6054_v42 = vpop.f32.mrf.mxu0 }
 0x6ea   :  { %6883 = vtanh.f32 %v5289_v20  ;;  %v6055_v55 = vadd.f32 %v6054_v42, %v6053_v52 }
 0x6ec   :  { %v5294_v24 = vadd.f32 %v6055_v55, %v5219_v2 }
 0x6ee   :  { %6885 = vtanh.f32 %v5294_v24 }
 0x6f7   :  { %v6884_v6 = vpop.eup %6883 }
 0x6f8   :  { %6106 = vmatprep.mubr.f32.mxu1 %v6884_v6 }
 0x6fb   :  { %v6886_v33 = vpop.eup %6885 }
 0x6fc   :  { %6107 = vmatmul.mubr.f32.vlgmr.msra.gmra.mxu1 %v6886_v33 }
 0x7bc   :  { %v6108_v21 = vpop.f32.mrf.mxu1 }
 0x7bd   :  { %v5394_v56 = vadd.f32 %v6108_v21, %v5977_v27 }
 0x7be   :  { %v5388_v51 = vpop.f32.mrf.mxu1 }
 0x7bf   :  { %6887 = vtanh.f32 %v5394_v56  ;;  %v5389_v3 = vadd.f32 %v5977_v27, %v5388_v51 }
 0x7c1   :  { %6889 = vtanh.f32 %v5389_v3 }
 0x7cc   :  { %v6888_v19 = vpop.eup %6887 }
 0x7cd   :  { %v5402_v31 = vsub.f32 %v5400_v13, %v6888_v19 }
 0x7ce   :  { %v6890_v40 = vpop.eup %6889 }
 0x7cf   :  { %v5404_v25 = vmul.f32 %v5402_v31, %v5402_v31  ;;  %v5401_v29 = vsub.f32 %v5399_v16, %v6890_v40 }
 0x7d1   :  { %v5413_v32 = vmul.f32 %v5978_v17, %v5404_v25  ;;  %v5403_v35 = vmul.f32 %v5401_v29, %v5401_v29 }
 0x7d3   :  { %v5418_v34 = vsel %vm5414_vm8, %v5413_v32, 0.0  ;;  %v5412_v23 = vmul.f32 %v5978_v17, %v5403_v35 }
 0x7d4   :  { %5419 = vadd.xlane.f32.xlu1 %v5418_v34 }
 0x7d5   :  { %v5415_v30 = vsel %vm5414_vm8, %v5412_v23, 0.0 }
 0x7d6   :  { %5416 = vadd.xlane.f32.xlu0 %v5415_v30 }
 0x7e5   :  { %5444 = vperm.xlu1 %6120, %v5389_v3  }
 0x7e9   :  { %5449 = vperm.xlu1 %6120, %v5394_v56  }
 0x7ec   :  { %5438 = vperm.xlu0 %6119, %v5979_v26  }
 0x7ed   :  { %6121 = vset.pattern.permute.xlu1 %v6891_v0 }
 0x7f0   :  { %6122 = vset.pattern.permute.xlu0 %v6891_v0 }
 0x85d   :  { %v5420_v39 = vpop.xlane.xlu1 %5419 }
 0x85e   :  { %v5423_v48 = vmul.f32 0.5, %v5420_v39 }
 0x85f   :  { %v5417_v43 = vpop.xlane.xlu0 %5416 }
 0x860   :  { %v5422_v44 = vmul.f32 0.5, %v5417_v43  ;;  %v5431_v50 = vsub.f32 %v5979_v26, %v5423_v48 }
 0x861   :  { %v5445_v53 = vpop.permute.xlu1 %5444 }
 0x862   :  { %v5430_v45 = vsub.f32 %v5979_v26, %v5422_v44 }
 0x864   :  { %5456 = vperm.xlu1 %6121, %v5430_v45  }
 0x865   :  { %v5450_v46 = vpop.permute.xlu1 %5449 }
 0x867   :  { %v5439_v36 = vpop.permute.xlu0 %5438 }
 0x868   :  { %5461 = vperm.xlu1 %6121, %v5431_v50   ;;  %v5441_v1 = vsel %vm5436_vm9, %v5439_v36, 0.0 }
 0x869   :  { %v5452_v58 = vsel %vm5435_vm10, %v5445_v53, %v5441_v1  ;;  %v5453_v15 = vsel %vm5435_vm10, %v5450_v46, %v5441_v1 }
 0x8df   :  { %v5457_v59 = vpop.permute.xlu1 %5456 }
 0x8e0   :  { %v5464_v0 = vsel %vm5434_vm11, %v5457_v59, %v5452_v58 }
 0x8e1   :  { %5466 = vst [vmem:[%s9218_s11] sm:$0xff] %v5464_v0 }
 0x8e3   :  { %v5462_v47 = vpop.permute.xlu1 %5461 }
 0x8e4   :  { %v5465_v7 = vsel %vm5434_vm11, %v5462_v47, %v5453_v15 }
 0x8e5   :  { %5467 = vst [vmem:[%s9218_s11 + $0x8] sm:$0xff] %v5465_v7 }

</bundles_post_ra>
